<compile_context>
chip_gen: v7x
topology: tpu7x:2x2x1
jax: 0.10.0
libtpu: 0.0.40
codegen_flags: <defaults>
</compile_context>

<pallas_src>
import functools

import jax
import jax.numpy as jnp
from jax.experimental import pallas as pl
from jax.experimental.pallas import tpu as pltpu


def make_divisible(v, divisor, min_value=None):
    if min_value is None:
        min_value = divisor
    new_v = max(min_value, int(v + divisor / 2) // divisor * divisor)
    if new_v < 0.9 * v:
        new_v += divisor
    return new_v


def _hardswish(x):
    return x * jnp.clip(x + 3.0, 0.0, 6.0) * (1.0 / 6.0)


def _hardsigmoid(x):
    return jnp.clip(x + 3.0, 0.0, 6.0) * (1.0 / 6.0)


# ------------------------------ fused kernel ------------------------------- #

def _fused_block_kernel(x_ref, w_exp_ref, b1_ref,
                        w_dw_ref, b2_ref,
                        se_w1_ref, se_b1_ref, se_w2_ref, se_b2_ref,
                        w_proj_ref, b3_ref,
                        o_ref, hid_ref,
                        *, K, pad, padw, use_se, use_hardswish):
    """expand(1x1,BN1-folded) -> act -> depthwise KxK(BN2-folded) -> SE -> act
       -> project(1x1,BN3-folded).  The hidden activation lives only in VMEM scratch."""
    _, H, W, Cin = x_ref.shape
    Chid = w_exp_ref.shape[1]
    Cout = w_proj_ref.shape[1]
    Hp, Wps, _ = hid_ref.shape
    Ho, Wo = H, W                                   # stride == 1 only

    # ---- Stage 1: 1x1 pointwise expand (BN1 scale folded into weights) + bias + act ----
    x = x_ref[0]                                    # (H, W, Cin)
    w_e = w_exp_ref[...]                            # (Cin, Chid), possibly bf16
    if Cin <= 16:
        # Tiny Cin: VPU broadcast-FMA over Cin (a K=Cin MXU dot wastes the systolic depth).
        y = x[:, :, 0:1] * w_e[0:1, :]
        for c in range(1, Cin):
            y = y + x[:, :, c:c + 1] * w_e[c:c + 1, :]
    else:
        # Production channel counts: route through the MXU (bf16 operands if requested).
        y = jnp.dot(x.reshape(H * W, Cin).astype(w_e.dtype), w_e,
                    preferred_element_type=jnp.float32).reshape(H, W, Chid)
    y = y + b1_ref[...]                             # folded BN1 bias
    y = _hardswish(y) if use_hardswish else jnp.maximum(y, 0.0)

    # ---- Zero only the halo strips the depthwise taps read (NOT the full scratch). ----
    # Outer halo columns beyond `pad` are loaded but sliced away after the roll, so they
    # may stay uninitialised.  Done every step (not pl.when(pid==0)) so a megacore-split
    # "parallel" batch axis with per-core scratch stays correct.
    if pad > 0:
        hdt = hid_ref.dtype
        hid_ref[0:pad, padw:padw + W, :] = jnp.zeros((pad, W, Chid), hdt)
        hid_ref[pad + H:Hp, padw:padw + W, :] = jnp.zeros((Hp - pad - H, W, Chid), hdt)
        hid_ref[:, padw - pad:padw, :] = jnp.zeros((Hp, pad, Chid), hdt)
        hid_ref[:, padw + W:padw + W + pad, :] = jnp.zeros((Hp, pad, Chid), hdt)

    # Interior write: padw is a multiple of 8, so this is a sublane-aligned block store.
    hid_ref[pad:pad + H, padw:padw + W, :] = y.astype(hid_ref.dtype)

    # ---- Stage 2: depthwise KxK conv (stride 1), BN2 scale folded into the tap weights ----
    wdw = w_dw_ref[...].reshape(K * K, Chid)        # leading-dim merge: layout-free
    # Single aligned load of the padded slab; upcast once so rolls / FMAs run in f32 even
    # when the scratch is stored in bf16.
    h_all = hid_ref[...].astype(jnp.float32)        # (Hp, Wps, Chid)
    acc = None
    for kw in range(K):
        shift = pad - kw
        # kw shift via XLU roll (free slot here) instead of a sublane-unaligned slice; the
        # circular wrap lands in halo columns that the aligned interior slice excludes.
        shifted = h_all if shift == 0 else pltpu.roll(h_all, shift=shift % Wps, axis=1)
        win = shifted[:, padw:padw + W, :]          # aligned sublane slice (start % 8 == 0)
        for kh in range(K):
            wk = wdw[kh * K + kw:kh * K + kw + 1, :]        # (1, Chid)
            tap = win[kh:kh + Ho]                   # leading-axis slice: no relayout
            term = tap * wk
            acc = term if acc is None else acc + term
    # NOTE: reshape is layout-free when Wo % 8 == 0 (test shapes); otherwise still correct.
    y2 = acc.reshape(Ho * Wo, Chid) + b2_ref[...]   # folded BN2 bias

    # ---- Stage 3: Squeeze-and-Excite (optional; reference applies it BEFORE the act) ----
    if use_se:
        pooled = jnp.sum(y2, axis=0, keepdims=True) * (1.0 / (Ho * Wo))     # (1, Chid)
        h = jnp.dot(pooled, se_w1_ref[...], preferred_element_type=jnp.float32) + se_b1_ref[...]
        h = jnp.maximum(h, 0.0)
        gate = _hardsigmoid(
            jnp.dot(h, se_w2_ref[...], preferred_element_type=jnp.float32) + se_b2_ref[...])
        y2 = y2 * gate                              # broadcast (1, Chid) over spatial

    # ---- Stage 4: activation + 1x1 project conv (BN3 scale folded) + bias ----
    y3 = _hardswish(y2) if use_hardswish else jnp.maximum(y2, 0.0)
    w_p = w_proj_ref[...]
    out = jnp.dot(y3.astype(w_p.dtype), w_p,
                  preferred_element_type=jnp.float32)               # (Ho*Wo, Cout)
    out = out + b3_ref[...]                         # folded BN3 bias
    o_ref[...] = out.reshape(1, Ho, Wo, Cout)


# -------------------------------- wrapper ---------------------------------- #

def inverted_residual_block(x_nchw, params, *, kernel_size, stride, use_se, use_hardswish,
                            matmul_dtype=jnp.float32, hidden_dtype=jnp.float32):
    """matmul_dtype / hidden_dtype: pass jnp.bfloat16 on v6e/v7x for the bf16-native MXU /
    half-size hidden scratch; keep f32 on v5e (no bf16 VALU) and for reference fidelity."""
    assert stride == 1, "TODO(synk): only stride=1 depthwise conv is implemented"
    assert kernel_size % 2 == 1, "odd depthwise kernel expected (MobileNetV3 uses 3/5/7)"
    N, Cin, H, W = x_nchw.shape
    x = jnp.transpose(x_nchw, (0, 2, 3, 1)).astype(jnp.float32)      # NCHW -> NHWC (glue)
    Chid = params["w_expand"].shape[1]
    Cout = params["w_proj"].shape[1]
    se_dim = params["se_w1"].shape[1]
    K = kernel_size
    pad = (K - 1) // 2
    padw = ((pad + 7) // 8) * 8 if pad > 0 else 0    # round W-halo up to a sublane tile
    Hp = H + 2 * pad
    Wps = W + 2 * padw
    Ho, Wo = H, W

    # Fold the eval-mode BN *scales* into the conv weights (biases stay separate); pre-cast
    # the matmul weights so no per-grid-step cast happens in-kernel.  SE weights stay f32
    # (tiny M=1 dots; robust lowering).
    w_expand = (params["w_expand"] * params["bn1_scale"]).astype(matmul_dtype)
    b1 = params["bn1_bias"]
    w_dw = (params["w_dw"] * params["bn2_scale"].reshape(1, 1, Chid)).astype(jnp.float32)
    b2 = params["bn2_bias"]
    w_proj = (params["w_proj"] * params["bn3_scale"]).astype(matmul_dtype)
    b3 = params["bn3_bias"]
    se_w1, se_b1 = params["se_w1"], params["se_b1"]
    se_w2, se_b2 = params["se_w2"], params["se_b2"]

    # VMEM budget from the actual footprint (scratch + double-buffered blocks/weights +
    # headroom for in-kernel temporaries), capped below v7x's 64 MiB physical VMEM.
    def _nbytes(a):
        return int(a.size) * a.dtype.itemsize
    scratch_bytes = Hp * Wps * Chid * jnp.dtype(hidden_dtype).itemsize
    x_block_bytes = H * W * Cin * 4
    out_block_bytes = Ho * Wo * Cout * 4
    weight_bytes = sum(_nbytes(a) for a in
                       (w_expand, b1, w_dw, b2, se_w1, se_b1, se_w2, se_b2, w_proj, b3))
    temps_bytes = 6 * Hp * Wps * Chid * 4 + 4 * H * W * max(Chid, Cout) * 4
    footprint = scratch_bytes + 2 * (x_block_bytes + out_block_bytes + weight_bytes) + temps_bytes
    vmem_limit = int(min(max(2 * footprint, 16 * 1024 * 1024), 56 * 1024 * 1024))

    kernel = functools.partial(
        _fused_block_kernel, K=K, pad=pad, padw=padw,
        use_se=use_se, use_hardswish=use_hardswish)

    # TODO(synk): add a row-block grid axis with a (K-1)-row halo (two-pass when use_se)
    #             for production H*W; whole-image blocks are fine at the test shapes.
    out = pl.pallas_call(
        kernel,
        out_shape=jax.ShapeDtypeStruct((N, Ho, Wo, Cout), jnp.float32),
        grid=(N,),
        in_specs=[
            pl.BlockSpec((1, H, W, Cin), lambda b: (b, 0, 0, 0)),    # x
            pl.BlockSpec((Cin, Chid), lambda b: (0, 0)),             # w_expand (BN1-folded)
            pl.BlockSpec((1, Chid), lambda b: (0, 0)),               # bn1 bias
            pl.BlockSpec((K, K, Chid), lambda b: (0, 0, 0)),         # w_dw (BN2-folded)
            pl.BlockSpec((1, Chid), lambda b: (0, 0)),               # bn2 bias
            pl.BlockSpec((Chid, se_dim), lambda b: (0, 0)),          # se_w1
            pl.BlockSpec((1, se_dim), lambda b: (0, 0)),             # se_b1
            pl.BlockSpec((se_dim, Chid), lambda b: (0, 0)),          # se_w2
            pl.BlockSpec((1, Chid), lambda b: (0, 0)),               # se_b2
            pl.BlockSpec((Chid, Cout), lambda b: (0, 0)),            # w_proj (BN3-folded)
            pl.BlockSpec((1, Cout), lambda b: (0, 0)),               # bn3 bias
        ],
        out_specs=pl.BlockSpec((1, Ho, Wo, Cout), lambda b: (b, 0, 0, 0)),
        scratch_shapes=[pltpu.VMEM((Hp, Wps, Chid), hidden_dtype)],  # padded hidden act
        compiler_params=pltpu.CompilerParams(
            dimension_semantics=("parallel",),       # batch axis may feed both v7x TCs
            vmem_limit_bytes=vmem_limit,
        ),
    )(x, w_expand, b1, w_dw, b2, se_w1, se_b1, se_w2, se_b2, w_proj, b3)

    # NOTE: PyTorch module's `self.identity` is always False (builtin-`input` bug),
    # so no residual add here.
    return jnp.transpose(out, (0, 3, 1, 2))                          # NHWC -> NCHW (glue)


# ----------------------- deterministic parameter init ---------------------- #

def init_params(key, inputs, hidden_dims, outputs, kernel_size):
    se_dim = make_divisible(hidden_dims // 4, 8)
    ks = jax.random.split(key, 10)

    def bn_fold(k, c):
        kg, kb, km, kv = jax.random.split(k, 4)
        gamma = 1.0 + 0.1 * jax.random.normal(kg, (c,))
        beta = 0.1 * jax.random.normal(kb, (c,))
        mean = 0.1 * jax.random.normal(km, (c,))
        var = 1.0 + 0.1 * jax.random.uniform(kv, (c,))
        scale = gamma / jnp.sqrt(var + 1e-5)
        bias = beta - mean * scale
        return (scale.reshape(1, c).astype(jnp.float32),
                bias.reshape(1, c).astype(jnp.float32))

    p = {}
    # 1x1 expand conv: torch weight (Chid, Cin, 1, 1) -> matmul (Cin, Chid)
    p["w_expand"] = (0.3 * jax.random.normal(ks[0], (inputs, hidden_dims))).astype(jnp.float32)
    p["bn1_scale"], p["bn1_bias"] = bn_fold(ks[1], hidden_dims)
    # depthwise conv: torch weight (Chid, 1, K, K) -> (K, K, Chid)
    p["w_dw"] = (0.3 * jax.random.normal(
        ks[2], (kernel_size, kernel_size, hidden_dims))).astype(jnp.float32)
    p["bn2_scale"], p["bn2_bias"] = bn_fold(ks[3], hidden_dims)
    # SE: Linear(Chid, se_dim), Linear(se_dim, Chid) -> pre-transposed for x @ W
    p["se_w1"] = (0.3 * jax.random.normal(ks[4], (hidden_dims, se_dim))).astype(jnp.float32)
    p["se_b1"] = (0.1 * jax.random.normal(ks[5], (1, se_dim))).astype(jnp.float32)
    p["se_w2"] = (0.3 * jax.random.normal(ks[6], (se_dim, hidden_dims))).astype(jnp.float32)
    p["se_b2"] = (0.1 * jax.random.normal(ks[7], (1, hidden_dims))).astype(jnp.float32)
    # 1x1 project conv: torch weight (Cout, Chid, 1, 1) -> matmul (Chid, Cout)
    p["w_proj"] = (0.3 * jax.random.normal(ks[8], (hidden_dims, outputs))).astype(jnp.float32)
    p["bn3_scale"], p["bn3_bias"] = bn_fold(ks[9], outputs)
    return p


if __name__ == "__main__":
    INPUTS, HIDDEN, OUTPUTS = 4, 16, 8
    KSIZE, STRIDE = 3, 1
    USE_SE, USE_HSWISH = True, True

    key = jax.random.PRNGKey(0)
    kx, kp = jax.random.split(key)
    x = jax.random.normal(kx, (2, INPUTS, 16, 16), dtype=jnp.float32)   # NCHW input
    params = init_params(kp, INPUTS, HIDDEN, OUTPUTS, KSIZE)

    out = inverted_residual_block(x, params, kernel_size=KSIZE, stride=STRIDE,
                                  use_se=USE_SE, use_hardswish=USE_HSWISH)
    out = jax.block_until_ready(out)
    assert out.shape == (2, OUTPUTS, 16, 16) and out.dtype == jnp.float32
    print("KERNEL_OK")
</pallas_src>

<mosaic_0001>
module attributes {stable_mosaic.version = 11 : i64} {
  func.func @_fused_block_kernel(%arg0: i32, %arg1: memref<1x16x16x4xf32, #tpu.memory_space<vmem>>, %arg2: memref<4x16xf32, #tpu.memory_space<vmem>>, %arg3: memref<1x16xf32, #tpu.memory_space<vmem>>, %arg4: memref<3x3x16xf32, #tpu.memory_space<vmem>>, %arg5: memref<1x16xf32, #tpu.memory_space<vmem>>, %arg6: memref<16x8xf32, #tpu.memory_space<vmem>>, %arg7: memref<1x8xf32, #tpu.memory_space<vmem>>, %arg8: memref<8x16xf32, #tpu.memory_space<vmem>>, %arg9: memref<1x16xf32, #tpu.memory_space<vmem>>, %arg10: memref<16x8xf32, #tpu.memory_space<vmem>>, %arg11: memref<1x8xf32, #tpu.memory_space<vmem>>, %arg12: memref<1x16x16x8xf32, #tpu.memory_space<vmem>>, %arg13: memref<18x32x16xf32, #tpu.memory_space<vmem>>) attributes {dimension_semantics = [#tpu.dimension_semantics<parallel>], iteration_bounds = array<i64: 2>, scalar_prefetch = 0 : i64, scratch_operands = 1 : i64, tpu.core_type = #tpu.core_type<tc>, window_params = [{transform_indices = @transform_0, window_bounds = array<i64: 1, 16, 16, 4>}, {pipeline_mode = #tpu.pipeline_mode<synchronous>, transform_indices = @transform_1, window_bounds = array<i64: 4, 16>}, {pipeline_mode = #tpu.pipeline_mode<synchronous>, transform_indices = @transform_2, window_bounds = array<i64: 1, 16>}, {pipeline_mode = #tpu.pipeline_mode<synchronous>, transform_indices = @transform_3, window_bounds = array<i64: 3, 3, 16>}, {pipeline_mode = #tpu.pipeline_mode<synchronous>, transform_indices = @transform_4, window_bounds = array<i64: 1, 16>}, {pipeline_mode = #tpu.pipeline_mode<synchronous>, transform_indices = @transform_5, window_bounds = array<i64: 16, 8>}, {pipeline_mode = #tpu.pipeline_mode<synchronous>, transform_indices = @transform_6, window_bounds = array<i64: 1, 8>}, {pipeline_mode = #tpu.pipeline_mode<synchronous>, transform_indices = @transform_7, window_bounds = array<i64: 8, 16>}, {pipeline_mode = #tpu.pipeline_mode<synchronous>, transform_indices = @transform_8, window_bounds = array<i64: 1, 16>}, {pipeline_mode = #tpu.pipeline_mode<synchronous>, transform_indices = @transform_9, window_bounds = array<i64: 16, 8>}, {pipeline_mode = #tpu.pipeline_mode<synchronous>, transform_indices = @transform_10, window_bounds = array<i64: 1, 8>}, {transform_indices = @transform_11, window_bounds = array<i64: 1, 16, 16, 8>}]} {
    %c0 = arith.constant 0 : index
    %c0_0 = arith.constant 0 : index
    %c0_1 = arith.constant 0 : index
    %c0_2 = arith.constant 0 : index
    %0 = vector.load %arg1[%c0, %c0_0, %c0_1, %c0_2] : memref<1x16x16x4xf32, #tpu.memory_space<vmem>>, vector<1x16x16x4xf32>
    %1 = vector.shape_cast %0 : vector<1x16x16x4xf32> to vector<16x16x4xf32>
    %c0_3 = arith.constant 0 : index
    %c0_4 = arith.constant 0 : index
    %2 = vector.load %arg2[%c0_3, %c0_4] : memref<4x16xf32, #tpu.memory_space<vmem>>, vector<4x16xf32>
    %3 = vector.extract_strided_slice %1 {offsets = [0, 0, 0], sizes = [16, 16, 1], strides = [1, 1, 1]} : vector<16x16x4xf32> to vector<16x16x1xf32>
    %4 = vector.extract_strided_slice %2 {offsets = [0, 0], sizes = [1, 16], strides = [1, 1]} : vector<4x16xf32> to vector<1x16xf32>
    %5 = vector.shape_cast %4 : vector<1x16xf32> to vector<1x1x16xf32>
    %6 = vector.broadcast %3 : vector<16x16x1xf32> to vector<16x16x16xf32>
    %7 = vector.broadcast %5 : vector<1x1x16xf32> to vector<16x16x16xf32>
    %8 = arith.mulf %6, %7 : vector<16x16x16xf32>
    %9 = vector.extract_strided_slice %1 {offsets = [0, 0, 1], sizes = [16, 16, 1], strides = [1, 1, 1]} : vector<16x16x4xf32> to vector<16x16x1xf32>
    %10 = vector.extract_strided_slice %2 {offsets = [1, 0], sizes = [1, 16], strides = [1, 1]} : vector<4x16xf32> to vector<1x16xf32>
    %11 = vector.shape_cast %10 : vector<1x16xf32> to vector<1x1x16xf32>
    %12 = vector.broadcast %9 : vector<16x16x1xf32> to vector<16x16x16xf32>
    %13 = vector.broadcast %11 : vector<1x1x16xf32> to vector<16x16x16xf32>
    %14 = arith.mulf %12, %13 : vector<16x16x16xf32>
    %15 = arith.addf %8, %14 : vector<16x16x16xf32>
    %16 = vector.extract_strided_slice %1 {offsets = [0, 0, 2], sizes = [16, 16, 1], strides = [1, 1, 1]} : vector<16x16x4xf32> to vector<16x16x1xf32>
    %17 = vector.extract_strided_slice %2 {offsets = [2, 0], sizes = [1, 16], strides = [1, 1]} : vector<4x16xf32> to vector<1x16xf32>
    %18 = vector.shape_cast %17 : vector<1x16xf32> to vector<1x1x16xf32>
    %19 = vector.broadcast %16 : vector<16x16x1xf32> to vector<16x16x16xf32>
    %20 = vector.broadcast %18 : vector<1x1x16xf32> to vector<16x16x16xf32>
    %21 = arith.mulf %19, %20 : vector<16x16x16xf32>
    %22 = arith.addf %15, %21 : vector<16x16x16xf32>
    %23 = vector.extract_strided_slice %1 {offsets = [0, 0, 3], sizes = [16, 16, 1], strides = [1, 1, 1]} : vector<16x16x4xf32> to vector<16x16x1xf32>
    %24 = vector.extract_strided_slice %2 {offsets = [3, 0], sizes = [1, 16], strides = [1, 1]} : vector<4x16xf32> to vector<1x16xf32>
    %25 = vector.shape_cast %24 : vector<1x16xf32> to vector<1x1x16xf32>
    %26 = vector.broadcast %23 : vector<16x16x1xf32> to vector<16x16x16xf32>
    %27 = vector.broadcast %25 : vector<1x1x16xf32> to vector<16x16x16xf32>
    %28 = arith.mulf %26, %27 : vector<16x16x16xf32>
    %29 = arith.addf %22, %28 : vector<16x16x16xf32>
    %c0_5 = arith.constant 0 : index
    %c0_6 = arith.constant 0 : index
    %30 = vector.load %arg3[%c0_5, %c0_6] : memref<1x16xf32, #tpu.memory_space<vmem>>, vector<1x16xf32>
    %31 = vector.shape_cast %30 : vector<1x16xf32> to vector<1x1x16xf32>
    %32 = vector.broadcast %31 : vector<1x1x16xf32> to vector<16x16x16xf32>
    %33 = arith.addf %29, %32 : vector<16x16x16xf32>
    %cst = arith.constant 3.000000e+00 : f32
    %34 = vector.broadcast %cst : f32 to vector<16x16x16xf32>
    %35 = arith.addf %33, %34 : vector<16x16x16xf32>
    %cst_7 = arith.constant 0.000000e+00 : f32
    %cst_8 = arith.constant 6.000000e+00 : f32
    %36 = vector.broadcast %cst_7 : f32 to vector<16x16x16xf32>
    %37 = arith.maximumf %36, %35 : vector<16x16x16xf32>
    %38 = vector.broadcast %cst_8 : f32 to vector<16x16x16xf32>
    %39 = arith.minimumf %38, %37 : vector<16x16x16xf32>
    %40 = arith.mulf %33, %39 : vector<16x16x16xf32>
    %cst_9 = arith.constant 0.166666672 : f32
    %41 = vector.broadcast %cst_9 : f32 to vector<16x16x16xf32>
    %42 = arith.mulf %40, %41 : vector<16x16x16xf32>
    %cst_10 = arith.constant 0.000000e+00 : f32
    %43 = vector.broadcast %cst_10 : f32 to vector<1x16x16xf32>
    %c0_11 = arith.constant 0 : index
    %c8 = arith.constant 8 : index
    %c0_12 = arith.constant 0 : index
    %44 = vector.load %arg13[%c0_11, %c8, %c0_12] : memref<18x32x16xf32, #tpu.memory_space<vmem>>, vector<1x16x16xf32>
    tpu.vector_store %arg13[%c0_11, %c8, %c0_12], %43 {strides = array<i32>} : memref<18x32x16xf32, #tpu.memory_space<vmem>>, vector<1x16x16xf32>,
    %cst_13 = arith.constant 0.000000e+00 : f32
    %45 = vector.broadcast %cst_13 : f32 to vector<1x16x16xf32>
    %c17 = arith.constant 17 : index
    %c8_14 = arith.constant 8 : index
    %c0_15 = arith.constant 0 : index
    %46 = vector.load %arg13[%c17, %c8_14, %c0_15] : memref<18x32x16xf32, #tpu.memory_space<vmem>>, vector<1x16x16xf32>
    tpu.vector_store %arg13[%c17, %c8_14, %c0_15], %45 {strides = array<i32>} : memref<18x32x16xf32, #tpu.memory_space<vmem>>, vector<1x16x16xf32>,
    %cst_16 = arith.constant 0.000000e+00 : f32
    %47 = vector.broadcast %cst_16 : f32 to vector<18x1x16xf32>
    %c0_17 = arith.constant 0 : index
    %c7 = arith.constant 7 : index
    %c0_18 = arith.constant 0 : index
    %48 = vector.load %arg13[%c0_17, %c7, %c0_18] : memref<18x32x16xf32, #tpu.memory_space<vmem>>, vector<18x1x16xf32>
    tpu.vector_store %arg13[%c0_17, %c7, %c0_18], %47 {strides = array<i32>} : memref<18x32x16xf32, #tpu.memory_space<vmem>>, vector<18x1x16xf32>,
    %cst_19 = arith.constant 0.000000e+00 : f32
    %49 = vector.broadcast %cst_19 : f32 to vector<18x1x16xf32>
    %c0_20 = arith.constant 0 : index
    %c24 = arith.constant 24 : index
    %c0_21 = arith.constant 0 : index
    %50 = vector.load %arg13[%c0_20, %c24, %c0_21] : memref<18x32x16xf32, #tpu.memory_space<vmem>>, vector<18x1x16xf32>
    tpu.vector_store %arg13[%c0_20, %c24, %c0_21], %49 {strides = array<i32>} : memref<18x32x16xf32, #tpu.memory_space<vmem>>, vector<18x1x16xf32>,
    %c1 = arith.constant 1 : index
    %c8_22 = arith.constant 8 : index
    %c0_23 = arith.constant 0 : index
    %51 = vector.load %arg13[%c1, %c8_22, %c0_23] : memref<18x32x16xf32, #tpu.memory_space<vmem>>, vector<16x16x16xf32>
    tpu.vector_store %arg13[%c1, %c8_22, %c0_23], %42 {strides = array<i32>} : memref<18x32x16xf32, #tpu.memory_space<vmem>>, vector<16x16x16xf32>,
    %c0_24 = arith.constant 0 : index
    %c0_25 = arith.constant 0 : index
    %c0_26 = arith.constant 0 : index
    %52 = vector.load %arg4[%c0_24, %c0_25, %c0_26] : memref<3x3x16xf32, #tpu.memory_space<vmem>>, vector<3x3x16xf32>
    %53 = vector.shape_cast %52 : vector<3x3x16xf32> to vector<9x16xf32>
    %c0_27 = arith.constant 0 : index
    %c0_28 = arith.constant 0 : index
    %c0_29 = arith.constant 0 : index
    %54 = vector.load %arg13[%c0_27, %c0_28, %c0_29] : memref<18x32x16xf32, #tpu.memory_space<vmem>>, vector<18x32x16xf32>
    %c1_i32 = arith.constant 1 : i32
    %55 = tpu.dynamic_rotate %54 by %c1_i32 dim 1 : vector<18x32x16xf32>, i32 -> vector<18x32x16xf32>
    %56 = vector.extract_strided_slice %55 {offsets = [0, 8, 0], sizes = [18, 16, 16], strides = [1, 1, 1]} : vector<18x32x16xf32> to vector<18x16x16xf32>
    %57 = vector.extract_strided_slice %53 {offsets = [0, 0], sizes = [1, 16], strides = [1, 1]} : vector<9x16xf32> to vector<1x16xf32>
    %58 = vector.extract_strided_slice %56 {offsets = [0, 0, 0], sizes = [16, 16, 16], strides = [1, 1, 1]} : vector<18x16x16xf32> to vector<16x16x16xf32>
    %59 = vector.shape_cast %57 : vector<1x16xf32> to vector<1x1x16xf32>
    %60 = vector.broadcast %59 : vector<1x1x16xf32> to vector<16x16x16xf32>
    %61 = arith.mulf %58, %60 : vector<16x16x16xf32>
    %62 = vector.extract_strided_slice %53 {offsets = [3, 0], sizes = [1, 16], strides = [1, 1]} : vector<9x16xf32> to vector<1x16xf32>
    %63 = vector.extract_strided_slice %56 {offsets = [1, 0, 0], sizes = [16, 16, 16], strides = [1, 1, 1]} : vector<18x16x16xf32> to vector<16x16x16xf32>
    %64 = vector.shape_cast %62 : vector<1x16xf32> to vector<1x1x16xf32>
    %65 = vector.broadcast %64 : vector<1x1x16xf32> to vector<16x16x16xf32>
    %66 = arith.mulf %63, %65 : vector<16x16x16xf32>
    %67 = arith.addf %61, %66 : vector<16x16x16xf32>
    %68 = vector.extract_strided_slice %53 {offsets = [6, 0], sizes = [1, 16], strides = [1, 1]} : vector<9x16xf32> to vector<1x16xf32>
    %69 = vector.extract_strided_slice %56 {offsets = [2, 0, 0], sizes = [16, 16, 16], strides = [1, 1, 1]} : vector<18x16x16xf32> to vector<16x16x16xf32>
    %70 = vector.shape_cast %68 : vector<1x16xf32> to vector<1x1x16xf32>
    %71 = vector.broadcast %70 : vector<1x1x16xf32> to vector<16x16x16xf32>
    %72 = arith.mulf %69, %71 : vector<16x16x16xf32>
    %73 = arith.addf %67, %72 : vector<16x16x16xf32>
    %74 = vector.extract_strided_slice %54 {offsets = [0, 8, 0], sizes = [18, 16, 16], strides = [1, 1, 1]} : vector<18x32x16xf32> to vector<18x16x16xf32>
    %75 = vector.extract_strided_slice %53 {offsets = [1, 0], sizes = [1, 16], strides = [1, 1]} : vector<9x16xf32> to vector<1x16xf32>
    %76 = vector.extract_strided_slice %74 {offsets = [0, 0, 0], sizes = [16, 16, 16], strides = [1, 1, 1]} : vector<18x16x16xf32> to vector<16x16x16xf32>
    %77 = vector.shape_cast %75 : vector<1x16xf32> to vector<1x1x16xf32>
    %78 = vector.broadcast %77 : vector<1x1x16xf32> to vector<16x16x16xf32>
    %79 = arith.mulf %76, %78 : vector<16x16x16xf32>
    %80 = arith.addf %73, %79 : vector<16x16x16xf32>
    %81 = vector.extract_strided_slice %53 {offsets = [4, 0], sizes = [1, 16], strides = [1, 1]} : vector<9x16xf32> to vector<1x16xf32>
    %82 = vector.extract_strided_slice %74 {offsets = [1, 0, 0], sizes = [16, 16, 16], strides = [1, 1, 1]} : vector<18x16x16xf32> to vector<16x16x16xf32>
    %83 = vector.shape_cast %81 : vector<1x16xf32> to vector<1x1x16xf32>
    %84 = vector.broadcast %83 : vector<1x1x16xf32> to vector<16x16x16xf32>
    %85 = arith.mulf %82, %84 : vector<16x16x16xf32>
    %86 = arith.addf %80, %85 : vector<16x16x16xf32>
    %87 = vector.extract_strided_slice %53 {offsets = [7, 0], sizes = [1, 16], strides = [1, 1]} : vector<9x16xf32> to vector<1x16xf32>
    %88 = vector.extract_strided_slice %74 {offsets = [2, 0, 0], sizes = [16, 16, 16], strides = [1, 1, 1]} : vector<18x16x16xf32> to vector<16x16x16xf32>
    %89 = vector.shape_cast %87 : vector<1x16xf32> to vector<1x1x16xf32>
    %90 = vector.broadcast %89 : vector<1x1x16xf32> to vector<16x16x16xf32>
    %91 = arith.mulf %88, %90 : vector<16x16x16xf32>
    %92 = arith.addf %86, %91 : vector<16x16x16xf32>
    %c31_i32 = arith.constant 31 : i32
    %93 = tpu.dynamic_rotate %54 by %c31_i32 dim 1 : vector<18x32x16xf32>, i32 -> vector<18x32x16xf32>
    %94 = vector.extract_strided_slice %93 {offsets = [0, 8, 0], sizes = [18, 16, 16], strides = [1, 1, 1]} : vector<18x32x16xf32> to vector<18x16x16xf32>
    %95 = vector.extract_strided_slice %53 {offsets = [2, 0], sizes = [1, 16], strides = [1, 1]} : vector<9x16xf32> to vector<1x16xf32>
    %96 = vector.extract_strided_slice %94 {offsets = [0, 0, 0], sizes = [16, 16, 16], strides = [1, 1, 1]} : vector<18x16x16xf32> to vector<16x16x16xf32>
    %97 = vector.shape_cast %95 : vector<1x16xf32> to vector<1x1x16xf32>
    %98 = vector.broadcast %97 : vector<1x1x16xf32> to vector<16x16x16xf32>
    %99 = arith.mulf %96, %98 : vector<16x16x16xf32>
    %100 = arith.addf %92, %99 : vector<16x16x16xf32>
    %101 = vector.extract_strided_slice %53 {offsets = [5, 0], sizes = [1, 16], strides = [1, 1]} : vector<9x16xf32> to vector<1x16xf32>
    %102 = vector.extract_strided_slice %94 {offsets = [1, 0, 0], sizes = [16, 16, 16], strides = [1, 1, 1]} : vector<18x16x16xf32> to vector<16x16x16xf32>
    %103 = vector.shape_cast %101 : vector<1x16xf32> to vector<1x1x16xf32>
    %104 = vector.broadcast %103 : vector<1x1x16xf32> to vector<16x16x16xf32>
    %105 = arith.mulf %102, %104 : vector<16x16x16xf32>
    %106 = arith.addf %100, %105 : vector<16x16x16xf32>
    %107 = vector.extract_strided_slice %53 {offsets = [8, 0], sizes = [1, 16], strides = [1, 1]} : vector<9x16xf32> to vector<1x16xf32>
    %108 = vector.extract_strided_slice %94 {offsets = [2, 0, 0], sizes = [16, 16, 16], strides = [1, 1, 1]} : vector<18x16x16xf32> to vector<16x16x16xf32>
    %109 = vector.shape_cast %107 : vector<1x16xf32> to vector<1x1x16xf32>
    %110 = vector.broadcast %109 : vector<1x1x16xf32> to vector<16x16x16xf32>
    %111 = arith.mulf %108, %110 : vector<16x16x16xf32>
    %112 = arith.addf %106, %111 : vector<16x16x16xf32>
    %113 = vector.shape_cast %112 : vector<16x16x16xf32> to vector<256x16xf32>
    %c0_30 = arith.constant 0 : index
    %c0_31 = arith.constant 0 : index
    %114 = vector.load %arg5[%c0_30, %c0_31] : memref<1x16xf32, #tpu.memory_space<vmem>>, vector<1x16xf32>
    %115 = vector.broadcast %114 : vector<1x16xf32> to vector<256x16xf32>
    %116 = arith.addf %113, %115 : vector<256x16xf32>
    %cst_32 = arith.constant dense<0.000000e+00> : vector<16xf32>
    %117 = vector.multi_reduction <add>, %116, %cst_32 [0] : vector<256x16xf32> to vector<16xf32>
    %118 = vector.shape_cast %117 : vector<16xf32> to vector<1x16xf32>
    %cst_33 = arith.constant 3.906250e-03 : f32
    %119 = vector.broadcast %cst_33 : f32 to vector<1x16xf32>
    %120 = arith.mulf %118, %119 : vector<1x16xf32>
    %c0_34 = arith.constant 0 : index
    %c0_35 = arith.constant 0 : index
    %121 = vector.load %arg6[%c0_34, %c0_35] : memref<16x8xf32, #tpu.memory_space<vmem>>, vector<16x8xf32>
    %cst_36 = arith.constant dense<0.000000e+00> : vector<1x8xf32>
    %122 = tpu.matmul %120, %121, %cst_36 {dimension_numbers = #tpu.dot_dimension_numbers<[1], [0], [0], [1], [0, 0, 1, 1], [], []>} : vector<1x16xf32>, vector<16x8xf32>, vector<1x8xf32> -> vector<1x8xf32>
    %c0_37 = arith.constant 0 : index
    %c0_38 = arith.constant 0 : index
    %123 = vector.load %arg7[%c0_37, %c0_38] : memref<1x8xf32, #tpu.memory_space<vmem>>, vector<1x8xf32>
    %124 = arith.addf %122, %123 : vector<1x8xf32>
    %cst_39 = arith.constant 0.000000e+00 : f32
    %125 = vector.broadcast %cst_39 : f32 to vector<1x8xf32>
    %126 = arith.maximumf %124, %125 : vector<1x8xf32>
    %c0_40 = arith.constant 0 : index
    %c0_41 = arith.constant 0 : index
    %127 = vector.load %arg8[%c0_40, %c0_41] : memref<8x16xf32, #tpu.memory_space<vmem>>, vector<8x16xf32>
    %cst_42 = arith.constant dense<0.000000e+00> : vector<1x16xf32>
    %128 = tpu.matmul %126, %127, %cst_42 {dimension_numbers = #tpu.dot_dimension_numbers<[1], [0], [0], [1], [0, 0, 1, 1], [], []>} : vector<1x8xf32>, vector<8x16xf32>, vector<1x16xf32> -> vector<1x16xf32>
    %c0_43 = arith.constant 0 : index
    %c0_44 = arith.constant 0 : index
    %129 = vector.load %arg9[%c0_43, %c0_44] : memref<1x16xf32, #tpu.memory_space<vmem>>, vector<1x16xf32>
    %130 = arith.addf %128, %129 : vector<1x16xf32>
    %cst_45 = arith.constant 3.000000e+00 : f32
    %131 = vector.broadcast %cst_45 : f32 to vector<1x16xf32>
    %132 = arith.addf %130, %131 : vector<1x16xf32>
    %cst_46 = arith.constant 0.000000e+00 : f32
    %cst_47 = arith.constant 6.000000e+00 : f32
    %133 = vector.broadcast %cst_46 : f32 to vector<1x16xf32>
    %134 = arith.maximumf %133, %132 : vector<1x16xf32>
    %135 = vector.broadcast %cst_47 : f32 to vector<1x16xf32>
    %136 = arith.minimumf %135, %134 : vector<1x16xf32>
    %cst_48 = arith.constant 0.166666672 : f32
    %137 = vector.broadcast %cst_48 : f32 to vector<1x16xf32>
    %138 = arith.mulf %136, %137 : vector<1x16xf32>
    %139 = vector.broadcast %138 : vector<1x16xf32> to vector<256x16xf32>
    %140 = arith.mulf %116, %139 : vector<256x16xf32>
    %cst_49 = arith.constant 3.000000e+00 : f32
    %141 = vector.broadcast %cst_49 : f32 to vector<256x16xf32>
    %142 = arith.addf %140, %141 : vector<256x16xf32>
    %cst_50 = arith.constant 0.000000e+00 : f32
    %cst_51 = arith.constant 6.000000e+00 : f32
    %143 = vector.broadcast %cst_50 : f32 to vector<256x16xf32>
    %144 = arith.maximumf %143, %142 : vector<256x16xf32>
    %145 = vector.broadcast %cst_51 : f32 to vector<256x16xf32>
    %146 = arith.minimumf %145, %144 : vector<256x16xf32>
    %147 = arith.mulf %140, %146 : vector<256x16xf32>
    %cst_52 = arith.constant 0.166666672 : f32
    %148 = vector.broadcast %cst_52 : f32 to vector<256x16xf32>
    %149 = arith.mulf %147, %148 : vector<256x16xf32>
    %c0_53 = arith.constant 0 : index
    %c0_54 = arith.constant 0 : index
    %150 = vector.load %arg10[%c0_53, %c0_54] : memref<16x8xf32, #tpu.memory_space<vmem>>, vector<16x8xf32>
    %cst_55 = arith.constant dense<0.000000e+00> : vector<256x8xf32>
    %151 = tpu.matmul %149, %150, %cst_55 {dimension_numbers = #tpu.dot_dimension_numbers<[1], [0], [0], [1], [0, 0, 1, 1], [], []>} : vector<256x16xf32>, vector<16x8xf32>, vector<256x8xf32> -> vector<256x8xf32>
    %c0_56 = arith.constant 0 : index
    %c0_57 = arith.constant 0 : index
    %152 = vector.load %arg11[%c0_56, %c0_57] : memref<1x8xf32, #tpu.memory_space<vmem>>, vector<1x8xf32>
    %153 = vector.broadcast %152 : vector<1x8xf32> to vector<256x8xf32>
    %154 = arith.addf %151, %153 : vector<256x8xf32>
    %155 = vector.shape_cast %154 : vector<256x8xf32> to vector<1x16x16x8xf32>
    %c0_58 = arith.constant 0 : index
    %c0_59 = arith.constant 0 : index
    %c0_60 = arith.constant 0 : index
    %c0_61 = arith.constant 0 : index
    %156 = vector.load %arg12[%c0_58, %c0_59, %c0_60, %c0_61] : memref<1x16x16x8xf32, #tpu.memory_space<vmem>>, vector<1x16x16x8xf32>
    tpu.vector_store %arg12[%c0_58, %c0_59, %c0_60, %c0_61], %155 {strides = array<i32>} : memref<1x16x16x8xf32, #tpu.memory_space<vmem>>, vector<1x16x16x8xf32>,
    return
  }
  func.func @transform_0(%arg0: i32) -> (i32, i32, i32, i32) {
    %c0_i32 = arith.constant 0 : i32
    %c0_i32_0 = arith.constant 0 : i32
    %c0_i32_1 = arith.constant 0 : i32
    %c0_i32_2 = arith.constant 0 : i32
    return %arg0, %c0_i32, %c0_i32_0, %c0_i32_1 : i32, i32, i32, i32
  }
  func.func @transform_1(%arg0: i32) -> (i32, i32) {
    %c0_i32 = arith.constant 0 : i32
    %c0_i32_0 = arith.constant 0 : i32
    %c0_i32_1 = arith.constant 0 : i32
    return %c0_i32, %c0_i32_0 : i32, i32
  }
  func.func @transform_2(%arg0: i32) -> (i32, i32) {
    %c0_i32 = arith.constant 0 : i32
    %c0_i32_0 = arith.constant 0 : i32
    %c0_i32_1 = arith.constant 0 : i32
    return %c0_i32, %c0_i32_0 : i32, i32
  }
  func.func @transform_3(%arg0: i32) -> (i32, i32, i32) {
    %c0_i32 = arith.constant 0 : i32
    %c0_i32_0 = arith.constant 0 : i32
    %c0_i32_1 = arith.constant 0 : i32
    %c0_i32_2 = arith.constant 0 : i32
    return %c0_i32, %c0_i32_0, %c0_i32_1 : i32, i32, i32
  }
  func.func @transform_4(%arg0: i32) -> (i32, i32) {
    %c0_i32 = arith.constant 0 : i32
    %c0_i32_0 = arith.constant 0 : i32
    %c0_i32_1 = arith.constant 0 : i32
    return %c0_i32, %c0_i32_0 : i32, i32
  }
  func.func @transform_5(%arg0: i32) -> (i32, i32) {
    %c0_i32 = arith.constant 0 : i32
    %c0_i32_0 = arith.constant 0 : i32
    %c0_i32_1 = arith.constant 0 : i32
    return %c0_i32, %c0_i32_0 : i32, i32
  }
  func.func @transform_6(%arg0: i32) -> (i32, i32) {
    %c0_i32 = arith.constant 0 : i32
    %c0_i32_0 = arith.constant 0 : i32
    %c0_i32_1 = arith.constant 0 : i32
    return %c0_i32, %c0_i32_0 : i32, i32
  }
  func.func @transform_7(%arg0: i32) -> (i32, i32) {
    %c0_i32 = arith.constant 0 : i32
    %c0_i32_0 = arith.constant 0 : i32
    %c0_i32_1 = arith.constant 0 : i32
    return %c0_i32, %c0_i32_0 : i32, i32
  }
  func.func @transform_8(%arg0: i32) -> (i32, i32) {
    %c0_i32 = arith.constant 0 : i32
    %c0_i32_0 = arith.constant 0 : i32
    %c0_i32_1 = arith.constant 0 : i32
    return %c0_i32, %c0_i32_0 : i32, i32
  }
  func.func @transform_9(%arg0: i32) -> (i32, i32) {
    %c0_i32 = arith.constant 0 : i32
    %c0_i32_0 = arith.constant 0 : i32
    %c0_i32_1 = arith.constant 0 : i32
    return %c0_i32, %c0_i32_0 : i32, i32
  }
  func.func @transform_10(%arg0: i32) -> (i32, i32) {
    %c0_i32 = arith.constant 0 : i32
    %c0_i32_0 = arith.constant 0 : i32
    %c0_i32_1 = arith.constant 0 : i32
    return %c0_i32, %c0_i32_0 : i32, i32
  }
  func.func @transform_11(%arg0: i32) -> (i32, i32, i32, i32) {
    %c0_i32 = arith.constant 0 : i32
    %c0_i32_0 = arith.constant 0 : i32
    %c0_i32_1 = arith.constant 0 : i32
    %c0_i32_2 = arith.constant 0 : i32
    return %arg0, %c0_i32, %c0_i32_0, %c0_i32_1 : i32, i32, i32, i32
  }
}

</mosaic_0001>

<bundles_post_ra>
// kernel: tpu_custom_call.1
= control target key start
LH: loop header
LB: loop body
LE: loop exit
PB: predicated region body
PF: predicated region fallthrough
CT: control target
= control target key end

     0   :  { %s3546_s17 = smov 0   ;;  %s6181_s0 = inlined_call_operand.vmem [shape: f32[2,16,16,4], index: 0, kind: input, shape index: {}]   ;;  %s6182_s1 = inlined_call_operand.vmem [shape: f32[4,16], index: 1, kind: input, shape index: {}]   ;;  %s6183_s2 = inlined_call_operand.vmem [shape: f32[1,16], index: 2, kind: input, shape index: {}]   ;;  %s6184_s3 = inlined_call_operand.vmem [shape: f32[3,3,16], index: 3, kind: input, shape index: {}]   ;;  %s6185_s4 = inlined_call_operand.vmem [shape: f32[1,16], index: 4, kind: input, shape index: {}]   ;;  %s6186_s5 = inlined_call_operand.vmem [shape: f32[16,8], index: 5, kind: input, shape index: {}]   ;;  %s6187_s6 = inlined_call_operand.vmem [shape: f32[1,8], index: 6, kind: input, shape index: {}]   ;;  %s6188_s7 = inlined_call_operand.vmem [shape: f32[8,16], index: 7, kind: input, shape index: {}]   ;;  %s6189_s8 = inlined_call_operand.vmem [shape: f32[1,16], index: 8, kind: input, shape index: {}]   ;;  %s6190_s9 = inlined_call_operand.vmem [shape: f32[16,8], index: 9, kind: input, shape index: {}]   ;;  %s6191_s10 = inlined_call_operand.vmem [shape: f32[1,8], index: 10, kind: input, shape index: {}]   ;;  %s6192_s11 = inlined_call_operand.vmem [shape: f32[2,16,16,8], index: 11, kind: output, shape index: {}]  }
   0x1 LB: > { %s3197_s18 = sadd.s32 4294967295, %s3477_s17   ;;  %p3201_p0 = scmp.ge.s32.totalorder %s3477_s17, 1  ;;  %s3477_s17 = sphi %s3546_s17, %s21_s17  }
   0x2   : > { %p337_p1 = scmp.lt.s32.totalorder %s3477_s17, 3 }
   0x4   : > { %p338_p2 = pnand %p3201_p0, %p337_p1 }
   0x6   : > { %341 = sbr.rel (%p338_p2) target bundleno = 1339 (0x53b), region = 64 }
   0xd   : > { %p377_p3 = scmp.lt.s32.totalorder %s3197_s18, 1  ;;  %v6195_v0 = vmov 1   ;;  %v6199_v7 = vmov 0   ;;  %v6201_v10 = vmov 2   ;;  %v6197_v14 = vmov 3  }
   0xe   : > { %3376 = vset.pattern.permute.xlu0 %v6195_v0  ;;  %3374 = vset.pattern.permute.xlu1 %v6195_v0  ;;  %vm1403_vm0 = vcmask 130048   ;;  %vm1409_vm1 = vcmask 122880   ;;  %v6193_v21 = vmov 0.0   ;;  %v580_v57 = vlaneseq  ;;  %v419_v63 = vld [vmem:[%s6182_s1] sm:$0xf] }
   0xf   : > { %s6546_s18 = smov (!%p377_p3, %s3197_s18), 1  ;;  %1429 = vst.msk [vmem:[#allocation2 + $0x38] sm:$0x1] %vm1409_vm1, %v6193_v21  ;;  %1410 = vst.msk [vmem:[#allocation2 + $0x7] sm:$0x1] %vm1409_vm1, %v6193_v21  ;;  %vm3485_vm4 = vmmov 0  }
  0x10   : > { %s3245_s19 = sshll.u32 %s6546_s18, 8  ;;  %1404 = vst.msk [vmem:[#allocation2 + $0x8] sm:$0xff] %vm1403_vm0, %v6193_v21  ;;  %1405 = vst.msk [vmem:[#allocation2 + $0x10] sm:$0xff] %vm1403_vm0, %v6193_v21  ;;  %v3867_v59 = vshrl.u32 %v580_v57, 7  ;;  %vm2506_vm5 = vcmask 64512  }
  0x11   : > { %s3564_s22 = scalar_lea.vmem %s6181_s0, %s3245_s19  ;;  %1407 = vst.msk [vmem:[#allocation2 + $0x228] sm:$0xff] %vm1403_vm0, %v6193_v21  ;;  %1408 = vst.msk [vmem:[#allocation2 + $0x230] sm:$0xff] %vm1403_vm0, %v6193_v21  ;;  %s6080_s27 = scalar_lea.vmem %s6192_s11, %s3245_s19 }
  0x12   : > { %v3567_v1 = vld [vmem:[%s3564_s22 + $0x10] sm:$0xff]  ;;  %v3570_v2 = vld [vmem:[%s3564_s22] sm:$0xff]  ;;  %v3575_v3 = vld [vmem:[%s3564_s22 + $0x28] sm:$0xff]  ;;  %1411 = vst.msk [vmem:[#allocation2 + $0x27] sm:$0x1] %vm1409_vm1, %v6193_v21  ;;  %v3874_v62 = vsub.s32 1, %v3867_v59 }
  0x13   : > { %625 = vperm.xlu0 %3376, %v3567_v1   ;;  %617 = vperm.xlu1 %3374, %v3570_v2   ;;  %v388_v4 = vld [vmem:[%s3564_s22 + $0x8] sm:$0xff]  ;;  %v3580_v5 = vld [vmem:[%s3564_s22 + $0x38] sm:$0xff]  ;;  %v3589_v8 = vld [vmem:[%s3564_s22 + $0x50] sm:$0xff]  ;;  %1412 = vst.msk [vmem:[#allocation2 + $0x47] sm:$0x1] %vm1409_vm1, %v6193_v21  ;;  %vm2077_vm2 = vcmp.lt.s32.totalorder %v3867_v59, 7 }
  0x14   : > { %v3583_v6 = vld [vmem:[%s3564_s22 + $0x18] sm:$0xff]  ;;  %v3594_v9 = vld [vmem:[%s3564_s22 + $0x68] sm:$0xff]  ;;  %v3602_v11 = vld [vmem:[%s3564_s22 + $0x20] sm:$0xff]  ;;  %1413 = vst.msk [vmem:[#allocation2 + $0x67] sm:$0x1] %vm1409_vm1, %v6193_v21  ;;  %vm1610_vm3 = vcmp.lt.s32.totalorder %v3867_v59, 1 }
  0x15   : > { %v3611_v12 = vld [vmem:[%s3564_s22 + $0x40] sm:$0xff]  ;;  %v3617_v13 = vld [vmem:[%s3564_s22 + $0x58] sm:$0xff]  ;;  %v3622_v15 = vld [vmem:[%s3564_s22 + $0x70] sm:$0xff]  ;;  %1414 = vst.msk [vmem:[#allocation2 + $0x87] sm:$0x1] %vm1409_vm1, %v6193_v21 }
  0x16   : > { %v3626_v16 = vld [vmem:[%s3564_s22 + $0x88] sm:$0xff]  ;;  %v3632_v17 = vld [vmem:[%s3564_s22 + $0xa0] sm:$0xff]  ;;  %v3638_v18 = vld [vmem:[%s3564_s22 + $0xb8] sm:$0xff]  ;;  %1415 = vst.msk [vmem:[#allocation2 + $0xa7] sm:$0x1] %vm1409_vm1, %v6193_v21 }
  0x17   : > { %637 = vperm.xlu0 %3376, %v3575_v3   ;;  %621 = vperm.xlu1 %3374, %v388_v4   ;;  %v3644_v19 = vld [vmem:[%s3564_s22 + $0xd0] sm:$0xff]  ;;  %1416 = vst.msk [vmem:[#allocation2 + $0xc7] sm:$0x1] %vm1409_vm1, %v6193_v21  ;;  %1417 = vst.msk [vmem:[#allocation2 + $0xe7] sm:$0x1] %vm1409_vm1, %v6193_v21  ;;  %v396_v22 = vld [vmem:[%s3564_s22 + $0x48] sm:$0xff] }
  0x18   : > { %v3647_v20 = vld [vmem:[%s3564_s22 + $0x30] sm:$0xff]  ;;  %1418 = vst.msk [vmem:[#allocation2 + $0x107] sm:$0x1] %vm1409_vm1, %v6193_v21  ;;  %1419 = vst.msk [vmem:[#allocation2 + $0x127] sm:$0x1] %vm1409_vm1, %v6193_v21  ;;  %v3759_v23 = vld [vmem:[%s3564_s22 + $0xe8] sm:$0xff] }
  0x19   : > { %1420 = vst.msk [vmem:[#allocation2 + $0x147] sm:$0x1] %vm1409_vm1, %v6193_v21  ;;  %1421 = vst.msk [vmem:[#allocation2 + $0x167] sm:$0x1] %vm1409_vm1, %v6193_v21  ;;  %v399_v24 = vld [vmem:[%s3564_s22 + $0x60] sm:$0xff]  ;;  %v3776_v25 = vld [vmem:[%s3564_s22 + $0x78] sm:$0xff] }
  0x1a   : > { %1422 = vst.msk [vmem:[#allocation2 + $0x187] sm:$0x1] %vm1409_vm1, %v6193_v21  ;;  %1423 = vst.msk [vmem:[#allocation2 + $0x1a7] sm:$0x1] %vm1409_vm1, %v6193_v21  ;;  %v3785_v28 = vld [vmem:[%s3564_s22 + $0x90] sm:$0xff]  ;;  %v3794_v31 = vld [vmem:[%s3564_s22 + $0xa8] sm:$0xff] }
  0x1b   : > { %645 = vperm.xlu0 %3376, %v3580_v5   ;;  %3375 = vset.pattern.permute.xlu1 %v6199_v7  ;;  %1424 = vst.msk [vmem:[#allocation2 + $0x1c7] sm:$0x1] %vm1409_vm1, %v6193_v21  ;;  %1425 = vst.msk [vmem:[#allocation2 + $0x1e7] sm:$0x1] %vm1409_vm1, %v6193_v21  ;;  %v3804_v34 = vld [vmem:[%s3564_s22 + $0xc0] sm:$0xff]  ;;  %v3811_v36 = vld [vmem:[%s3564_s22 + $0xd8] sm:$0xff] }
  0x1c   : > { %437 = vperm.xlu1 %3375, %v3583_v6   ;;  %1426 = vst.msk [vmem:[#allocation2 + $0x207] sm:$0x1] %vm1409_vm1, %v6193_v21  ;;  %1427 = vst.msk [vmem:[#allocation2 + $0x227] sm:$0x1] %vm1409_vm1, %v6193_v21  ;;  %v3820_v39 = vld [vmem:[%s3564_s22 + $0x80] sm:$0xff]  ;;  %v3829_v42 = vld [vmem:[%s3564_s22 + $0x98] sm:$0xff] }
  0x1d   : > { %1428 = vst.msk [vmem:[#allocation2 + $0x18] sm:$0x1] %vm1409_vm1, %v6193_v21  ;;  %1430 = vst.msk [vmem:[#allocation2 + $0x58] sm:$0x1] %vm1409_vm1, %v6193_v21  ;;  %v3858_v54 = vld [vmem:[%s3564_s22 + $0xb0] sm:$0xff] }
  0x1e   : > { %1431 = vst.msk [vmem:[#allocation2 + $0x78] sm:$0x1] %vm1409_vm1, %v6193_v21  ;;  %1432 = vst.msk [vmem:[#allocation2 + $0x98] sm:$0x1] %vm1409_vm1, %v6193_v21 }
  0x1f   : > { %657 = vperm.xlu0 %3376, %v3589_v8   ;;  %1433 = vst.msk [vmem:[#allocation2 + $0xb8] sm:$0x1] %vm1409_vm1, %v6193_v21  ;;  %1434 = vst.msk [vmem:[#allocation2 + $0xd8] sm:$0x1] %vm1409_vm1, %v6193_v21 }
  0x20   : > { %3377 = vset.pattern.permute.xlu1 %v6195_v0  ;;  %1435 = vst.msk [vmem:[#allocation2 + $0xf8] sm:$0x1] %vm1409_vm1, %v6193_v21  ;;  %1436 = vst.msk [vmem:[#allocation2 + $0x118] sm:$0x1] %vm1409_vm1, %v6193_v21 }
  0x21   : > { %629 = vperm.xlu1 %3377, %v3583_v6   ;;  %1437 = vst.msk [vmem:[#allocation2 + $0x138] sm:$0x1] %vm1409_vm1, %v6193_v21  ;;  %1438 = vst.msk [vmem:[#allocation2 + $0x158] sm:$0x1] %vm1409_vm1, %v6193_v21 }
  0x22   : > { %1439 = vst.msk [vmem:[#allocation2 + $0x178] sm:$0x1] %vm1409_vm1, %v6193_v21  ;;  %1440 = vst.msk [vmem:[#allocation2 + $0x198] sm:$0x1] %vm1409_vm1, %v6193_v21 }
  0x23   : > { %669 = vperm.xlu0 %3376, %v3594_v9   ;;  %1441 = vst.msk [vmem:[#allocation2 + $0x1b8] sm:$0x1] %vm1409_vm1, %v6193_v21  ;;  %1442 = vst.msk [vmem:[#allocation2 + $0x1d8] sm:$0x1] %vm1409_vm1, %v6193_v21 }
  0x24   : > { %1443 = vst.msk [vmem:[#allocation2 + $0x1f8] sm:$0x1] %vm1409_vm1, %v6193_v21  ;;  %1444 = vst.msk [vmem:[#allocation2 + $0x218] sm:$0x1] %vm1409_vm1, %v6193_v21 }
  0x25   : > { %3378 = vset.pattern.permute.xlu1 %v6201_v10  ;;  %1445 = vst.msk [vmem:[#allocation2 + $0x238] sm:$0x1] %vm1409_vm1, %v6193_v21  ;;  %6274 = vst [vmem:[#allocation3_spill] sm:$0xff] %v3811_v36 }
  0x26   : > { %813 = vperm.xlu1 %3378, %v3570_v2  }
  0x27   : > { %3406 = vset.pattern.permute.xlu0 %v6201_v10 }
  0x28   : > { %817 = vperm.xlu0 %3406, %v388_v4  }
  0x2a   : > { %3379 = vset.pattern.permute.xlu1 %v6199_v7 }
  0x2b   : > { %442 = vperm.xlu1 %3379, %v3602_v11  }
  0x2c   : > { %821 = vperm.xlu0 %3406, %v3567_v1  }
  0x2f   : > { %3380 = vset.pattern.permute.xlu1 %v6195_v0 }
  0x30   : > { %833 = vperm.xlu0 %3406, %v3575_v3   ;;  %633 = vperm.xlu1 %3380, %v3602_v11  }
  0x34   : > { %845 = vperm.xlu0 %3406, %v3611_v12   ;;  %3381 = vset.pattern.permute.xlu1 %v6201_v10 }
  0x35   : > { %825 = vperm.xlu1 %3381, %v3583_v6  }
  0x38   : > { %857 = vperm.xlu0 %3406, %v3617_v13  }
  0x39   : > { %3382 = vset.pattern.permute.xlu1 %v6197_v14 }
  0x3a   : > { %1013 = vperm.xlu1 %3382, %v388_v4  }
  0x3c   : > { %869 = vperm.xlu0 %3406, %v3622_v15  }
  0x3e   : > { %3383 = vset.pattern.permute.xlu1 %v6199_v7 }
  0x3f   : > { %447 = vperm.xlu1 %3383, %v3575_v3  }
  0x40   : > { %881 = vperm.xlu0 %3406, %v3626_v16  }
  0x43   : > { %3384 = vset.pattern.permute.xlu1 %v6201_v10 }
  0x44   : > { %893 = vperm.xlu0 %3406, %v3632_v17   ;;  %829 = vperm.xlu1 %3384, %v3602_v11  }
  0x48   : > { %905 = vperm.xlu0 %3406, %v3638_v18   ;;  %3385 = vset.pattern.permute.xlu1 %v6197_v14 }
  0x49   : > { %1017 = vperm.xlu1 %3385, %v3567_v1  }
  0x4c   : > { %917 = vperm.xlu0 %3406, %v3644_v19  }
  0x4d   : > { %3386 = vset.pattern.permute.xlu1 %v6199_v7 }
  0x4e   : > { %452 = vperm.xlu1 %3386, %v3647_v20  }
  0x50   : > { %3445 = vset.pattern.permute.xlu0 %v6199_v7 }
  0x51   : > { %422 = vperm.xlu0 %3445, %v3570_v2  }
  0x52   : > { %3387 = vset.pattern.permute.xlu1 %v6195_v0 }
  0x53   : > { %641 = vperm.xlu1 %3387, %v3647_v20  }
  0x55   : > { %427 = vperm.xlu0 %3445, %v388_v4   ;;  %v3889_v4 = vrot.slane %v419_v63, %v3874_v62 }
  0x57   : > { %3388 = vset.pattern.permute.xlu1 %v6197_v14  ;;  %6277 = vst [vmem:[#allocation6_spill] sm:$0xff] %v3889_v4 }
  0x58   : > { %1025 = vperm.xlu1 %3388, %v3602_v11  }
  0x59   : > { %432 = vperm.xlu0 %3445, %v3567_v1  }
  0x5c   : > { %3389 = vset.pattern.permute.xlu1 %v6199_v7 }
  0x5d   : > { %462 = vperm.xlu0 %3445, %v3611_v12   ;;  %457 = vperm.xlu1 %3389, %v3580_v5  }
  0x61   : > { %477 = vperm.xlu0 %3445, %v3617_v13   ;;  %3390 = vset.pattern.permute.xlu1 %v6201_v10 }
  0x62   : > { %837 = vperm.xlu1 %3390, %v3647_v20  }
  0x65   : > { %492 = vperm.xlu0 %3445, %v3622_v15  }
  0x66   : > { %3391 = vset.pattern.permute.xlu1 %v6197_v14 }
  0x67   : > { %1029 = vperm.xlu1 %3391, %v3575_v3   ;;  %v3885_v3 = vsub.s32 2, %v3867_v59 }
  0x69   : > { %507 = vperm.xlu0 %3445, %v3626_v16   ;;  %v3899_v11 = vrot.slane %v419_v63, %v3885_v3 }
  0x6b   : > { %3392 = vset.pattern.permute.xlu1 %v6195_v0  ;;  %6279 = vst [vmem:[#allocation8_spill] sm:$0xff] %v3899_v11 }
  0x6c   : > { %649 = vperm.xlu1 %3392, %v3611_v12  }
  0x6d   : > { %522 = vperm.xlu0 %3445, %v3632_v17  }
  0x70   : > { %3393 = vset.pattern.permute.xlu1 %v6201_v10 }
  0x71   : > { %537 = vperm.xlu0 %3445, %v3638_v18   ;;  %841 = vperm.xlu1 %3393, %v3580_v5  }
  0x75   : > { %552 = vperm.xlu0 %3445, %v3644_v19   ;;  %3394 = vset.pattern.permute.xlu1 %v6199_v7 }
  0x76   : > { %467 = vperm.xlu1 %3394, %v396_v22  }
  0x79   : > { %567 = vperm.xlu0 %3445, %v3759_v23  }
  0x7a   : > { %3395 = vset.pattern.permute.xlu1 %v6195_v0 }
  0x7b   : > { %653 = vperm.xlu1 %3395, %v396_v22  }
  0x7d   : > { %3450 = vset.pattern.permute.xlu0 %v6197_v14 }
  0x7e   : > { %1009 = vperm.xlu0 %3450, %v3570_v2   ;;  %v3882_v2 = vsub.s32 0, %v3867_v59 }
  0x7f   : > { %3396 = vset.pattern.permute.xlu1 %v6197_v14 }
  0x80   : > { %1037 = vperm.xlu1 %3396, %v3580_v5   ;;  %6276 = vst [vmem:[#allocation5_spill] sm:$0xff] %v3882_v2 }
  0x82   : > { %1021 = vperm.xlu0 %3450, %v3583_v6   ;;  %v1138_v6 = vsub.s32 3, %v3867_v59 }
  0x84   : > { %3397 = vset.pattern.permute.xlu1 %v6199_v7  ;;  %v3910_v57 = vrot.slane %v419_v63, %v1138_v6 }
  0x85   : > { %472 = vperm.xlu1 %3397, %v3589_v8  }
  0x86   : > { %1033 = vperm.xlu0 %3450, %v3647_v20  }
  0x89   : > { %3398 = vset.pattern.permute.xlu1 %v6201_v10 }
  0x8a   : > { %849 = vperm.xlu1 %3398, %v396_v22   ;;  %1045 = vperm.xlu0 %3450, %v396_v22  }
  0x8e   : > { %3399 = vset.pattern.permute.xlu1 %v6197_v14  ;;  %1057 = vperm.xlu0 %3450, %v399_v24  }
  0x8f   : > { %1041 = vperm.xlu1 %3399, %v3611_v12  }
  0x92   : > { %v3778_v26 = vpop.permute.xlu1 %617  ;;  %v3780_v27 = vpop.permute.xlu0 %625  ;;  %1069 = vperm.xlu0 %3450, %v3776_v25  }
  0x93   : > { %3400 = vset.pattern.permute.xlu1 %v6195_v0 }
  0x94   : > { %661 = vperm.xlu1 %3400, %v3617_v13  }
  0x96   : > { %v3788_v29 = vpop.permute.xlu1 %621  ;;  %v3790_v30 = vpop.permute.xlu0 %637  ;;  %1081 = vperm.xlu0 %3450, %v3785_v28  }
  0x98   : > { %3401 = vset.pattern.permute.xlu1 %v6201_v10 }
  0x99   : > { %853 = vperm.xlu1 %3401, %v3589_v8  }
  0x9a   : > { %v3798_v32 = vpop.permute.xlu0 %645  ;;  %1093 = vperm.xlu0 %3450, %v3794_v31  }
  0x9b   : > { %v3801_v33 = vpop.permute.xlu1 %437 }
  0x9d   : > { %3402 = vset.pattern.permute.xlu1 %v6199_v7 }
  0x9e   : > { %482 = vperm.xlu1 %3402, %v399_v24   ;;  %v3807_v35 = vpop.permute.xlu0 %657  ;;  %1105 = vperm.xlu0 %3450, %v3804_v34  }
  0xa0   : > { %v3813_v37 = vpop.permute.xlu1 %629 }
  0xa2   : > { %3403 = vset.pattern.permute.xlu1 %v6195_v0  ;;  %v3816_v38 = vpop.permute.xlu0 %669  ;;  %1117 = vperm.xlu0 %3450, %v3811_v36  }
  0xa3   : > { %665 = vperm.xlu1 %3403, %v399_v24  }
  0xa5   : > { %v3822_v40 = vpop.permute.xlu1 %813 }
  0xa6   : > { %3453 = vset.pattern.permute.xlu0 %v6195_v0 }
  0xa7   : > { %3404 = vset.pattern.permute.xlu1 %v6197_v14  ;;  %v818_v41 = vpop.permute.xlu0 %817  ;;  %681 = vperm.xlu0 %3453, %v3820_v39  }
  0xa8   : > { %1049 = vperm.xlu1 %3404, %v3589_v8   ;;  %v3896_v8 = vrot.slane %v419_v63, %v3882_v2  ;;  %v3923_v63 = vld [vmem:[%s6183_s2] ss:$0 sm:$0xff] }
  0xaa   : > { %v443_v43 = vpop.permute.xlu1 %442  ;;  %6278 = vst [vmem:[#allocation7_spill] sm:$0xff] %v3896_v8 }
  0xab   : > { %v3831_v44 = vpop.permute.xlu0 %821  ;;  %693 = vperm.xlu0 %3453, %v3829_v42   ;;  %v588_v19 = vmul.f32 %v3896_v8, %v443_v43  ;;  %v750_v43 = vmul.f32 %v3889_v4, %v3780_v27  ;;  %v6280_v27 = vmov 2  }
  0xac   : > { %3405 = vset.pattern.permute.xlu1 %v6199_v7 }
  0xad   : > { %487 = vperm.xlu1 %3405, %v3594_v9  }
  0xaf   : > { %v634_v45 = vpop.permute.xlu1 %633  ;;  %v3836_v46 = vpop.permute.xlu0 %833  ;;  %705 = vperm.xlu0 %3453, %v3858_v54  }
  0xb0   : > { %v752_v12 = vmul.f32 %v3889_v4, %v634_v45 }
  0xb1   : > { %3407 = vset.pattern.permute.xlu1 %v6201_v10 }
  0xb2   : > { %861 = vperm.xlu1 %3407, %v399_v24   ;;  %v945_v24 = vmul.f32 %v3899_v11, %v818_v41  ;;  %v784_v45 = vadd.f32 %v752_v12, %v588_v19 }
  0xb3   : > { %v3839_v47 = vpop.permute.xlu0 %845 }
  0xb4   : > { %v3841_v48 = vpop.permute.xlu1 %825 }
  0xb6   : > { %3408 = vset.pattern.permute.xlu1 %v6197_v14 }
  0xb7   : > { %1053 = vperm.xlu1 %3408, %v3617_v13   ;;  %v3845_v49 = vpop.permute.xlu0 %857 }
  0xb9   : > { %v1014_v50 = vpop.permute.xlu1 %1013 }
  0xba   : > { %v1141_v41 = vmul.f32 %v3910_v57, %v1014_v50 }
  0xbb   : > { %3409 = vset.pattern.permute.xlu1 %v6195_v0  ;;  %v3848_v51 = vpop.permute.xlu0 %869 }
  0xbc   : > { %673 = vperm.xlu1 %3409, %v3622_v15  }
  0xbe   : > { %v3851_v52 = vpop.permute.xlu1 %447 }
  0xbf   : > { %v3853_v53 = vpop.permute.xlu0 %881 }
  0xc0   : > { %3410 = vset.pattern.permute.xlu1 %v6201_v10 }
  0xc1   : > { %865 = vperm.xlu1 %3410, %v3594_v9  }
  0xc3   : > { %v830_v55 = vpop.permute.xlu1 %829  ;;  %v3860_v56 = vpop.permute.xlu0 %893 }
  0xc4   : > { %v948_v20 = vmul.f32 %v3899_v11, %v830_v55 }
  0xc5   : > { %3411 = vset.pattern.permute.xlu1 %v6199_v7 }
  0xc6   : > { %497 = vperm.xlu1 %3411, %v3776_v25  }
  0xc7   : > { %v3865_v58 = vpop.permute.xlu0 %905 }
  0xc8   : > { %v1018_v60 = vpop.permute.xlu1 %1017 }
  0xca   : > { %3412 = vset.pattern.permute.xlu1 %v6195_v0 }
  0xcb   : > { %677 = vperm.xlu1 %3412, %v3776_v25   ;;  %v3871_v61 = vpop.permute.xlu0 %917 }
  0xcc   : > { %6275 = vst [vmem:[#allocation4_spill] sm:$0xff] %v3871_v61 }
  0xcd   : > { %v3879_v1 = vpop.permute.xlu1 %452 }
  0xcf   : > { %3413 = vset.pattern.permute.xlu1 %v6197_v14  ;;  %v980_v14 = vadd.f32 %v948_v20, %v784_v45 }
  0xd0   : > { %v3891_v5 = vpop.permute.xlu0 %422  ;;  %1061 = vperm.xlu1 %3413, %v3594_v9   ;;  %v749_v9 = vmul.f32 %v3889_v4, %v3788_v29  ;;  %v946_v29 = vmul.f32 %v3899_v11, %v3831_v44 }
  0xd2   : > { %v3902_v13 = vpop.permute.xlu1 %641 }
  0xd4   : > { %v428_v22 = vpop.permute.xlu0 %427  ;;  %3414 = vset.pattern.permute.xlu1 %v6199_v7 }
  0xd5   : > { %v585_v21 = vmul.f32 %v3896_v8, %v428_v22  ;;  %502 = vperm.xlu1 %3414, %v3820_v39  }
  0xd7   : > { %v781_v0 = vadd.f32 %v749_v9, %v585_v21  ;;  %v1026_v55 = vpop.permute.xlu1 %1025  ;;  %v1142_v9 = vmul.f32 %v3910_v57, %v1018_v60 }
  0xd8   : > { %v1144_v7 = vmul.f32 %v3910_v57, %v1026_v55  ;;  %v433_v10 = vpop.permute.xlu0 %432 }
  0xd9   : > { %v977_v6 = vadd.f32 %v945_v24, %v781_v0  ;;  %v586_v12 = vmul.f32 %v3896_v8, %v433_v10  ;;  %3415 = vset.pattern.permute.xlu1 %v6280_v27  ;;  %v6281_v24 = vmov 3   ;;  %v589_v10 = vmul.f32 %v3896_v8, %v3851_v52 }
  0xda   : > { %v1176_v21 = vadd.f32 %v1144_v7, %v980_v14  ;;  %873 = vperm.xlu1 %3415, %v3776_v25   ;;  %v753_v7 = vmul.f32 %v3889_v4, %v3790_v30  ;;  %v6282_v52 = vmov 1  }
  0xdb   : > { %v1173_v19 = vadd.f32 %v1141_v41, %v977_v6  ;;  %v782_v20 = vadd.f32 %v750_v43, %v586_v12 }
  0xdc   : > { %v1215_v22 = vadd.f32 %v3923_v63, %v1176_v21  ;;  %v3929_v44 = vpop.permute.xlu1 %457  ;;  %v463_v50 = vpop.permute.xlu0 %462  ;;  %v949_v21 = vmul.f32 %v3899_v11, %v3836_v46  ;;  %v785_v30 = vadd.f32 %v753_v7, %v589_v10 }
  0xdd   : > { %v1212_v45 = vadd.f32 %v3923_v63, %v1173_v19  ;;  %v978_v55 = vadd.f32 %v946_v29, %v782_v20 }
  0xde   : > { %v1247_v0 = vadd.f32 3.0, %v1215_v22  ;;  %3416 = vset.pattern.permute.xlu1 %v6281_v24  ;;  %v981_v61 = vadd.f32 %v949_v21, %v785_v30  ;;  %v3961_v21 = vld [vmem:[%s3564_s22 + $0xc8] sm:$0xff] }
  0xdf   : > { %v1244_v14 = vadd.f32 3.0, %v1212_v45  ;;  %v1174_v25 = vadd.f32 %v1142_v9, %v978_v55  ;;  %1065 = vperm.xlu1 %3416, %v3622_v15   ;;  %717 = vperm.xlu0 %3453, %v3961_v21  }
  0xe0   : > { %v1279_v43 = vmax.f32 %v1247_v0, 0.0  ;;  %v3939_v41 = vpop.permute.xlu0 %477 }
  0xe1   : > { %v1276_v60 = vmax.f32 %v1244_v14, 0.0  ;;  %v1213_v6 = vadd.f32 %v3923_v63, %v1174_v25  ;;  %v3942_v29 = vpop.permute.xlu1 %837 }
  0xe2   : > { %v1311_v12 = vmin.f32 %v1279_v43, 6.0 }
  0xe3   : > { %v1308_v19 = vmin.f32 %v1276_v60, 6.0  ;;  %v1245_v20 = vadd.f32 3.0, %v1213_v6  ;;  %3417 = vset.pattern.permute.xlu1 %v6282_v52 }
  0xe4   : > { %v1343_v9 = vmul.f32 %v1311_v12, %v1215_v22  ;;  %685 = vperm.xlu1 %3417, %v3626_v16   ;;  %v3948_v15 = vpop.permute.xlu0 %492 }
  0xe5   : > { %v1340_v55 = vmul.f32 %v1308_v19, %v1212_v45  ;;  %v1277_v0 = vmax.f32 %v1245_v20, 0.0  ;;  %v6283_v20 = vmov 0  }
  0xe6   : > { %v1375_v14 = vmul.f32 0.16666667, %v1343_v9  ;;  %v1030_v25 = vpop.permute.xlu1 %1029 }
  0xe7   : > { %v1372_v36 = vmul.f32 0.16666667, %v1340_v55  ;;  %v1309_v43 = vmin.f32 %v1277_v0, 6.0  ;;  %v1145_v46 = vmul.f32 %v3910_v57, %v1030_v25 }
  0xe8   : > { %1451 = vst.msk [vmem:[#allocation2 + $0x68] sm:$0xff] %vm1403_vm0, %v1375_v14  ;;  %3418 = vset.pattern.permute.xlu1 %v6280_v27  ;;  %v3953_v7 = vpop.permute.xlu0 %507  ;;  %v952_v14 = vmul.f32 %v3899_v11, %v3839_v47 }
  0xe9   : > { %1448 = vst.msk [vmem:[#allocation2 + $0x30] sm:$0xff] %vm1403_vm0, %v1372_v36  ;;  %v1341_v22 = vmul.f32 %v1309_v43, %v1213_v6  ;;  %v1177_v10 = vadd.f32 %v1145_v46, %v981_v61  ;;  %877 = vperm.xlu1 %3418, %v3820_v39   ;;  %v592_v36 = vmul.f32 %v3896_v8, %v463_v50 }
  0xeb   : > { %v1373_v45 = vmul.f32 0.16666667, %v1341_v22  ;;  %v1216_v60 = vadd.f32 %v3923_v63, %v1177_v10  ;;  %v650_v12 = vpop.permute.xlu1 %649  ;;  %v584_v10 = vmul.f32 %v3896_v8, %v3891_v5  ;;  %v755_v5 = vmul.f32 %v3889_v4, %v3798_v32 }
  0xec   : > { %v3958_v19 = vpop.permute.xlu0 %522  ;;  %v756_v6 = vmul.f32 %v3889_v4, %v650_v12  ;;  %v947_v32 = vmul.f32 %v3899_v11, %v3841_v48  ;;  %v950_v48 = vmul.f32 %v3899_v11, %v3942_v29 }
  0xed   : > { %1449 = vst.msk [vmem:[#allocation2 + $0x48] sm:$0xff] %vm1403_vm0, %v1373_v45  ;;  %v1248_v30 = vadd.f32 3.0, %v1216_v60  ;;  %3419 = vset.pattern.permute.xlu1 %v6283_v20 }
  0xee   : > { %512 = vperm.xlu1 %3419, %v3785_v28   ;;  %v788_v25 = vadd.f32 %v756_v6, %v592_v36  ;;  %v751_v36 = vmul.f32 %v3889_v4, %v3813_v37 }
  0xef   : > { %v1280_v61 = vmax.f32 %v1248_v30, 0.0 }
  0xf0   : > { %v842_v9 = vpop.permute.xlu1 %841  ;;  %v3969_v55 = vpop.permute.xlu0 %537  ;;  %v3980_v45 = vadd.f32 %v952_v14, %v788_v25 }
  0xf1   : > { %v1312_v0 = vmin.f32 %v1280_v61, 6.0  ;;  %v944_v61 = vmul.f32 %v3899_v11, %v3822_v40  ;;  %v951_v14 = vmul.f32 %v3899_v11, %v842_v9  ;;  %v754_v40 = vmul.f32 %v3889_v4, %v3902_v13 }
  0xf2   : > { %3420 = vset.pattern.permute.xlu1 %v6282_v52 }
  0xf3   : > { %689 = vperm.xlu1 %3420, %v3785_v28   ;;  %v1344_v43 = vmul.f32 %v1312_v0, %v1216_v60  ;;  %v748_v60 = vmul.f32 %v3889_v4, %v3778_v26  ;;  %v587_v0 = vmul.f32 %v3896_v8, %v3801_v33  ;;  %v590_v33 = vmul.f32 %v3896_v8, %v3879_v1 }
  0xf4   : > { %v3975_v46 = vpop.permute.xlu0 %552 }
  0xf5   : > { %v468_v22 = vpop.permute.xlu1 %467  ;;  %v1376_v50 = vmul.f32 0.16666667, %v1344_v43  ;;  %v780_v30 = vadd.f32 %v748_v60, %v584_v10  ;;  %v783_v43 = vadd.f32 %v751_v36, %v587_v0  ;;  %v786_v36 = vadd.f32 %v754_v40, %v590_v33 }
  0xf7   : > { %3421 = vset.pattern.permute.xlu1 %v6281_v24  ;;  %1452 = vst.msk [vmem:[#allocation2 + $0x70] sm:$0xff] %vm1403_vm0, %v1376_v50  ;;  %v976_v37 = vadd.f32 %v944_v61, %v780_v30  ;;  %v979_v30 = vadd.f32 %v947_v32, %v783_v43  ;;  %v982_v0 = vadd.f32 %v950_v48, %v786_v36 }
  0xf8   : > { %1073 = vperm.xlu1 %3421, %v3820_v39   ;;  %v3984_v47 = vpop.permute.xlu0 %567  ;;  %v591_v39 = vmul.f32 %v3896_v8, %v3929_v44 }
  0xfa   : > { %v654_v12 = vpop.permute.xlu1 %653  ;;  %v787_v44 = vadd.f32 %v755_v5, %v591_v39 }
  0xfb   : > { %v757_v1 = vmul.f32 %v3889_v4, %v654_v12 }
  0xfc   : > { %3422 = vset.pattern.permute.xlu1 %v6283_v20  ;;  %v983_v13 = vadd.f32 %v951_v14, %v787_v44  ;;  %v593_v14 = vmul.f32 %v3896_v8, %v468_v22 }
  0xfd   : > { %v1010_v6 = vpop.permute.xlu0 %1009  ;;  %517 = vperm.xlu1 %3422, %v3829_v42  }
  0xfe   : > { %v1140_v26 = vmul.f32 %v3910_v57, %v1010_v6  ;;  %v789_v12 = vadd.f32 %v757_v1, %v593_v14 }
  0xff   : > { %v1038_v25 = vpop.permute.xlu1 %1037 }
 0x100   : > { %v1172_v50 = vadd.f32 %v1140_v26, %v976_v37  ;;  %v1147_v10 = vmul.f32 %v3910_v57, %v1038_v25 }
 0x101   : > { %v1022_v60 = vpop.permute.xlu0 %1021  ;;  %3423 = vset.pattern.permute.xlu1 %v6280_v27 }
 0x102   : > { %v1143_v9 = vmul.f32 %v3910_v57, %v1022_v60  ;;  %885 = vperm.xlu1 %3423, %v3785_v28   ;;  %v1211_v61 = vadd.f32 %v3923_v63, %v1172_v50  ;;  %v1179_v39 = vadd.f32 %v1147_v10, %v983_v13 }
 0x104   : > { %v4014_v5 = vpop.permute.xlu1 %472  ;;  %v1175_v6 = vadd.f32 %v1143_v9, %v979_v30  ;;  %v1243_v29 = vadd.f32 3.0, %v1211_v61  ;;  %v1218_v28 = vadd.f32 %v3923_v63, %v1179_v39 }
 0x105   : > { %v1034_v26 = vpop.permute.xlu0 %1033 }
 0x106   : > { %v1146_v37 = vmul.f32 %v3910_v57, %v1034_v26  ;;  %3424 = vset.pattern.permute.xlu1 %v6281_v24  ;;  %v1214_v32 = vadd.f32 %v3923_v63, %v1175_v6  ;;  %v1275_v40 = vmax.f32 %v1243_v29, 0.0  ;;  %v1250_v43 = vadd.f32 3.0, %v1218_v28 }
 0x107   : > { %1077 = vperm.xlu1 %3424, %v3626_v16  }
 0x108   : > { %v1178_v25 = vadd.f32 %v1146_v37, %v982_v0  ;;  %v1246_v44 = vadd.f32 3.0, %v1214_v32  ;;  %v1307_v9 = vmin.f32 %v1275_v40, 6.0  ;;  %v1282_v30 = vmax.f32 %v1250_v43, 0.0  ;;  %v4030_v37 = vld [vmem:[%s3564_s22 + $0xe0] sm:$0xff] }
 0x109   : > { %v850_v50 = vpop.permute.xlu1 %849  ;;  %v1046_v10 = vpop.permute.xlu0 %1045  ;;  %729 = vperm.xlu0 %3453, %v4030_v37  }
 0x10a   : > { %v1217_v60 = vadd.f32 %v3923_v63, %v1178_v25  ;;  %v953_v33 = vmul.f32 %v3899_v11, %v850_v50  ;;  %v1149_v48 = vmul.f32 %v3910_v57, %v1046_v10  ;;  %v1278_v13 = vmax.f32 %v1246_v44, 0.0 }
 0x10b   : > { %3425 = vset.pattern.permute.xlu1 %v6282_v52  ;;  %v1339_v36 = vmul.f32 %v1307_v9, %v1211_v61  ;;  %v1314_v39 = vmin.f32 %v1282_v30, 6.0  ;;  %v595_v50 = vmul.f32 %v3896_v8, %v3939_v41 }
 0x10c   : > { %v1249_v16 = vadd.f32 3.0, %v1217_v60  ;;  %v985_v22 = vadd.f32 %v953_v33, %v789_v12  ;;  %697 = vperm.xlu1 %3425, %v3632_v17   ;;  %v1310_v6 = vmin.f32 %v1278_v13, 6.0 }
 0x10d   : > { %v1371_v29 = vmul.f32 0.16666667, %v1339_v36  ;;  %v1346_v14 = vmul.f32 %v1314_v39, %v1218_v28  ;;  %v4054_v39 = vld [vmem:[%s3564_s22 + $0xf8] sm:$0xff] }
 0x10e   : > { %v1281_v26 = vmax.f32 %v1249_v16, 0.0  ;;  %v1181_v0 = vadd.f32 %v1149_v48, %v985_v22  ;;  %v1042_v1 = vpop.permute.xlu1 %1041  ;;  %v1342_v25 = vmul.f32 %v1310_v6, %v1214_v32  ;;  %v955_v32 = vmul.f32 %v3899_v11, %v3845_v49  ;;  %6284 = vst [vmem:[#allocation9_spill] sm:$0xff] %v4054_v39  ;;  %741 = vperm.xlu0 %3453, %v4054_v39  }
 0x10f   : > { %1447 = vst.msk [vmem:[#allocation2 + $0x28] sm:$0xff] %vm1403_vm0, %v1371_v29  ;;  %v1378_v61 = vmul.f32 0.16666667, %v1346_v14  ;;  %v1148_v36 = vmul.f32 %v3910_v57, %v1042_v1 }
 0x110   : > { %v1313_v40 = vmin.f32 %v1281_v26, 6.0  ;;  %v1220_v43 = vadd.f32 %v3923_v63, %v1181_v0  ;;  %3426 = vset.pattern.permute.xlu1 %v6280_v27  ;;  %v1374_v44 = vmul.f32 0.16666667, %v1342_v25  ;;  %v758_v25 = vmul.f32 %v3889_v4, %v3807_v35 }
 0x111   : > { %889 = vperm.xlu1 %3426, %v3829_v42   ;;  %1454 = vst.msk [vmem:[#allocation2 + $0x90] sm:$0xff] %vm1403_vm0, %v1378_v61  ;;  %v1180_v6 = vadd.f32 %v1148_v36, %v3980_v45 }
 0x112   : > { %v1345_v10 = vmul.f32 %v1313_v40, %v1217_v60  ;;  %v1252_v12 = vadd.f32 3.0, %v1220_v43  ;;  %1450 = vst.msk [vmem:[#allocation2 + $0x50] sm:$0xff] %vm1403_vm0, %v1374_v44  ;;  %3458 = vset.pattern.permute.xlu0 %v6280_v27 }
 0x113   : > { %v662_v28 = vpop.permute.xlu1 %661  ;;  %v1219_v0 = vadd.f32 %v3923_v63, %v1180_v6  ;;  %929 = vperm.xlu0 %3458, %v3759_v23   ;;  %v594_v23 = vmul.f32 %v3896_v8, %v4014_v5 }
 0x114   : > { %v1377_v33 = vmul.f32 0.16666667, %v1345_v10  ;;  %v1284_v48 = vmax.f32 %v1252_v12, 0.0  ;;  %v759_v9 = vmul.f32 %v3889_v4, %v662_v28  ;;  %v598_v28 = vmul.f32 %v3896_v8, %v3948_v15 }
 0x115   : > { %3427 = vset.pattern.permute.xlu1 %v6283_v20 }
 0x116   : > { %1453 = vst.msk [vmem:[#allocation2 + $0x88] sm:$0xff] %vm1403_vm0, %v1377_v33  ;;  %v1316_v41 = vmin.f32 %v1284_v48, 6.0  ;;  %v791_v60 = vadd.f32 %v759_v9, %v595_v50  ;;  %527 = vperm.xlu1 %3427, %v3794_v31   ;;  %v1058_v50 = vpop.permute.xlu0 %1057 }
 0x117   : > { %937 = vperm.xlu0 %3458, %v4054_v39   ;;  %v1152_v48 = vmul.f32 %v3910_v57, %v1058_v50  ;;  %v4246_v39 = vmul.f32 %v3899_v11, %v3860_v56 }
 0x118   : > { %v1348_v30 = vmul.f32 %v1316_v41, %v1220_v43  ;;  %v854_v13 = vpop.permute.xlu1 %853  ;;  %v987_v16 = vadd.f32 %v955_v32, %v791_v60  ;;  %v790_v43 = vadd.f32 %v758_v25, %v594_v23  ;;  %v958_v41 = vmul.f32 %v3899_v11, %v3848_v51 }
 0x119   : > { %6298 = vst [vmem:[#allocation23_spill] sm:$0xff] %v4246_v39 }
 0x11a   : > { %v1380_v22 = vmul.f32 0.16666667, %v1348_v30  ;;  %3428 = vset.pattern.permute.xlu1 %v6282_v52 }
 0x11b   : > { %701 = vperm.xlu1 %3428, %v3794_v31   ;;  %3461 = vset.pattern.permute.xlu0 %v6281_v24 }
 0x11c   : > { %1456 = vst.msk [vmem:[#allocation2 + $0xb0] sm:$0xff] %vm1403_vm0, %v1380_v22 }
 0x11d   : > { %v483_v49 = vpop.permute.xlu1 %482 }
 0x11e   : > { %v596_v35 = vmul.f32 %v3896_v8, %v483_v49 }
 0x11f   : > { %3429 = vset.pattern.permute.xlu1 %v6281_v24 }
 0x120   : > { %1085 = vperm.xlu1 %3429, %v3829_v42   ;;  %v1251_v42 = vadd.f32 3.0, %v1219_v0 }
 0x122   : > { %v666_v26 = vpop.permute.xlu1 %665  ;;  %v1283_v29 = vmax.f32 %v1251_v42, 0.0 }
 0x123   : > { %v760_v12 = vmul.f32 %v3889_v4, %v666_v26 }
 0x124   : > { %3430 = vset.pattern.permute.xlu1 %v6283_v20  ;;  %v1315_v40 = vmin.f32 %v1283_v29, 6.0 }
 0x125   : > { %532 = vperm.xlu1 %3430, %v3858_v54   ;;  %v792_v32 = vadd.f32 %v760_v12, %v596_v35  ;;  %v1482_v35 = vld [vmem:[#allocation2] sm:$0xff]  ;;  %v1483_v12 = vld [vmem:[#allocation2 + $0x8] sm:$0xff] }
 0x126   : > { %v1347_v61 = vmul.f32 %v1315_v40, %v1219_v0 }
 0x127   : > { %v1050_v1 = vpop.permute.xlu1 %1049 }
 0x128   : > { %v1379_v10 = vmul.f32 0.16666667, %v1347_v61  ;;  %v1150_v5 = vmul.f32 %v3910_v57, %v1050_v1  ;;  %v761_v61 = vmul.f32 %v3889_v4, %v3816_v38  ;;  %v1479_v38 = vld [vmem:[%s6184_s3] sm:$0x7] }
 0x129   : > { %3431 = vset.pattern.permute.xlu1 %v6280_v27 }
 0x12a   : > { %897 = vperm.xlu1 %3431, %v3794_v31   ;;  %v954_v31 = vmul.f32 %v3899_v11, %v854_v13  ;;  %1455 = vst.msk [vmem:[#allocation2 + $0xa8] sm:$0xff] %vm1403_vm0, %v1379_v10 }
 0x12c   : > { %v488_v45 = vpop.permute.xlu1 %487 }
 0x12e   : > { %3432 = vset.pattern.permute.xlu1 %v6281_v24 }
 0x12f   : > { %1089 = vperm.xlu1 %3432, %v3632_v17   ;;  %v986_v17 = vadd.f32 %v954_v31, %v790_v43 }
 0x131   : > { %v862_v14 = vpop.permute.xlu1 %861  ;;  %v1182_v33 = vadd.f32 %v1150_v5, %v986_v17  ;;  %v4109_v5 = vld [vmem:[#allocation2 + $0x10] sm:$0xff] }
 0x133   : > { %3433 = vset.pattern.permute.xlu1 %v6282_v52  ;;  %v1221_v13 = vadd.f32 %v3923_v63, %v1182_v33 }
 0x134   : > { %709 = vperm.xlu1 %3433, %v3638_v18   ;;  %v956_v18 = vmul.f32 %v3899_v11, %v862_v14 }
 0x135   : > { %v1253_v36 = vadd.f32 3.0, %v1221_v13 }
 0x136   : > { %v1054_v44 = vpop.permute.xlu1 %1053  ;;  %v988_v22 = vadd.f32 %v956_v18, %v792_v32  ;;  %v1480_v18 = vld [vmem:[%s6184_s3 + $0x4] sm:$0x7]  ;;  %v4120_v32 = vld [vmem:[#allocation2 + $0x38] sm:$0xff] }
 0x137   : > { %v1151_v60 = vmul.f32 %v3910_v57, %v1054_v44  ;;  %v1285_v51 = vmax.f32 %v1253_v36, 0.0  ;;  %v597_v44 = vmul.f32 %v3896_v8, %v488_v45  ;;  %v2023_v36 = vrot.slane %v1483_v12, 1 }
 0x138   : > { %3434 = vset.pattern.permute.xlu1 %v6280_v27  ;;  %v1184_v6 = vadd.f32 %v1152_v48, %v988_v22 }
 0x139   : > { %901 = vperm.xlu1 %3434, %v3858_v54   ;;  %v1183_v15 = vadd.f32 %v1151_v60, %v987_v16  ;;  %v1317_v14 = vmin.f32 %v1285_v51, 6.0  ;;  %v793_v33 = vadd.f32 %v761_v61, %v597_v44  ;;  %v1590_v60 = vrot.slane %v4109_v5, 7 }
 0x13a   : > { %v1223_v42 = vadd.f32 %v3923_v63, %v1184_v6  ;;  %v2041_v6 = vrot.slane %v4109_v5, 1  ;;  %v4132_v51 = vrot.slane %v1479_v38, %v3874_v62 }
 0x13b   : > { %v674_v9 = vpop.permute.xlu1 %673  ;;  %v1222_v26 = vadd.f32 %v3923_v63, %v1183_v15  ;;  %v1349_v40 = vmul.f32 %v1317_v14, %v1221_v13  ;;  %v1481_v15 = vld [vmem:[%s6184_s3 + $0x8] sm:$0x7]  ;;  %v4142_v14 = vpop.permute.xlu0 %1069 }
 0x13c   : > { %v762_v30 = vmul.f32 %v3889_v4, %v674_v9  ;;  %v1255_v16 = vadd.f32 3.0, %v1223_v42  ;;  %v1554_v9 = vrot.slane %v1482_v35, 7  ;;  %6285 = vst [vmem:[#allocation10_spill] sm:$0xff] %v4132_v51  ;;  %v4162_v35 = vld [vmem:[#allocation2 + $0x20] sm:$0xff] }
 0x13d   : > { %3435 = vset.pattern.permute.xlu1 %v6283_v20  ;;  %v1254_v29 = vadd.f32 3.0, %v1222_v26  ;;  %v1381_v31 = vmul.f32 0.16666667, %v1349_v40  ;;  %v4149_v40 = vld [vmem:[#allocation2 + $0x78] sm:$0xff] }
 0x13e   : > { %v794_v49 = vadd.f32 %v762_v30, %v598_v28  ;;  %542 = vperm.xlu1 %3435, %v3804_v34   ;;  %v1287_v43 = vmax.f32 %v1255_v16, 0.0  ;;  %v1485_v30 = vld [vmem:[#allocation2 + $0x18] sm:$0xff]  ;;  %v4227_v16 = vld [vmem:[#allocation2 + $0xc0] sm:$0xff] }
 0x13f   : > { %v1286_v23 = vmax.f32 %v1254_v29, 0.0  ;;  %1457 = vst.msk [vmem:[#allocation2 + $0xc8] sm:$0xff] %vm1403_vm0, %v1381_v31  ;;  %v4139_v29 = vrot.slane %v1479_v38, %v3885_v3  ;;  %v4151_v31 = vld [vmem:[#allocation2 + $0x40] sm:$0xff]  ;;  %6293 = vst [vmem:[#allocation18_spill] sm:$0xff] %v4227_v16 }
 0x140   : > { %v866_v0 = vpop.permute.xlu1 %865  ;;  %v4094_v1 = vadd.f32 %v958_v41, %v794_v49  ;;  %v1319_v10 = vmin.f32 %v1287_v43, 6.0  ;;  %v1572_v41 = vrot.slane %v1483_v12, 7  ;;  %v4126_v49 = vld [vmem:[#allocation2 + $0x60] sm:$0xff]  ;;  %v2059_v43 = vrot.slane %v1485_v30, 1  ;;  %v3462_v30 = vld [vmem:[%s3564_s22 + $0xb8] sm:$0xff] }
 0x141   : > { %v1318_v17 = vmin.f32 %v1286_v23, 6.0  ;;  %v4147_v23 = vrot.slane %v1480_v18, %v3885_v3  ;;  %v1557_v44 = vrot.slane %v4126_v49, 7 }
 0x142   : > { %3436 = vset.pattern.permute.xlu1 %v6282_v52  ;;  %v1351_v45 = vmul.f32 %v1319_v10, %v1223_v42  ;;  %v4135_v42 = vrot.slane %v1480_v18, %v3874_v62  ;;  %v4160_v10 = vrot.slane %v1481_v15, %v3874_v62  ;;  %v4177_v62 = vld [vmem:[#allocation2 + $0x68] sm:$0xff]  ;;  %v2078_v49 = vsel %vm2077_vm2, %v2041_v6, %v2059_v43  ;;  %v4217_v43 = vpop.permute.xlu0 %1081 }
 0x143   : > { %713 = vperm.xlu1 %3436, %v3804_v34   ;;  %v1350_v28 = vmul.f32 %v1318_v17, %v1222_v26  ;;  %v4157_v17 = vrot.slane %v1479_v38, %v3882_v2  ;;  %v6302_v56 = vrot.slane %v4177_v62, 7 }
 0x144   : > { %v1383_v13 = vmul.f32 0.16666667, %v1351_v45  ;;  %v2096_v45 = vsel %vm2077_vm2, %v2023_v36, %v2041_v6  ;;  %v4199_v36 = vld [vmem:[#allocation2 + $0xa0] sm:$0xff]  ;;  %v4235_v6 = vmul.f32 %v3899_v11, %v3853_v53  ;;  %v601_v53 = vmul.f32 %v3896_v8, %v3953_v7 }
 0x145   : > { %v4099_v25 = vpop.permute.xlu1 %497  ;;  %v1382_v48 = vmul.f32 0.16666667, %v1350_v28  ;;  %6286 = vst [vmem:[#allocation11_spill] sm:$0xff] %v4157_v17  ;;  %v4165_v28 = vrot.slane %v1480_v18, %v3882_v2  ;;  %v4181_v18 = vrot.slane %v1481_v15, %v3885_v3  ;;  %v4197_v3 = vld [vmem:[#allocation2 + $0xb8] sm:$0xff]  ;;  %6291 = vst [vmem:[#allocation16_spill] sm:$0xff] %v4199_v36  ;;  %v4286_v7 = vmul.f32 %v4135_v42, %v4177_v62 }
 0x146   : > { %1459 = vst.msk [vmem:[#allocation2 + $0xe8] sm:$0xff] %vm1403_vm0, %v1383_v13  ;;  %6290 = vst [vmem:[#allocation15_spill] sm:$0xff] %v4197_v3  ;;  %v4223_v13 = vmul.f32 %v4132_v51, %v4109_v5  ;;  %v4294_v3 = vpop.permute.xlu0 %1093 }
 0x147   : > { %3437 = vset.pattern.permute.xlu1 %v6281_v24  ;;  %1458 = vst.msk [vmem:[#allocation2 + $0xd0] sm:$0xff] %vm1403_vm0, %v1382_v48  ;;  %v4214_v48 = vmul.f32 %v4139_v29, %v2096_v45  ;;  %v4229_v45 = vld [vmem:[#allocation2 + $0xe0] sm:$0xff]  ;;  %6306 = vst [vmem:[#allocation28_spill] sm:$0xff] %v4286_v7 }
 0x148   : > { %1097 = vperm.xlu1 %3437, %v3858_v54   ;;  %v957_v54 = vmul.f32 %v3899_v11, %v866_v0  ;;  %6294 = vst [vmem:[#allocation19_spill] sm:$0xff] %v4229_v45  ;;  %6309 = vst [vmem:[#allocation31_spill] sm:$0xff] %v4294_v3 }
 0x149   : > { %6292 = vst [vmem:[#allocation17_spill] sm:$0xff] %v4214_v48 }
 0x14a   : > { %v4106_v50 = vpop.permute.xlu1 %677  ;;  %v989_v26 = vadd.f32 %v957_v54, %v793_v33  ;;  %v1611_v54 = vsel %vm1610_vm3, %v1572_v41, %v1590_v60  ;;  %v4173_v33 = vld [vmem:[#allocation2 + $0x98] sm:$0xff]  ;;  %v4185_v60 = vrot.slane %v1481_v15, %v3882_v2 }
 0x14b   : > { %6287 = vst [vmem:[#allocation12_spill] sm:$0xff] %v4173_v33  ;;  %v4231_v2 = vld [vmem:[#allocation2 + $0xd8] sm:$0xff]  ;;  %v4250_v33 = vmul.f32 %v3899_v11, %v3865_v58  ;;  %v1632_v58 = vsel %vm1610_vm3, %v1557_v44, %v6302_v56  ;;  %v4282_v44 = vmul.f32 %v4132_v51, %v4177_v62  ;;  %v4292_v56 = vld [vmem:[#allocation2 + $0x48] sm:$0xff]  ;;  %v763_v16 = vmul.f32 %v3889_v4, %v4106_v50 }
 0x14c   : > { %3438 = vset.pattern.permute.xlu1 %v6283_v20  ;;  %6288 = vst [vmem:[#allocation13_spill] sm:$0xff] %v4185_v60  ;;  %6295 = vst [vmem:[#allocation20_spill] sm:$0xff] %v4231_v2  ;;  %v4313_v3 = vmul.f32 %v4157_v17, %v1632_v58  ;;  %v4321_v50 = vmul.f32 %v3896_v8, %v3969_v55  ;;  %v4336_v48 = vmul.f32 %v4132_v51, %v4292_v56 }
 0x14d   : > { %547 = vperm.xlu1 %3438, %v3961_v21   ;;  %6299 = vst [vmem:[#allocation24_spill] sm:$0xff] %v4250_v33  ;;  %6305 = vst [vmem:[#allocation27_spill] sm:$0xff] %v4282_v44  ;;  %v6311_v33 = vrot.slane %v4120_v32, 1 }
 0x14e   : > { %6308 = vst [vmem:[#allocation30_spill] sm:$0xff] %v4292_v56  ;;  %6313 = vst [vmem:[#allocation33_spill] sm:$0xff] %v4313_v3 }
 0x14f   : > { %v1062_v22 = vpop.permute.xlu1 %1061  ;;  %6314 = vst [vmem:[#allocation34_spill] sm:$0xff] %v4321_v50  ;;  %6317 = vst [vmem:[#allocation37_spill] sm:$0xff] %v4336_v48  ;;  %v1155_v50 = vmul.f32 %v3910_v57, %v4142_v14  ;;  %v4352_v48 = vpop.permute.xlu0 %1105 }
 0x150   : > { %v1153_v0 = vmul.f32 %v3910_v57, %v1062_v22  ;;  %v4193_v22 = vmul.f32 %v4132_v51, %v1483_v12  ;;  %v4211_v12 = vmul.f32 %v4157_v17, %v1611_v54  ;;  %6320 = vst [vmem:[#allocation39_spill] sm:$0xff] %v4352_v48 }
 0x151   : > { %3439 = vset.pattern.permute.xlu1 %v6280_v27 }
 0x152   : > { %v1185_v61 = vadd.f32 %v1153_v0, %v989_v26  ;;  %909 = vperm.xlu1 %3439, %v3804_v34   ;;  %v1629_v34 = vsel %vm1610_vm3, %v1554_v9, %v1572_v41  ;;  %v4187_v9 = vld [vmem:[#allocation2 + $0x58] sm:$0xff]  ;;  %v4189_v41 = vld [vmem:[#allocation2 + $0x80] sm:$0xff]  ;;  %v4205_v26 = vld [vmem:[#allocation2 + $0x30] sm:$0xff] }
 0x153   : > { %6289 = vst [vmem:[#allocation14_spill] sm:$0xff] %v4187_v9  ;;  %v4208_v0 = vmul.f32 %v4157_v17, %v1629_v34  ;;  %v4242_v34 = vld [vmem:[#allocation2 + $0xf8] sm:$0xff]  ;;  %v1591_v36 = vrot.slane %v4205_v26, 7  ;;  %v6312_v2 = vrot.slane %v4205_v26, 1 }
 0x154   : > { %v4175_v38 = vpop.permute.xlu1 %502  ;;  %v4202_v15 = vadd.f32 %v3923_v63, %v1185_v61  ;;  %6297 = vst [vmem:[#allocation22_spill] sm:$0xff] %v4242_v34  ;;  %v4276_v61 = vld [vmem:[%s3564_s22 + $0xd0] sm:$0xff]  ;;  %v4298_v34 = vmul.f32 %v4132_v51, %v4205_v26 }
 0x155   : > { %6304 = vst [vmem:[#allocation26_spill] sm:$0xff] %v4276_v61  ;;  %v2079_v45 = vsel %vm2077_vm2, %v6312_v2, %v6311_v33  ;;  %v1574_v2 = vrot.slane %v4292_v56, 7  ;;  %v4323_v33 = vld [vmem:[#allocation2 + $0x50] sm:$0xff] }
 0x156   : > { %3440 = vset.pattern.permute.xlu1 %v6281_v24  ;;  %6310 = vst [vmem:[#allocation32_spill] sm:$0xff] %v4298_v34  ;;  %v4329_v3 = vmul.f32 %v4139_v29, %v2079_v45  ;;  %v4332_v7 = vmul.f32 %v4147_v23, %v2079_v45  ;;  %v6319_v45 = vrot.slane %v4162_v35, 7  ;;  %v1592_v55 = vrot.slane %v4323_v33, 7 }
 0x157   : > { %1101 = vperm.xlu1 %3440, %v3462_v30   ;;  %v4238_v30 = vmul.f32 %v4139_v29, %v2078_v49  ;;  %v1256_v49 = vadd.f32 3.0, %v4202_v15 }
 0x158   : > { %6315 = vst [vmem:[#allocation35_spill] sm:$0xff] %v4329_v3  ;;  %6316 = vst [vmem:[#allocation36_spill] sm:$0xff] %v4332_v7  ;;  %v4345_v3 = vmul.f32 %v3896_v8, %v3975_v46  ;;  %v4360_v46 = vmul.f32 %v4185_v60, %v1632_v58 }
 0x159   : > { %6296 = vst [vmem:[#allocation21_spill] sm:$0xff] %v4238_v30  ;;  %v874_v54 = vpop.permute.xlu1 %873  ;;  %v6300_v30 = vld [vmem:[#allocation4_spill] sm:$0xff]  ;;  %v1288_v44 = vmax.f32 %v1256_v49, 0.0  ;;  %v599_v49 = vmul.f32 %v3896_v8, %v4099_v25 }
 0x15a   : > { %v4256_v5 = vmul.f32 %v3899_v11, %v6300_v30  ;;  %v4270_v30 = vmul.f32 %v3896_v8, %v3958_v19  ;;  %v4290_v19 = vmul.f32 %v4160_v10, %v4177_v62  ;;  %6318 = vst [vmem:[#allocation38_spill] sm:$0xff] %v4345_v3  ;;  %v4367_v3 = vmul.f32 %v4135_v42, %v4292_v56 }
 0x15b   : > { %3441 = vset.pattern.permute.xlu1 %v6282_v52  ;;  %v795_v25 = vadd.f32 %v763_v16, %v599_v49  ;;  %v1320_v9 = vmin.f32 %v1288_v44, 6.0  ;;  %v6321_v16 = vrot.slane %v4151_v31, 7  ;;  %v1496_v49 = vld [vmem:[#allocation2 + $0x70] sm:$0xff] }
 0x15c   : > { %6301 = vst [vmem:[#allocation4_spill] sm:$0xff] %v4256_v5  ;;  %6303 = vst [vmem:[#allocation25_spill] sm:$0xff] %v4270_v30  ;;  %v4272_v5 = vld [vmem:[#allocation2 + $0x28] sm:$0xff]  ;;  %721 = vperm.xlu1 %3441, %v4276_v61   ;;  %v4310_v30 = vmul.f32 %v4135_v42, %v4205_v26  ;;  %v1691_v61 = vmul.f32 %v4165_v28, %v1632_v58 }
 0x15d   : > { %6307 = vst [vmem:[#allocation29_spill] sm:$0xff] %v4290_v19  ;;  %v1573_v32 = vrot.slane %v4272_v5, 7  ;;  %v959_v19 = vmul.f32 %v3899_v11, %v874_v54  ;;  %v1631_v54 = vsel %vm1610_vm3, %v6321_v16, %v1574_v2  ;;  %v1352_v35 = vmul.f32 %v1320_v9, %v4202_v15 }
 0x15e   : > { %v1066_v39 = vpop.permute.xlu1 %1065  ;;  %v4375_v9 = vmul.f32 %v4160_v10, %v4292_v56  ;;  %v1689_v48 = vmul.f32 %v4165_v28, %v1631_v54  ;;  %v4389_v56 = vpop.permute.xlu0 %1117 }
 0x15f   : > { %v1630_v7 = vsel %vm1610_vm3, %v6319_v45, %v1573_v32  ;;  %v1154_v34 = vmul.f32 %v3910_v57, %v1066_v39  ;;  %v991_v44 = vadd.f32 %v959_v19, %v795_v25  ;;  %v1612_v45 = vsel %vm1610_vm3, %v1573_v32, %v1591_v36  ;;  %v6322_v25 = vld [vmem:[#allocation3_spill] sm:$0xff] }
 0x160   : > { %3442 = vset.pattern.permute.xlu1 %v6280_v27  ;;  %v1687_v58 = vmul.f32 %v4165_v28, %v1630_v7  ;;  %v1384_v15 = vmul.f32 0.16666667, %v1352_v35  ;;  %v1655_v36 = vmul.f32 %v4157_v17, %v1631_v54  ;;  %v4381_v32 = vsel %vm1610_vm3, %v1574_v2, %v1592_v55  ;;  %6323 = vst [vmem:[#allocation3_spill] sm:$0xff] %v4389_v56 }
 0x161   : > { %913 = vperm.xlu1 %3442, %v3961_v21   ;;  %v1186_v39 = vadd.f32 %v1154_v34, %v4094_v1  ;;  %v1187_v19 = vadd.f32 %v1155_v50, %v991_v44  ;;  %v1688_v16 = vmul.f32 %v4165_v28, %v1612_v45  ;;  %v2044_v44 = vrot.slane %v1496_v49, 1 }
 0x162   : > { %1460 = vst.msk [vmem:[#allocation2 + $0xf0] sm:$0xff] %vm1403_vm0, %v1384_v15  ;;  %v4419_v56 = vmul.f32 %v4135_v42, %v1496_v49 }
 0x163   : > { %v686_v14 = vpop.permute.xlu1 %685  ;;  %v1225_v1 = vadd.f32 %v3923_v63, %v1186_v39  ;;  %v1226_v50 = vadd.f32 %v3923_v63, %v1187_v19  ;;  %v1755_v39 = vmul.f32 %v4185_v60, %v1631_v54  ;;  %v4400_v63 = vmul.f32 %v4132_v51, %v1496_v49 }
 0x164   : > { %v765_v31 = vmul.f32 %v3889_v4, %v686_v14  ;;  %v1593_v14 = vrot.slane %v1496_v49, 7  ;;  %v4406_v19 = vadd.f32 %v1691_v61, %v1655_v36  ;;  %v6329_v54 = vrot.slane %v4177_v62, 7  ;;  %6330 = vst [vmem:[#allocation45_spill] sm:$0xff] %v4419_v56 }
 0x165   : > { %3443 = vset.pattern.permute.xlu1 %v6283_v20  ;;  %v1257_v2 = vadd.f32 3.0, %v1225_v1  ;;  %v1258_v15 = vadd.f32 3.0, %v1226_v50  ;;  %6325 = vst [vmem:[#allocation41_spill] sm:$0xff] %v4400_v63  ;;  %v4423_v61 = vmul.f32 %v4160_v10, %v1496_v49  ;;  %v6331_v36 = vrot.slane %v4149_v40, 1 }
 0x166   : > { %557 = vperm.xlu1 %3443, %v6322_v25   ;;  %v797_v34 = vadd.f32 %v765_v31, %v601_v53  ;;  %v1653_v25 = vmul.f32 %v4157_v17, %v1630_v7  ;;  %v1719_v53 = vadd.f32 %v1687_v58, %v4208_v0  ;;  %v1756_v31 = vmul.f32 %v4185_v60, %v4381_v32  ;;  %v4411_v58 = vld [vmem:[%s3564_s22 + $0xd8] sm:$0xff] }
 0x167   : > { %v4404_v7 = vmul.f32 %v3896_v8, %v3984_v47  ;;  %6327 = vst [vmem:[#allocation43_spill] sm:$0xff] %v4406_v19  ;;  %v1289_v0 = vmax.f32 %v1257_v2, 0.0  ;;  %v1720_v47 = vadd.f32 %v1688_v16, %v4211_v12  ;;  %v2081_v2 = vsel %vm2077_vm2, %v2044_v44, %v6331_v36 }
 0x168   : > { %v878_v35 = vpop.permute.xlu1 %877  ;;  %v4392_v55 = vadd.f32 %v4235_v6, %v797_v34  ;;  %v4408_v6 = vld [vmem:[#allocation2 + $0x118] sm:$0xff]  ;;  %v1614_v34 = vsel %vm1610_vm3, %v6329_v54, %v1593_v14  ;;  %v1721_v63 = vadd.f32 %v1689_v48, %v1653_v25  ;;  %v1787_v19 = vadd.f32 %v1755_v39, %v1719_v53  ;;  %v4431_v54 = vld [vmem:[#allocation2 + $0x88] sm:$0xff]  ;;  %v682_v48 = vpop.permute.xlu0 %681 }
 0x169   : > { %6326 = vst [vmem:[#allocation42_spill] sm:$0xff] %v4404_v7  ;;  %6328 = vst [vmem:[#allocation44_spill] sm:$0xff] %v4408_v6  ;;  %v1290_v7 = vmax.f32 %v1258_v15, 0.0  ;;  %v1788_v14 = vadd.f32 %v1756_v31, %v1720_v47  ;;  %v4435_v16 = vmul.f32 %v4157_v17, %v1614_v34  ;;  %v4438_v49 = vmul.f32 %v4165_v28, %v1614_v34 }
 0x16a   : > { %6324 = vst [vmem:[#allocation40_spill] sm:$0xff] %v4392_v55  ;;  %3444 = vset.pattern.permute.xlu1 %v6282_v52  ;;  %v1321_v55 = vmin.f32 %v1289_v0, 6.0  ;;  %v1690_v40 = vmul.f32 %v4165_v28, %v4381_v32  ;;  %v6332_v53 = vrot.slane %v4177_v62, 1  ;;  %v4448_v31 = vmul.f32 %v4139_v29, %v2081_v2 }
 0x16b   : > { %725 = vperm.xlu1 %3444, %v4411_v58   ;;  %v1322_v12 = vmin.f32 %v1290_v7, 6.0  ;;  %v4451_v15 = vmul.f32 %v4147_v23, %v2081_v2  ;;  %v1654_v7 = vmul.f32 %v4157_v17, %v1612_v45  ;;  %v1789_v0 = vadd.f32 %v4360_v46, %v1721_v63 }
 0x16c   : > { %v1353_v25 = vmul.f32 %v1321_v55, %v1225_v1  ;;  %v2099_v39 = vsel %vm2077_vm2, %v6332_v53, %v2044_v44  ;;  %6333 = vst [vmem:[#allocation46_spill] sm:$0xff] %v4448_v31  ;;  %v1576_v1 = vrot.slane %v4431_v54, 7  ;;  %v1855_v62 = vadd.f32 %v4193_v22, %v1787_v19 }
 0x16d   : > { %v4429_v52 = vpop.permute.xlu1 %512  ;;  %v1354_v55 = vmul.f32 %v1322_v12, %v1226_v50  ;;  %v1856_v44 = vadd.f32 %v4223_v13, %v1788_v14  ;;  %v764_v36 = vmul.f32 %v3889_v4, %v682_v48  ;;  %v600_v53 = vmul.f32 %v3896_v8, %v4175_v38  ;;  %v4470_v50 = vld [vmem:[#allocation2 + $0x90] sm:$0xff] }
 0x16e   : > { %v1385_v47 = vmul.f32 0.16666667, %v1353_v25  ;;  %v4465_v45 = vmul.f32 %v4181_v18, %v2099_v39  ;;  %v2024_v46 = vrot.slane %v4272_v5, 1  ;;  %v1722_v22 = vadd.f32 %v1690_v40, %v1654_v7 }
 0x16f   : > { %3446 = vset.pattern.permute.xlu1 %v6281_v24  ;;  %v4474_v13 = vmul.f32 %v4181_v18, %v2081_v2  ;;  %v1891_v38 = vmul.f32 %v4135_v42, %v4272_v5  ;;  %v1386_v63 = vmul.f32 0.16666667, %v1354_v55  ;;  %v960_v19 = vmul.f32 %v3899_v11, %v878_v35 }
 0x170   : > { %1109 = vperm.xlu1 %3446, %v3961_v21   ;;  %v1825_v21 = vmul.f32 %v4132_v51, %v4272_v5  ;;  %1461 = vst.msk [vmem:[#allocation2 + $0x108] sm:$0xff] %vm1403_vm0, %v1385_v47  ;;  %v1758_v12 = vmul.f32 %v4185_v60, %v1614_v34  ;;  %v6334_v48 = vrot.slane %v4189_v41, 7  ;;  %v4488_v2 = vmul.f32 %v4147_v23, %v2099_v39  ;;  %v4494_v34 = vld [vmem:[#allocation2 + $0x100] sm:$0xff] }
 0x171   : > { %v1923_v5 = vadd.f32 %v1891_v38, %v1855_v62  ;;  %v1594_v25 = vrot.slane %v4470_v50, 7  ;;  %v1924_v35 = vadd.f32 %v4310_v30, %v1856_v44  ;;  %v796_v7 = vadd.f32 %v764_v36, %v600_v53  ;;  %1462 = vst.msk [vmem:[#allocation2 + $0x110] sm:$0xff] %vm1403_vm0, %v1386_v63  ;;  %6335 = vst [vmem:[#allocation47_spill] sm:$0xff] %v4494_v34  ;;  %v6354_v34 = vld [vmem:[#allocation36_spill] sm:$0xff] }
 0x172   : > { %v4462_v56 = vpop.permute.xlu1 %689  ;;  %v1857_v14 = vadd.f32 %v1825_v21, %v1789_v0  ;;  %v4485_v40 = vsel %vm1610_vm3, %v6334_v48, %v1576_v1  ;;  %v6336_v41 = vrot.slane %v4205_v26, 1  ;;  %v1790_v55 = vadd.f32 %v1758_v12, %v1722_v22  ;;  %v4505_v21 = vld [vmem:[#allocation2 + $0x120] sm:$0xff]  ;;  %v6346_v12 = vld [vmem:[#allocation30_spill] sm:$0xff] }
 0x173   : > { %v1960_v47 = vmul.f32 %v4160_v10, %v4323_v33  ;;  %v4503_v62 = vmul.f32 %v4139_v29, %v2099_v39  ;;  %6338 = vst [vmem:[#allocation49_spill] sm:$0xff] %v4505_v21  ;;  %v4509_v44 = vsel %vm1610_vm3, %v1576_v1, %v1594_v25  ;;  %v1759_v26 = vmul.f32 %v4185_v60, %v4485_v40 }
 0x174   : > { %3447 = vset.pattern.permute.xlu1 %v6283_v20  ;;  %v2097_v0 = vsel %vm2077_vm2, %v2024_v46, %v6336_v41  ;;  %v992_v36 = vadd.f32 %v960_v19, %v796_v7  ;;  %v1925_v46 = vadd.f32 %v4367_v3, %v1857_v14  ;;  %v1656_v22 = vmul.f32 %v4157_v17, %v4381_v32  ;;  %v6339_v7 = vld [vmem:[#allocation32_spill] sm:$0xff] }
 0x175   : > { %562 = vperm.xlu1 %3447, %v4030_v37   ;;  %6337 = vst [vmem:[#allocation48_spill] sm:$0xff] %v4503_v62  ;;  %v2043_v39 = vrot.slane %v4323_v33, 1  ;;  %v1991_v1 = vadd.f32 %v4375_v9, %v1923_v5  ;;  %v1992_v63 = vadd.f32 %v1960_v47, %v1924_v35  ;;  %v2120_v19 = vmul.f32 %v4139_v29, %v2097_v0  ;;  %v6340_v5 = vld [vmem:[#allocation43_spill] sm:$0xff] }
 0x176   : > { %v1760_v32 = vmul.f32 %v4185_v60, %v4509_v44  ;;  %v1158_v14 = vmul.f32 %v3910_v57, %v4217_v43  ;;  %v2186_v25 = vmul.f32 %v4147_v23, %v2097_v0  ;;  %v1858_v9 = vadd.f32 %v6339_v7, %v1790_v55  ;;  %v6343_v55 = vld [vmem:[#allocation14_spill] sm:$0xff]  ;;  %v6345_v7 = vld [vmem:[#allocation17_spill] sm:$0xff] }
 0x177   : > { %v1074_v30 = vpop.permute.xlu1 %1073  ;;  %v1791_v35 = vadd.f32 %v1759_v26, %v6340_v5  ;;  %v4543_v43 = vmul.f32 %v4160_v10, %v4470_v50  ;;  %v1724_v0 = vadd.f32 %v4438_v49, %v1656_v22  ;;  %v2150_v5 = vadd.f32 %v6345_v7, %v1991_v1  ;;  %v6349_v49 = vld [vmem:[#allocation12_spill] sm:$0xff] }
 0x178   : > { %v1156_v53 = vmul.f32 %v3910_v57, %v1074_v30  ;;  %v6342_v30 = vld [vmem:[#allocation29_spill] sm:$0xff]  ;;  %v6347_v38 = vrot.slane %v6346_v12, 1  ;;  %v6350_v22 = vrot.slane %v6349_v49, 1  ;;  %v1828_v1 = vmul.f32 %v4132_v51, %v4323_v33  ;;  %v4569_v12 = vld [vmem:[#allocation2 + $0xa8] sm:$0xff] }
 0x179   : > { %3448 = vset.pattern.permute.xlu1 %v6280_v27  ;;  %v1792_v7 = vadd.f32 %v1760_v32, %v1724_v0  ;;  %v6353_v49 = vld [vmem:[#allocation37_spill] sm:$0xff]  ;;  %v602_v32 = vmul.f32 %v3896_v8, %v4429_v52  ;;  %v1693_v52 = vmul.f32 %v4165_v28, %v4485_v40 }
 0x17a   : > { %v1188_v48 = vadd.f32 %v1156_v53, %v992_v36  ;;  %921 = vperm.xlu1 %3448, %v4411_v58   ;;  %v4535_v58 = vld [vmem:[%s6183_s2] ss:$0 sm:$0xff]  ;;  %v1993_v36 = vadd.f32 %v6342_v30, %v1925_v46  ;;  %v6344_v53 = vrot.slane %v6343_v55, 1  ;;  %v2098_v46 = vsel %vm2077_vm2, %v6347_v38, %v2043_v39  ;;  %v6348_v30 = vld [vmem:[#allocation21_spill] sm:$0xff]  ;;  %v6352_v38 = vld [vmem:[#allocation26_spill] sm:$0xff] }
 0x17b   : > { %v2151_v3 = vadd.f32 %v6348_v30, %v1992_v63  ;;  %v6351_v55 = vrot.slane %v4470_v50, 1  ;;  %v1859_v6 = vadd.f32 %v6353_v49, %v1791_v35  ;;  %v1860_v31 = vadd.f32 %v1828_v1, %v1792_v7  ;;  %v4598_v1 = vld [vmem:[#allocation2 + $0xb0] sm:$0xff] }
 0x17c   : > { %v1227_v41 = vadd.f32 %v4535_v58, %v1188_v48  ;;  %v4538_v47 = vpop.permute.xlu1 %517  ;;  %v2080_v26 = vsel %vm2077_vm2, %v2043_v39, %v6344_v53  ;;  %v1894_v48 = vmul.f32 %v4135_v42, %v4323_v33  ;;  %v766_v39 = vmul.f32 %v3889_v4, %v4462_v56 }
 0x17d   : > { %6341 = vst [vmem:[#allocation32_spill] sm:$0xff] %v4538_v47  ;;  %v4565_v53 = vsel %vm2077_vm2, %v6351_v55, %v6350_v22  ;;  %v4575_v30 = vmul.f32 %v4139_v29, %v2080_v26  ;;  %v2152_v22 = vadd.f32 %v2120_v19, %v1993_v36  ;;  %v2188_v55 = vmul.f32 %v4147_v23, %v2098_v46 }
 0x17e   : > { %3449 = vset.pattern.permute.xlu1 %v6281_v24  ;;  %v1926_v63 = vadd.f32 %v1894_v48, %v1858_v9  ;;  %v1259_v21 = vadd.f32 3.0, %v1227_v41  ;;  %v2189_v33 = vmul.f32 %v4147_v23, %v2080_v26  ;;  %v2218_v56 = vadd.f32 %v2186_v25, %v2150_v5  ;;  %v6356_v25 = vld [vmem:[#allocation28_spill] sm:$0xff] }
 0x17f   : > { %1113 = vperm.xlu1 %3449, %v6352_v38   ;;  %v2219_v38 = vadd.f32 %v6354_v34, %v2151_v3  ;;  %v2254_v9 = vmul.f32 %v4181_v18, %v2098_v46  ;;  %v1577_v48 = vrot.slane %v4569_v12, 7  ;;  %v798_v35 = vadd.f32 %v766_v39, %v602_v32  ;;  %v4593_v3 = vld [vmem:[%s3564_s22 + $0xe8] sm:$0xff] }
 0x180   : > { %v1291_v49 = vmax.f32 %v1259_v21, 0.0  ;;  %v6355_v36 = vmov 1   ;;  %v1994_v47 = vadd.f32 %v4423_v61, %v1926_v63  ;;  %v2255_v62 = vmul.f32 %v4181_v18, %v2080_v26  ;;  %6357 = vst [vmem:[#allocation43_spill] sm:$0xff] %v4593_v3  ;;  %v6358_v32 = vld [vmem:[#allocation16_spill] sm:$0xff] }
 0x181   : > { %v886_v0 = vpop.permute.xlu1 %885  ;;  %v1927_v34 = vadd.f32 %v6356_v25, %v1859_v6  ;;  %v2220_v5 = vadd.f32 %v2188_v55, %v2152_v22  ;;  %v1694_v21 = vmul.f32 %v4165_v28, %v4509_v44  ;;  %v2286_v61 = vadd.f32 %v2254_v9, %v2218_v56  ;;  %v4611_v22 = vld [vmem:[%s6185_s4] ss:$0 sm:$0xff]  ;;  %v6360_v55 = vld [vmem:[#allocation45_spill] sm:$0xff] }
 0x182   : > { %v962_v19 = vmul.f32 %v3899_v11, %v886_v0  ;;  %v1323_v7 = vmin.f32 %v1291_v49, 6.0  ;;  %v2287_v63 = vadd.f32 %v2255_v62, %v2219_v38  ;;  %v1963_v26 = vmul.f32 %v4160_v10, %v4431_v54  ;;  %v6361_v38 = vld [vmem:[#allocation35_spill] sm:$0xff] }
 0x183   : > { %3451 = vset.pattern.permute.xlu1 %v6355_v36  ;;  %v6359_v0 = vrot.slane %v6358_v32, 7  ;;  %v1928_v49 = vadd.f32 %v6360_v55, %v1860_v31  ;;  %v2153_v9 = vadd.f32 %v6361_v38, %v1994_v47  ;;  %v2288_v47 = vadd.f32 %v4465_v45, %v2220_v5  ;;  %v4640_v5 = vld [vmem:[%s3564_s22 + $0xf0] sm:$0xff] }
 0x184   : > { %733 = vperm.xlu1 %3451, %v4593_v3   ;;  %v994_v39 = vadd.f32 %v962_v19, %v798_v35  ;;  %v1355_v35 = vmul.f32 %v1323_v7, %v1227_v41  ;;  %v6362_v19 = vld [vmem:[#allocation33_spill] sm:$0xff]  ;;  %v1995_v3 = vadd.f32 %v1963_v26, %v1927_v34  ;;  %v6363_v41 = vld [vmem:[#allocation40_spill] sm:$0xff]  ;;  %v2122_v34 = vmul.f32 %v4139_v29, %v2098_v46 }
 0x185   : > { %v4606_v6 = vsel %vm1610_vm3, %v6359_v0, %v1577_v48  ;;  %v1725_v32 = vadd.f32 %v1693_v52, %v6362_v19  ;;  %v1595_v0 = vrot.slane %v4598_v1, 7  ;;  %v4626_v52 = vadd.f32 %v4611_v22, %v2286_v61 }
 0x186   : > { %v1078_v25 = vpop.permute.xlu1 %1077  ;;  %v1190_v56 = vadd.f32 %v1158_v14, %v994_v39  ;;  %v1761_v11 = vmul.f32 %v4185_v60, %v4606_v6  ;;  %v1387_v8 = vmul.f32 0.16666667, %v1355_v35  ;;  %v4634_v39 = vadd.f32 %v4611_v22, %v2287_v63 }
 0x187   : > { %v1157_v62 = vmul.f32 %v3910_v57, %v1078_v25  ;;  %6364 = vst [vmem:[#allocation29_spill] sm:$0xff] %v4626_v52  ;;  %v4631_v7 = vsel %vm1610_vm3, %v1577_v48, %v1595_v0  ;;  %v1996_v26 = vadd.f32 %v4543_v43, %v1928_v49  ;;  %v2221_v61 = vadd.f32 %v2189_v33, %v2153_v9 }
 0x188   : > { %3452 = vset.pattern.permute.xlu1 %v6280_v27  ;;  %v1229_v31 = vadd.f32 %v4535_v58, %v1190_v56  ;;  %6365 = vst [vmem:[#allocation14_spill] sm:$0xff] %v4634_v39  ;;  %1463 = vst.msk [vmem:[#allocation2 + $0x128] sm:$0xff] %vm1403_vm0, %v1387_v8  ;;  %v2027_v46 = vrot.slane %v4431_v54, 1  ;;  %v2154_v55 = vadd.f32 %v2122_v34, %v1995_v3  ;;  %v2357_v49 = vsel %vm1403_vm0, %v4626_v52, 0.0 }
 0x189   : > { %v1189_v14 = vadd.f32 %v1157_v62, %v6363_v41  ;;  %925 = vperm.xlu1 %3452, %v4030_v37   ;;  %v1762_v63 = vmul.f32 %v4185_v60, %v4631_v7  ;;  %v1793_v35 = vadd.f32 %v1761_v11, %v1725_v32  ;;  %v4648_v8 = vadd.f32 %v4611_v22, %v2288_v47  ;;  %v6367_v62 = vld [vmem:[#allocation25_spill] sm:$0xff] }
 0x18a   : > { %v1261_v25 = vadd.f32 3.0, %v1229_v31  ;;  %v1726_v33 = vadd.f32 %v1694_v21, %v4435_v16  ;;  %v2358_v38 = vsel %vm1403_vm0, %v4634_v39, 0.0  ;;  %v2155_v11 = vadd.f32 %v4575_v30, %v1996_v26 }
 0x18b   : > { %v1228_v37 = vadd.f32 %v4535_v58, %v1189_v14  ;;  %v698_v45 = vpop.permute.xlu1 %697  ;;  %6366 = vst [vmem:[#allocation17_spill] sm:$0xff] %v4648_v8  ;;  %v2289_v32 = vadd.f32 %v4474_v13, %v2221_v61  ;;  %v6368_v0 = vrot.slane %v4470_v50, 1  ;;  %v2222_v16 = vadd.f32 %v4488_v2, %v2154_v55  ;;  %v6369_v14 = vld [vmem:[#allocation23_spill] sm:$0xff] }
 0x18c   : > { %v768_v48 = vmul.f32 %v3889_v4, %v698_v45  ;;  %v1293_v56 = vmax.f32 %v1261_v25, 0.0  ;;  %v1794_v34 = vadd.f32 %v1762_v63, %v1726_v33  ;;  %v6371_v25 = vld [vmem:[#allocation27_spill] sm:$0xff]  ;;  %v4672_v13 = vmul.f32 %v4132_v51, %v4470_v50 }
 0x18d   : > { %v1260_v43 = vadd.f32 3.0, %v1228_v37  ;;  %3454 = vset.pattern.permute.xlu1 %v6283_v20  ;;  %v2100_v41 = vsel %vm2077_vm2, %v2027_v46, %v6368_v0  ;;  %v1861_v45 = vadd.f32 %v6371_v25, %v1793_v35  ;;  %v2259_v61 = vmul.f32 %v4181_v18, %v4565_v53  ;;  %v6372_v2 = vld [vmem:[#allocation31_spill] sm:$0xff]  ;;  %v4696_v0 = vld [vmem:[#allocation2 + $0xd0] sm:$0xff] }
 0x18e   : > { %v800_v3 = vadd.f32 %v768_v48, %v6367_v62  ;;  %572 = vperm.xlu1 %3454, %v4640_v5   ;;  %v1325_v9 = vmin.f32 %v1293_v56, 6.0  ;;  %v2359_v46 = vadd.f32 %v2358_v38, %v2357_v49  ;;  %v4676_v48 = vld [vmem:[#allocation2 + $0xc8] sm:$0xff]  ;;  %v4680_v55 = vmul.f32 %v3910_v57, %v6372_v2 }
 0x18f   : > { %v1292_v19 = vmax.f32 %v1260_v43, 0.0  ;;  %v1897_v63 = vmul.f32 %v4135_v42, %v4431_v54  ;;  %v2223_v35 = vadd.f32 %v4451_v15, %v2155_v11  ;;  %v2258_v56 = vmul.f32 %v4181_v18, %v2100_v41 }
 0x190   : > { %v4664_v21 = vpop.permute.xlu1 %889  ;;  %v4667_v47 = vadd.f32 %v6369_v14, %v800_v3  ;;  %v1357_v30 = vmul.f32 %v1325_v9, %v1229_v31  ;;  %v2360_v31 = vsel %vm1403_vm0, %v4648_v8, 0.0  ;;  %v4691_v43 = vadd.f32 %v4611_v22, %v2289_v32  ;;  %v6374_v3 = vld [vmem:[#allocation41_spill] sm:$0xff] }
 0x191   : > { %v1324_v26 = vmin.f32 %v1292_v19, 6.0  ;;  %v2046_v49 = vrot.slane %v4598_v1, 1  ;;  %v1862_v38 = vadd.f32 %v6374_v3, %v1794_v34  ;;  %v1929_v9 = vadd.f32 %v1897_v63, %v1861_v45 }
 0x192   : > { %6370 = vst [vmem:[#allocation30_spill] sm:$0xff] %v4667_v47  ;;  %3455 = vset.pattern.permute.xlu1 %v6355_v36  ;;  %6373 = vst [vmem:[#allocation21_spill] sm:$0xff] %v4691_v43  ;;  %v1389_v33 = vmul.f32 0.16666667, %v1357_v30  ;;  %v2290_v36 = vadd.f32 %v2258_v56, %v2222_v16  ;;  %v1578_v19 = vrot.slane %v4676_v48, 7  ;;  %v1898_v11 = vmul.f32 %v4135_v42, %v4470_v50  ;;  %v6375_v30 = vld [vmem:[#allocation15_spill] sm:$0xff] }
 0x193   : > { %737 = vperm.xlu1 %3455, %v4640_v5   ;;  %v1356_v62 = vmul.f32 %v1324_v26, %v1228_v37  ;;  %v2361_v32 = vadd.f32 %v2360_v31, %v2359_v46  ;;  %v4704_v14 = vmul.f32 %v4132_v51, %v4431_v54  ;;  %v4709_v16 = vmul.f32 %v4147_v23, %v4565_v53 }
 0x194   : > { %1465 = vst.msk [vmem:[#allocation2 + $0x148] sm:$0xff] %vm1403_vm0, %v1389_v33  ;;  %v1660_v34 = vmul.f32 %v4157_v17, %v4509_v44  ;;  %v2291_v25 = vadd.f32 %v2259_v61, %v2223_v35  ;;  %v1965_v45 = vmul.f32 %v4160_v10, %v4569_v12  ;;  %v2362_v54 = vsel %vm1403_vm0, %v4691_v43, 0.0  ;;  %v3467_v44 = vld [vmem:[%s3564_s22 + $0xe0] sm:$0xff]  ;;  %v6378_v35 = vld [vmem:[#allocation18_spill] sm:$0xff]  ;;  %v6385_v43 = vld [vmem:[#allocation9_spill] sm:$0xff] }
 0x195   : > { %v4698_v15 = vpop.permute.xlu1 %527  ;;  %v1388_v37 = vmul.f32 0.16666667, %v1356_v62  ;;  %v1659_v50 = vmul.f32 %v4157_v17, %v4485_v40  ;;  %v6376_v26 = vrot.slane %v6375_v30, 1  ;;  %v1596_v2 = vrot.slane %v4696_v0, 7 }
 0x196   : > { %v4728_v61 = vadd.f32 %v4611_v22, %v2290_v36  ;;  %v1930_v31 = vadd.f32 %v1898_v11, %v1862_v38  ;;  %v1997_v63 = vadd.f32 %v1965_v45, %v1929_v9  ;;  %v6379_v56 = vrot.slane %v6378_v35, 7  ;;  %v6384_v35 = vld [vmem:[#allocation48_spill] sm:$0xff] }
 0x197   : > { %3456 = vset.pattern.permute.xlu1 %v6281_v24  ;;  %v2083_v46 = vsel %vm2077_vm2, %v2046_v49, %v6376_v26  ;;  %1464 = vst.msk [vmem:[#allocation2 + $0x130] sm:$0xff] %vm1403_vm0, %v1388_v37  ;;  %v4737_v33 = vmul.f32 %v4139_v29, %v2100_v41  ;;  %v2192_v62 = vmul.f32 %v4147_v23, %v2100_v41  ;;  %v694_v41 = vpop.permute.xlu0 %693  ;;  %v2028_v45 = vrot.slane %v4569_v12, 1 }
 0x198   : > { %1121 = vperm.xlu1 %3456, %v3467_v44   ;;  %6377 = vst [vmem:[#allocation12_spill] sm:$0xff] %v4728_v61  ;;  %v4734_v40 = vsel %vm1610_vm3, %v6379_v56, %v1578_v19  ;;  %v2363_v3 = vadd.f32 %v2362_v54, %v2361_v32  ;;  %v1695_v37 = vmul.f32 %v4165_v28, %v4606_v6  ;;  %v2364_v26 = vsel %vm1403_vm0, %v4728_v61, 0.0 }
 0x199   : > { %v4743_v36 = vadd.f32 %v4611_v22, %v2291_v25  ;;  %v4747_v38 = vmul.f32 %v4132_v51, %v4598_v1  ;;  %v4751_v9 = vmul.f32 %v4135_v42, %v4598_v1  ;;  %v1966_v11 = vmul.f32 %v4160_v10, %v4598_v1 }
 0x19a   : > { %v702_v30 = vpop.permute.xlu1 %701  ;;  %v4756_v32 = vmul.f32 %v4147_v23, %v2083_v46  ;;  %v1763_v25 = vmul.f32 %v4185_v60, %v4734_v40  ;;  %v4763_v54 = vsel %vm1610_vm3, %v1578_v19, %v1596_v2  ;;  %v1696_v1 = vmul.f32 %v4165_v28, %v4631_v7  ;;  %v6387_v19 = vld [vmem:[#allocation7_spill] sm:$0xff] }
 0x19b   : > { %6380 = vst [vmem:[#allocation26_spill] sm:$0xff] %v4743_v36  ;;  %6381 = vst [vmem:[#allocation37_spill] sm:$0xff] %v4747_v38  ;;  %v1998_v44 = vadd.f32 %v1966_v11, %v1930_v31  ;;  %v2156_v56 = vadd.f32 %v6384_v35, %v1997_v63  ;;  %v2365_v8 = vadd.f32 %v2364_v26, %v2363_v3  ;;  %v6386_v38 = vld [vmem:[#allocation32_spill] sm:$0xff]  ;;  %v4796_v26 = vld [vmem:[#allocation2 + $0x138] sm:$0xff] }
 0x19c   : > { %6382 = vst [vmem:[#allocation36_spill] sm:$0xff] %v4756_v32  ;;  %6383 = vst [vmem:[#allocation28_spill] sm:$0xff] %v4763_v54  ;;  %3457 = vset.pattern.permute.xlu1 %v6283_v20  ;;  %v1727_v39 = vadd.f32 %v1695_v37, %v1659_v50  ;;  %v767_v52 = vmul.f32 %v3889_v4, %v694_v41  ;;  %v603_v2 = vmul.f32 %v6387_v19, %v6386_v38  ;;  %v4788_v37 = vld [vmem:[#allocation2 + $0xe8] sm:$0xff]  ;;  %v6390_v38 = vld [vmem:[#allocation39_spill] sm:$0xff] }
 0x19d   : > { %577 = vperm.xlu1 %3457, %v6385_v43   ;;  %v2366_v20 = vsel %vm1403_vm0, %v4743_v36, 0.0  ;;  %v2261_v61 = vmul.f32 %v4181_v18, %v2083_v46  ;;  %v4780_v32 = vmul.f32 %v4139_v29, %v4565_v53  ;;  %v1764_v31 = vmul.f32 %v4185_v60, %v4763_v54  ;;  %v4784_v43 = vld [vmem:[#allocation2 + $0x140] sm:$0xff]  ;;  %v6392_v41 = vld [vmem:[#allocation8_spill] sm:$0xff]  ;;  %6393 = vst [vmem:[#allocation33_spill] sm:$0xff] %v4796_v26  ;;  %v6394_v36 = vld [vmem:[#allocation46_spill] sm:$0xff] }
 0x19e   : > { %6389 = vst [vmem:[#allocation45_spill] sm:$0xff] %v4784_v43  ;;  %v2101_v63 = vsel %vm2077_vm2, %v2028_v45, %v2046_v49  ;;  %v1795_v3 = vadd.f32 %v1763_v25, %v1727_v39  ;;  %v4792_v11 = vmul.f32 %v3910_v57, %v6390_v38  ;;  %v963_v53 = vmul.f32 %v6392_v41, %v4664_v21  ;;  %v6395_v49 = vld [vmem:[#allocation3_spill] sm:$0xff] }
 0x19f   : > { %6388 = vst [vmem:[#allocation16_spill] sm:$0xff] %v4780_v32  ;;  %v1086_v50 = vpop.permute.xlu1 %1085  ;;  %v1728_v35 = vadd.f32 %v1696_v1, %v1660_v34  ;;  %v2157_v32 = vadd.f32 %v6394_v36, %v1998_v44  ;;  %v2224_v54 = vadd.f32 %v2192_v62, %v2156_v56  ;;  %v4800_v47 = vmul.f32 %v4139_v29, %v2083_v46  ;;  %v706_v34 = vpop.permute.xlu0 %705  ;;  %v4882_v1 = vld [vmem:[#allocation2 + $0xf0] sm:$0xff] }
 0x1a0   : > { %6391 = vst [vmem:[#allocation35_spill] sm:$0xff] %v4792_v11  ;;  %v4803_v39 = vadd.f32 %v2366_v20, %v2365_v8  ;;  %v4807_v45 = vmul.f32 %v3910_v57, %v6395_v49  ;;  %v799_v25 = vadd.f32 %v767_v52, %v603_v2  ;;  %v2260_v36 = vmul.f32 %v4181_v18, %v2101_v63 }
 0x1a1   : > { %3459 = vset.pattern.permute.xlu1 %v6280_v27  ;;  %v1579_v62 = vrot.slane %v4788_v37, 7  ;;  %v1796_v46 = vadd.f32 %v1764_v31, %v1728_v35  ;;  %v4816_v27 = vmul.f32 %v4132_v51, %v4569_v12  ;;  %v1863_v8 = vadd.f32 %v4704_v14, %v1795_v3 }
 0x1a2   : > { %6396 = vst [vmem:[#allocation40_spill] sm:$0xff] %v4807_v45  ;;  %933 = vperm.xlu1 %3459, %v4640_v5   ;;  %v995_v44 = vadd.f32 %v963_v53, %v799_v25  ;;  %v1159_v52 = vmul.f32 %v3910_v57, %v1086_v50  ;;  %v1899_v2 = vmul.f32 %v4135_v42, %v4569_v12  ;;  %v4836_v53 = vld [vmem:[#allocation2 + $0x160] sm:$0xff]  ;;  %v6406_v45 = vld [vmem:[#allocation20_spill] sm:$0xff] }
 0x1a3   : > { %v2225_v20 = vadd.f32 %v4709_v16, %v2157_v32  ;;  %v2292_v38 = vadd.f32 %v2260_v36, %v2224_v54  ;;  %v4826_v31 = vmul.f32 %v3889_v4, %v706_v34  ;;  %v1661_v35 = vmul.f32 %v4157_v17, %v4606_v6  ;;  %6397 = vst [vmem:[#allocation25_spill] sm:$0xff] %v4836_v53  ;;  %v6398_v16 = vld [vmem:[#allocation19_spill] sm:$0xff] }
 0x1a4   : > { %v4820_v56 = vpop.permute.xlu1 %532  ;;  %v4832_v14 = vmul.f32 %v4157_v17, %v4631_v7  ;;  %v769_v50 = vmul.f32 %v3889_v4, %v702_v30  ;;  %v1191_v3 = vadd.f32 %v1159_v52, %v995_v44  ;;  %v2194_v12 = vmul.f32 %v4147_v23, %v2101_v63  ;;  %v6400_v54 = vld [vmem:[#allocation43_spill] sm:$0xff] }
 0x1a5   : > { %v6399_v32 = vrot.slane %v6398_v16, 7  ;;  %v4848_v7 = vmul.f32 %v4139_v29, %v2101_v63  ;;  %v1864_v30 = vadd.f32 %v4672_v13, %v1796_v46  ;;  %v1931_v49 = vadd.f32 %v1899_v2, %v1863_v8 }
 0x1a6   : > { %3460 = vset.pattern.permute.xlu1 %v6281_v24  ;;  %v1697_v24 = vmul.f32 %v4165_v28, %v4734_v40  ;;  %v605_v25 = vmul.f32 %v6387_v19, %v4698_v15  ;;  %v1230_v34 = vadd.f32 %v4535_v58, %v1191_v3  ;;  %v4858_v36 = vadd.f32 %v4611_v22, %v2292_v38 }
 0x1a7   : > { %v4845_v6 = vsel %vm1610_vm3, %v6399_v32, %v1579_v62  ;;  %1125 = vperm.xlu1 %3460, %v6400_v54   ;;  %v1967_v63 = vmul.f32 %v4160_v10, %v4676_v48  ;;  %v2293_v46 = vadd.f32 %v2261_v61, %v2225_v20  ;;  %v4868_v15 = vmul.f32 %v4132_v51, %v4676_v48 }
 0x1a8   : > { %6401 = vst [vmem:[#allocation23_spill] sm:$0xff] %v4858_v36  ;;  %v1765_v52 = vmul.f32 %v4185_v60, %v4845_v6  ;;  %v801_v16 = vadd.f32 %v769_v50, %v605_v25  ;;  %v1262_v8 = vadd.f32 3.0, %v1230_v34  ;;  %v1901_v38 = vmul.f32 %v4135_v42, %v4676_v48 }
 0x1a9   : > { %v898_v44 = vpop.permute.xlu1 %897  ;;  %v1932_v3 = vadd.f32 %v4751_v9, %v1864_v30  ;;  %v2047_v32 = vrot.slane %v4696_v0, 1  ;;  %v1999_v61 = vadd.f32 %v1967_v63, %v1931_v49  ;;  %v1729_v20 = vadd.f32 %v1697_v24, %v1661_v35 }
 0x1aa   : > { %v965_v2 = vmul.f32 %v6392_v41, %v898_v44  ;;  %v1294_v54 = vmax.f32 %v1262_v8, 0.0  ;;  %v4877_v25 = vmul.f32 %v4157_v17, %v4734_v40  ;;  %v2029_v44 = vrot.slane %v4676_v48, 1 }
 0x1ab   : > { %1129 = vperm.xlu1 %3460, %v4640_v5   ;;  %v1968_v13 = vmul.f32 %v4160_v10, %v4696_v0  ;;  %v4885_v9 = vadd.f32 %v4611_v22, %v2293_v46  ;;  %v2368_v5 = vsel %vm1403_vm0, %v4858_v36, 0.0  ;;  %v1797_v35 = vadd.f32 %v1765_v52, %v1729_v20 }
 0x1ac   : > { %v997_v50 = vadd.f32 %v965_v2, %v801_v16  ;;  %v1326_v30 = vmin.f32 %v1294_v54, 6.0  ;;  %v4892_v40 = vmul.f32 %v4132_v51, %v4696_v0  ;;  %v4896_v63 = vsel %vm2077_vm2, %v2029_v44, %v2047_v32  ;;  %v3468_v16 = vld [vmem:[%s3564_s22 + $0xf8] sm:$0xff] }
 0x1ad   : > { %6402 = vst [vmem:[#allocation27_spill] sm:$0xff] %v4885_v9  ;;  %v2000_v48 = vadd.f32 %v1968_v13, %v1932_v3  ;;  %v2158_v8 = vadd.f32 %v4737_v33, %v1999_v61  ;;  %v1597_v52 = vrot.slane %v4882_v1, 7  ;;  %v2369_v20 = vadd.f32 %v2368_v5, %v4803_v39  ;;  %v6403_v54 = vld [vmem:[#allocation30_spill] sm:$0xff]  ;;  %v6404_v5 = vld [vmem:[#allocation28_spill] sm:$0xff] }
 0x1ae   : > { %v1193_v24 = vadd.f32 %v4680_v55, %v997_v50  ;;  %v1090_v49 = vpop.permute.xlu1 %1089  ;;  %v1358_v2 = vmul.f32 %v1326_v30, %v1230_v34  ;;  %v4906_v13 = vmul.f32 %v4132_v51, %v4788_v37  ;;  %v4910_v3 = vmul.f32 %v4135_v42, %v4788_v37  ;;  %v4916_v34 = vld [vmem:[#allocation2 + $0x108] sm:$0xff] }
 0x1af   : > { %v1160_v46 = vmul.f32 %v3910_v57, %v1090_v49  ;;  %1133 = vperm.xlu1 %3460, %v3468_v16   ;;  %v1865_v44 = vadd.f32 %v4816_v27, %v1797_v35  ;;  %v2262_v33 = vmul.f32 %v4181_v18, %v4896_v63  ;;  %v1969_v39 = vmul.f32 %v4160_v10, %v4788_v37  ;;  %v6405_v49 = vld [vmem:[#allocation16_spill] sm:$0xff] }
 0x1b0   : > { %v1232_v55 = vadd.f32 %v4535_v58, %v1193_v24  ;;  %v1390_v61 = vmul.f32 0.16666667, %v1358_v2  ;;  %v1698_v24 = vmul.f32 %v4165_v28, %v6404_v5  ;;  %v2159_v16 = vadd.f32 %v6405_v49, %v2000_v48 }
 0x1b1   : > { %v1192_v50 = vadd.f32 %v1160_v46, %v6403_v54  ;;  %v2226_v54 = vadd.f32 %v2194_v12, %v2158_v8  ;;  %v4928_v27 = vsel %vm1610_vm3, %v1579_v62, %v1597_v52  ;;  %v2030_v36 = vrot.slane %v4788_v37, 1  ;;  %v6408_v62 = vld [vmem:[#allocation34_spill] sm:$0xff] }
 0x1b2   : > { %v1264_v30 = vadd.f32 3.0, %v1232_v55  ;;  %1466 = vst.msk [vmem:[#allocation2 + $0x150] sm:$0xff] %vm1403_vm0, %v1390_v61  ;;  %v6407_v53 = vrot.slane %v6406_v45, 1  ;;  %v1580_v12 = vrot.slane %v4916_v34, 7  ;;  %v4941_v61 = vmul.f32 %v4135_v42, %v4696_v0 }
 0x1b3   : > { %v1231_v21 = vadd.f32 %v4535_v58, %v1192_v50  ;;  %v710_v46 = vpop.permute.xlu1 %709  ;;  %v1933_v50 = vadd.f32 %v1901_v38, %v1865_v44  ;;  %v2294_v49 = vadd.f32 %v2262_v33, %v2226_v54  ;;  %v1766_v37 = vmul.f32 %v4185_v60, %v4928_v27  ;;  %v6410_v33 = vld [vmem:[#allocation24_spill] sm:$0xff] }
 0x1b4   : > { %v1296_v35 = vmax.f32 %v1264_v30, 0.0  ;;  %v771_v2 = vmul.f32 %v3889_v4, %v710_v46  ;;  %v2084_v48 = vsel %vm2077_vm2, %v2047_v32, %v6407_v53  ;;  %v6409_v30 = vld [vmem:[#allocation36_spill] sm:$0xff]  ;;  %v1699_v53 = vmul.f32 %v4165_v28, %v4845_v6 }
 0x1b5   : > { %v1263_v8 = vadd.f32 3.0, %v1231_v21  ;;  %v2227_v46 = vadd.f32 %v6409_v30, %v2159_v16  ;;  %v1730_v32 = vadd.f32 %v1698_v24, %v4832_v14  ;;  %v2263_v0 = vmul.f32 %v4181_v18, %v2084_v48  ;;  %v4956_v16 = vld [vmem:[#allocation2 + $0x110] sm:$0xff] }
 0x1b6   : > { %v1328_v26 = vmin.f32 %v1296_v35, 6.0  ;;  %v803_v52 = vadd.f32 %v771_v2, %v6408_v62  ;;  %v2048_v35 = vrot.slane %v4882_v1, 1  ;;  %v6412_v2 = vld [vmem:[#allocation47_spill] sm:$0xff]  ;;  %v2001_v14 = vadd.f32 %v1969_v39, %v1933_v50 }
 0x1b7   : > { %v1295_v45 = vmax.f32 %v1263_v8, 0.0  ;;  %v6413_v62 = vrot.slane %v6412_v2, 7  ;;  %v1731_v43 = vadd.f32 %v1699_v53, %v4877_v25  ;;  %v2196_v39 = vmul.f32 %v4147_v23, %v4896_v63 }
 0x1b8   : > { %v1360_v38 = vmul.f32 %v1328_v26, %v1232_v55  ;;  %v4949_v44 = vpop.permute.xlu1 %901  ;;  %v4952_v54 = vadd.f32 %v6410_v33, %v803_v52  ;;  %v4966_v26 = vmul.f32 %v4157_v17, %v4845_v6  ;;  %v4969_v55 = vadd.f32 %v4611_v22, %v2294_v49 }
 0x1b9   : > { %v4962_v8 = vsel %vm1610_vm3, %v6413_v62, %v1580_v12  ;;  %v1327_v30 = vmin.f32 %v1295_v45, 6.0  ;;  %v1664_v52 = vmul.f32 %v4157_v17, %v6404_v5  ;;  %v2295_v33 = vadd.f32 %v2263_v0, %v2227_v46  ;;  %v6417_v0 = vld [vmem:[#allocation37_spill] sm:$0xff] }
 0x1ba   : > { %6411 = vst [vmem:[#allocation31_spill] sm:$0xff] %v4952_v54  ;;  %6414 = vst [vmem:[#allocation41_spill] sm:$0xff] %v4969_v55  ;;  %v1392_v24 = vmul.f32 0.16666667, %v1360_v38  ;;  %v1798_v54 = vadd.f32 %v1766_v37, %v1730_v32  ;;  %v4975_v62 = vmul.f32 %v4139_v29, %v2084_v48  ;;  %v1598_v45 = vrot.slane %v4956_v16, 7  ;;  %v4996_v37 = vld [vmem:[#allocation2 + $0x158] sm:$0xff] }
 0x1bb   : > { %v1359_v2 = vmul.f32 %v1327_v30, %v1231_v21  ;;  %v1767_v6 = vmul.f32 %v4185_v60, %v4962_v8  ;;  %v4985_v5 = vsel %vm2077_vm2, %v2030_v36, %v2048_v35  ;;  %v2370_v25 = vsel %vm1403_vm0, %v4885_v9, 0.0 }
 0x1bc   : > { %6415 = vst [vmem:[#allocation15_spill] sm:$0xff] %v4975_v62  ;;  %1468 = vst.msk [vmem:[#allocation2 + $0x170] sm:$0xff] %vm1403_vm0, %v1392_v24  ;;  %v2160_v49 = vadd.f32 %v4848_v7, %v2001_v14  ;;  %v4994_v46 = vsel %vm1610_vm3, %v1580_v12, %v1598_v45  ;;  %v2371_v53 = vadd.f32 %v2370_v25, %v2369_v20  ;;  %v2372_v32 = vsel %vm1403_vm0, %v4969_v55, 0.0  ;;  %v718_v7 = vpop.permute.xlu0 %717  ;;  %v2427_v12 = vld [vmem:[%s6186_s5] sm:$0xff]  ;;  %v2428_v20 = vld [vmem:[%s6186_s5 + $0x8] sm:$0xff] }
 0x1bd   : > { %v1391_v21 = vmul.f32 0.16666667, %v1359_v2  ;;  %v4987_v50 = vpop.permute.xlu1 %542  ;;  %v5001_v36 = vadd.f32 %v4611_v22, %v2295_v33  ;;  %v1700_v38 = vmul.f32 %v4165_v28, %v4928_v27  ;;  %v1866_v30 = vadd.f32 %v6417_v0, %v1798_v54  ;;  %v5013_v14 = vld [vmem:[#allocation2 + $0x178] sm:$0xff]  ;;  %v5026_v0 = vld [vmem:[#allocation2 + $0x130] sm:$0xff] }
 0x1be   : > { %6418 = vst [vmem:[#allocation48_spill] sm:$0xff] %v5013_v14  ;;  %v2264_v24 = vmul.f32 %v4181_v18, %v4985_v5  ;;  %v1799_v33 = vadd.f32 %v1767_v6, %v1731_v43  ;;  %v3484_v2 = vmov 0.0|0.0   ;;  %v3351_v54 = vpack.c.bf16 %v2428_v20, %v2427_v12  ;;  %v5031_v12 = vld [vmem:[#allocation2 + $0x128] sm:$0xff]  ;;  %v5143_v14 = vld [vmem:[#allocation2 + $0x180] sm:$0xff] }
 0x1bf   : > { %6416 = vst [vmem:[#allocation18_spill] sm:$0xff] %v5001_v36  ;;  %1467 = vst.msk [vmem:[#allocation2 + $0x168] sm:$0xff] %vm1403_vm0, %v1391_v21  ;;  %3350 = vmatprep.subr.bf16.mxu0 %v3484_v2  ;;  %v5018_v45 = vmul.f32 %v4147_v23, %v2084_v48  ;;  %v5022_v21 = vmul.f32 %v4139_v29, %v4896_v63  ;;  %v1768_v25 = vmul.f32 %v4185_v60, %v4994_v46  ;;  %v6419_v55 = vmov 0.0  }
 0x1c0   : > { %3290 = vmatprep.mubr.msk.f32.mxu0 %vm3485_vm4, %v6419_v55  ;;  %v2228_v6 = vadd.f32 %v2196_v39, %v2160_v49  ;;  %v5034_v20 = vmul.f32 %v3889_v4, %v718_v7  ;;  %3352 = vmatpush3.bf16.msra.mxu0 %v3351_v54  ;;  %v2373_v2 = vadd.f32 %v2372_v32, %v2371_v53  ;;  %v2374_v43 = vsel %vm1403_vm0, %v5001_v36, 0.0  ;;  %v6420_v39 = vld [vmem:[#allocation22_spill] sm:$0xff] }
 0x1c1   : > { %v1732_v9 = vadd.f32 %v1700_v38, %v1664_v52  ;;  %v1934_v11 = vadd.f32 %v4941_v61, %v1866_v30  ;;  %v606_v62 = vmul.f32 %v6387_v19, %v4820_v56  ;;  %3293 = vmatprep.subr.mxu0 %v6419_v55  ;;  %v6421_v49 = vrot.slane %v6420_v39, 1  ;;  %6427 = vst [vmem:[#allocation32_spill] sm:$0xff] %v5143_v14 }
 0x1c2   : > { %v714_v48 = vpop.permute.xlu1 %713  ;;  %v2296_v54 = vadd.f32 %v2264_v24, %v2228_v6  ;;  %v1867_v63 = vadd.f32 %v4868_v15, %v1799_v33  ;;  %v1599_v52 = vrot.slane %v5026_v0, 7  ;;  %v1970_v61 = vmul.f32 %v4160_v10, %v4882_v1 }
 0x1c3   : > { %v2085_v7 = vsel %vm2077_vm2, %v2048_v35, %v6421_v49  ;;  %v1800_v53 = vadd.f32 %v1768_v25, %v1732_v9  ;;  %v1581_v56 = vrot.slane %v5031_v12, 7  ;;  %v966_v32 = vmul.f32 %v6392_v41, %v4949_v44 }
 0x1c4   : > { %v1666_v38 = vmul.f32 %v4157_v17, %v4928_v27  ;;  %v1838_v35 = vmul.f32 %v4132_v51, %v4882_v1  ;;  %v1904_v15 = vmul.f32 %v4135_v42, %v4882_v1  ;;  %v2375_v30 = vadd.f32 %v2374_v43, %v2373_v2  ;;  %v6423_v2 = vld [vmem:[#allocation49_spill] sm:$0xff] }
 0x1c5   : > { %v2002_v24 = vadd.f32 %v1970_v61, %v1934_v11  ;;  %v5061_v33 = vmul.f32 %v4147_v23, %v2085_v7  ;;  %v2265_v9 = vmul.f32 %v4181_v18, %v2085_v7  ;;  %v802_v25 = vadd.f32 %v4826_v31, %v606_v62 }
 0x1c6   : > { %v5066_v44 = vadd.f32 %v4611_v22, %v2296_v54  ;;  %v1935_v27 = vadd.f32 %v4910_v3, %v1867_v63  ;;  %v5071_v39 = vsel %vm1610_vm3, %v1581_v56, %v1599_v52  ;;  %v1702_v11 = vmul.f32 %v4165_v28, %v4994_v46 }
 0x1c7   : > { %v1098_v6 = vpop.permute.xlu1 %1097  ;;  %v1868_v43 = vadd.f32 %v4892_v40, %v1800_v53  ;;  %v6424_v49 = vrot.slane %v6423_v2, 7  ;;  %v998_v62 = vadd.f32 %v966_v32, %v802_v25  ;;  %v2198_v3 = vmul.f32 %v4147_v23, %v4985_v5 }
 0x1c8   : > { %6422 = vst [vmem:[#allocation9_spill] sm:$0xff] %v5066_v44  ;;  %v1162_v1 = vmul.f32 %v3910_v57, %v1098_v6  ;;  %v1701_v63 = vmul.f32 %v4165_v28, %v4962_v8  ;;  %v1971_v54 = vmul.f32 %v4160_v10, %v4916_v34  ;;  %v5091_v52 = vmul.f32 %v4139_v29, %v4985_v5 }
 0x1c9   : > { %v5081_v31 = vsel %vm1610_vm3, %v6424_v49, %v1581_v56  ;;  %v2161_v40 = vadd.f32 %v4800_v47, %v2002_v24  ;;  %v5095_v61 = vmul.f32 %v4139_v29, %v2085_v7  ;;  %v1770_v53 = vmul.f32 %v4185_v60, %v5071_v39 }
 0x1ca   : > { %v1194_v56 = vadd.f32 %v1162_v1, %v998_v62  ;;  %v5101_v32 = vmul.f32 %v4132_v51, %v4916_v34  ;;  %v1905_v25 = vmul.f32 %v4135_v42, %v4916_v34  ;;  %v2003_v6 = vadd.f32 %v1971_v54, %v1935_v27 }
 0x1cb   : > { %v1769_v5 = vmul.f32 %v4185_v60, %v5081_v31  ;;  %v1734_v47 = vadd.f32 %v1702_v11, %v1666_v38  ;;  %v1936_v7 = vadd.f32 %v1904_v15, %v1868_v43  ;;  %v2376_v1 = vsel %vm1403_vm0, %v5066_v44, 0.0 }
 0x1cc   : > { %v5107_v2 = vpop.permute.xlu1 %547  ;;  %v1233_v24 = vadd.f32 %v4535_v58, %v1194_v56  ;;  %v2049_v49 = vrot.slane %v4956_v16, 1  ;;  %v1733_v62 = vadd.f32 %v1701_v63, %v4966_v26  ;;  %v2031_v36 = vrot.slane %v4916_v34, 1 }
 0x1cd   : > { %v772_v27 = vmul.f32 %v3889_v4, %v714_v48  ;;  %v2229_v54 = vadd.f32 %v5018_v45, %v2161_v40  ;;  %v1972_v55 = vmul.f32 %v4160_v10, %v4956_v16  ;;  %v1802_v38 = vadd.f32 %v1770_v53, %v1734_v47  ;;  %v5130_v45 = vld [vmem:[#allocation2 + $0x148] sm:$0xff] }
 0x1ce   : > { %v1265_v15 = vadd.f32 3.0, %v1233_v24  ;;  %v2162_v11 = vadd.f32 %v5022_v21, %v2003_v6  ;;  %v1801_v43 = vadd.f32 %v1769_v5, %v1733_v62  ;;  %v608_v56 = vmul.f32 %v6387_v19, %v4987_v50  ;;  %v6425_v53 = vld [vmem:[#allocation44_spill] sm:$0xff] }
 0x1cf   : > { %v5122_v44 = vadd.f32 %v2376_v1, %v2375_v30  ;;  %v5126_v34 = vmul.f32 %v4132_v51, %v4956_v16  ;;  %v1906_v26 = vmul.f32 %v4135_v42, %v4956_v16  ;;  %v2004_v40 = vadd.f32 %v1972_v55, %v1936_v7 }
 0x1d0   : > { %v1297_v48 = vmax.f32 %v1265_v15, 0.0  ;;  %v6426_v21 = vrot.slane %v6425_v53, 1  ;;  %v1667_v50 = vmul.f32 %v4157_v17, %v4962_v8  ;;  %v804_v30 = vadd.f32 %v772_v27, %v608_v56  ;;  %v6428_v27 = vld [vmem:[#allocation15_spill] sm:$0xff] }
 0x1d1   : > { %v910_v63 = vpop.permute.xlu1 %909  ;;  %v2297_v47 = vadd.f32 %v2265_v9, %v2229_v54  ;;  %v2104_v16 = vsel %vm2077_vm2, %v2031_v36, %v2049_v49  ;;  %v1870_v1 = vadd.f32 %v1838_v35, %v1802_v38  ;;  %v2230_v15 = vadd.f32 %v2198_v3, %v2162_v11  ;;  %v6429_v3 = vld [vmem:[#allocation35_spill] sm:$0xff] }
 0x1d2   : > { %v2086_v6 = vsel %vm2077_vm2, %v2049_v49, %v6426_v21  ;;  %v968_v5 = vmul.f32 %v6392_v41, %v910_v63  ;;  %v1329_v62 = vmin.f32 %v1297_v48, 6.0  ;;  %v1869_v55 = vadd.f32 %v4906_v13, %v1801_v43  ;;  %v6430_v63 = vld [vmem:[#allocation45_spill] sm:$0xff] }
 0x1d3   : > { %v6243_v7 = vrot.slane %v5130_v45, 7  ;;  %v2267_v21 = vmul.f32 %v4181_v18, %v2086_v6  ;;  %v5148_v8 = vmul.f32 %v4157_v17, %v4994_v46  ;;  %v2163_v54 = vadd.f32 %v6428_v27, %v2004_v40 }
 0x1d4   : > { %v1000_v53 = vadd.f32 %v968_v5, %v804_v30  ;;  %v1361_v9 = vmul.f32 %v1329_v62, %v1233_v24  ;;  %v5152_v36 = vmul.f32 %v4139_v29, %v2104_v16  ;;  %v5155_v35 = vmul.f32 %v4147_v23, %v2104_v16 }
 0x1d5   : > { %v2266_v13 = vmul.f32 %v4181_v18, %v2104_v16  ;;  %v1938_v11 = vadd.f32 %v1906_v26, %v1870_v1  ;;  %v1937_v48 = vadd.f32 %v1905_v25, %v1869_v55  ;;  %v6431_v40 = vrot.slane %v6430_v63, 7  ;;  %v6432_v1 = vld [vmem:[#allocation31_spill] sm:$0xff] }
 0x1d6   : > { %v1196_v49 = vadd.f32 %v6429_v3, %v1000_v53  ;;  %v1102_v38 = vpop.permute.xlu1 %1101  ;;  %v1393_v43 = vmul.f32 0.16666667, %v1361_v9  ;;  %v1703_v26 = vmul.f32 %v4165_v28, %v5081_v31  ;;  %v1974_v16 = vmul.f32 %v4160_v10, %v5026_v0 }
 0x1d7   : > { %v1163_v56 = vmul.f32 %v3910_v57, %v1102_v38  ;;  %v2298_v24 = vadd.f32 %v2266_v13, %v2230_v15  ;;  %v5167_v30 = vsel %vm1610_vm3, %v6431_v40, %v6243_v7  ;;  %v2231_v62 = vadd.f32 %v5061_v33, %v2163_v54  ;;  %v6435_v7 = vld [vmem:[#allocation38_spill] sm:$0xff] }
 0x1d8   : > { %v1235_v5 = vadd.f32 %v4535_v58, %v1196_v49  ;;  %1469 = vst.msk [vmem:[#allocation2 + $0x188] sm:$0xff] %vm1403_vm0, %v1393_v43  ;;  %v1973_v15 = vmul.f32 %v4160_v10, %v5031_v12  ;;  %v5180_v53 = vmul.f32 %v4139_v29, %v2086_v6  ;;  %v5183_v9 = vadd.f32 %v4611_v22, %v2297_v47 }
 0x1d9   : > { %v1195_v25 = vadd.f32 %v1163_v56, %v6432_v1  ;;  %v1771_v27 = vmul.f32 %v4185_v60, %v5167_v30  ;;  %v2006_v13 = vadd.f32 %v1974_v16, %v1938_v11  ;;  %v2050_v3 = vrot.slane %v5026_v0, 1  ;;  %v5195_v16 = vld [vmem:[#allocation2 + $0x1a0] sm:$0xff] }
 0x1da   : > { %v1267_v55 = vadd.f32 3.0, %v1235_v5  ;;  %6433 = vst [vmem:[#allocation7_spill] sm:$0xff] %v5183_v9  ;;  %v2005_v33 = vadd.f32 %v1973_v15, %v1937_v48  ;;  %v5191_v56 = vadd.f32 %v4611_v22, %v2298_v24  ;;  %v1735_v63 = vadd.f32 %v1703_v26, %v1667_v50  ;;  %6436 = vst [vmem:[#allocation8_spill] sm:$0xff] %v5195_v16  ;;  %v5205_v26 = vld [vmem:[#allocation2 + $0x150] sm:$0xff] }
 0x1db   : > { %v1234_v49 = vadd.f32 %v4535_v58, %v1195_v25  ;;  %v722_v38 = vpop.permute.xlu1 %721  ;;  %v2032_v47 = vrot.slane %v5031_v12, 1  ;;  %v2299_v1 = vadd.f32 %v2267_v21, %v2231_v62  ;;  %v2201_v58 = vmul.f32 %v4147_v23, %v2086_v6 }
 0x1dc   : > { %v1299_v54 = vmax.f32 %v1267_v55, 0.0  ;;  %v774_v43 = vmul.f32 %v3889_v4, %v722_v38  ;;  %6434 = vst [vmem:[#allocation39_spill] sm:$0xff] %v5191_v56  ;;  %v2378_v48 = vsel %vm1403_vm0, %v5183_v9, 0.0  ;;  %v1803_v25 = vadd.f32 %v1771_v27, %v1735_v63  ;;  %v6437_v55 = vld [vmem:[#allocation4_spill] sm:$0xff] }
 0x1dd   : > { %v1266_v40 = vadd.f32 3.0, %v1234_v49  ;;  %v5202_v24 = vsel %vm2077_vm2, %v2032_v47, %v2050_v3  ;;  %v2165_v50 = vadd.f32 %v5095_v61, %v2006_v13  ;;  %v2164_v62 = vadd.f32 %v5091_v52, %v2005_v33  ;;  %v6440_v47 = vld [vmem:[#allocation33_spill] sm:$0xff] }
 0x1de   : > { %v1331_v46 = vmin.f32 %v1299_v54, 6.0  ;;  %v806_v11 = vadd.f32 %v774_v43, %v6435_v7  ;;  %v2380_v6 = vsel %vm1403_vm0, %v5191_v56, 0.0  ;;  %v730_v54 = vpop.permute.xlu0 %729  ;;  %v5213_v43 = vld [vmem:[#allocation2 + $0x198] sm:$0xff]  ;;  %v5217_v61 = vadd.f32 %v4611_v22, %v2299_v1 }
 0x1df   : > { %v1298_v21 = vmax.f32 %v1266_v40, 0.0  ;;  %6438 = vst [vmem:[#allocation46_spill] sm:$0xff] %v5213_v43  ;;  %v2379_v13 = vadd.f32 %v2378_v48, %v5122_v44  ;;  %v2268_v52 = vmul.f32 %v4181_v18, %v5202_v24  ;;  %v6441_v40 = vrot.slane %v6440_v47, 1 }
 0x1e0   : > { %v1363_v7 = vmul.f32 %v1331_v46, %v1235_v5  ;;  %v914_v15 = vpop.permute.xlu1 %913  ;;  %v5209_v38 = vadd.f32 %v6437_v55, %v806_v11  ;;  %6439 = vst [vmem:[#allocation3_spill] sm:$0xff] %v5217_v61  ;;  %v1600_v46 = vrot.slane %v5205_v26, 7  ;;  %v5223_v5 = vld [vmem:[#allocation2 + $0x168] sm:$0xff]  ;;  %v2233_v55 = vadd.f32 %v2201_v58, %v2165_v50 }
 0x1e1   : > { %v1330_v27 = vmin.f32 %v1298_v21, 6.0  ;;  %v5229_v11 = vsel %vm2077_vm2, %v2050_v3, %v6441_v40  ;;  %v1871_v21 = vadd.f32 %v5101_v32, %v1803_v25  ;;  %v2381_v63 = vadd.f32 %v2380_v6, %v2379_v13 }
 0x1e2   : > { %v1395_v33 = vmul.f32 0.16666667, %v1363_v7  ;;  %v5234_v44 = vmul.f32 %v4132_v51, %v5031_v12  ;;  %v2232_v48 = vadd.f32 %v5155_v35, %v2164_v62  ;;  %v5239_v7 = vmul.f32 %v3889_v4, %v730_v54  ;;  %v742_v25 = vpop.permute.xlu0 %741 }
 0x1e3   : > { %v1362_v1 = vmul.f32 %v1330_v27, %v1234_v49  ;;  %v1907_v3 = vmul.f32 %v4135_v42, %v5031_v12  ;;  %v1583_v32 = vrot.slane %v5223_v5, 7  ;;  %v2269_v50 = vmul.f32 %v4181_v18, %v5229_v11 }
 0x1e4   : > { %1471 = vst.msk [vmem:[#allocation2 + $0x1a8] sm:$0xff] %vm1403_vm0, %v1395_v33  ;;  %6442 = vst [vmem:[#allocation19_spill] sm:$0xff] %v5239_v7  ;;  %v1669_v35 = vmul.f32 %v4157_v17, %v5081_v31  ;;  %v6443_v62 = vrot.slane %v5130_v45, 7  ;;  %v2300_v27 = vadd.f32 %v2268_v52, %v2232_v48  ;;  %v2382_v12 = vsel %vm1403_vm0, %v5217_v61, 0.0  ;;  %v5261_v33 = vld [vmem:[#allocation2 + $0x170] sm:$0xff] }
 0x1e5   : > { %v1394_v49 = vmul.f32 0.16666667, %v1362_v1  ;;  %v5245_v58 = vpop.permute.xlu1 %557  ;;  %v1939_v54 = vadd.f32 %v1907_v3, %v1871_v21  ;;  %v1704_v13 = vmul.f32 %v4165_v28, %v5071_v39  ;;  %v2301_v40 = vadd.f32 %v2269_v50, %v2233_v55  ;;  %v6445_v3 = vld [vmem:[#allocation25_spill] sm:$0xff] }
 0x1e6   : > { %v5255_v6 = vsel %vm1610_vm3, %v6443_v62, %v1600_v46  ;;  %v2383_v31 = vadd.f32 %v2382_v12, %v2381_v63  ;;  %v5266_v1 = vmul.f32 %v4132_v51, %v5130_v45  ;;  %v5270_v52 = vmul.f32 %v4135_v42, %v5130_v45  ;;  %v930_v9 = vpop.permute.xlu0 %929 }
 0x1e7   : > { %1470 = vst.msk [vmem:[#allocation2 + $0x190] sm:$0xff] %vm1403_vm0, %v1394_v49  ;;  %v1975_v46 = vmul.f32 %v4160_v10, %v5130_v45  ;;  %v2033_v21 = vrot.slane %v5130_v45, 1  ;;  %v1705_v48 = vmul.f32 %v4165_v28, %v5167_v30  ;;  %v5279_v55 = vmul.f32 %v4132_v51, %v5026_v0 }
 0x1e8   : > { %6444 = vst [vmem:[#allocation43_spill] sm:$0xff] %v5266_v1  ;;  %v1772_v63 = vmul.f32 %v4185_v60, %v5255_v6  ;;  %v6446_v49 = vrot.slane %v6445_v3, 7  ;;  %v5291_v62 = vmul.f32 %v4157_v17, %v5167_v30  ;;  %v1601_v45 = vrot.slane %v5261_v33, 7 }
 0x1e9   : > { %v609_v12 = vmul.f32 %v6387_v19, %v5107_v2  ;;  %v5297_v61 = vadd.f32 %v4611_v22, %v2300_v27  ;;  %v2007_v56 = vadd.f32 %v1975_v46, %v1939_v54  ;;  %v1736_v3 = vadd.f32 %v1704_v13, %v5148_v8 }
 0x1ea   : > { %v5287_v50 = vsel %vm1610_vm3, %v6446_v49, %v1583_v32  ;;  %v726_v47 = vpop.permute.xlu1 %725  ;;  %v1908_v49 = vmul.f32 %v4135_v42, %v5026_v0  ;;  %v5303_v43 = vadd.f32 %v4611_v22, %v2301_v40  ;;  %v1670_v30 = vmul.f32 %v4157_v17, %v5071_v39 }
 0x1eb   : > { %6447 = vst [vmem:[#allocation30_spill] sm:$0xff] %v5297_v61  ;;  %v5309_v2 = vsel %vm1610_vm3, %v1583_v32, %v1601_v45  ;;  %v1773_v27 = vmul.f32 %v4185_v60, %v5287_v50  ;;  %v969_v54 = vmul.f32 %v6392_v41, %v914_v15  ;;  %v1706_v8 = vmul.f32 %v4165_v28, %v5255_v6 }
 0x1ec   : > { %6448 = vst [vmem:[#allocation28_spill] sm:$0xff] %v5303_v43  ;;  %v1804_v0 = vadd.f32 %v1772_v63, %v1736_v3  ;;  %v1737_v13 = vadd.f32 %v1705_v48, %v1669_v35  ;;  %v5317_v22 = vmul.f32 %v3889_v4, %v742_v25  ;;  %v805_v40 = vadd.f32 %v5034_v20, %v609_v12  ;;  %v938_v35 = vpop.permute.xlu0 %937  ;;  %v5331_v48 = vld [vmem:[#allocation2 + $0x1b8] sm:$0xff] }
 0x1ed   : > { %v5321_v39 = vmul.f32 %v6392_v41, %v930_v9  ;;  %v5325_v32 = vmul.f32 %v4139_v29, %v5202_v24  ;;  %v2384_v15 = vsel %vm1403_vm0, %v5297_v61, 0.0  ;;  %v1774_v46 = vmul.f32 %v4185_v60, %v5309_v2  ;;  %6451 = vst [vmem:[#allocation34_spill] sm:$0xff] %v5331_v48 }
 0x1ee   : > { %6449 = vst [vmem:[#allocation16_spill] sm:$0xff] %v5317_v22  ;;  %v5335_v20 = vmul.f32 %v4139_v29, %v5229_v11  ;;  %v2166_v9 = vadd.f32 %v5152_v36, %v2007_v56  ;;  %v2386_v25 = vsel %vm1403_vm0, %v5303_v43, 0.0  ;;  %v2051_v45 = vrot.slane %v5205_v26, 1  ;;  %v5342_v22 = vld [vmem:[#allocation2 + $0x1d8] sm:$0xff]  ;;  %v5350_v56 = vld [vmem:[#allocation2 + $0x1c0] sm:$0xff] }
 0x1ef   : > { %6450 = vst [vmem:[#allocation20_spill] sm:$0xff] %v5321_v39  ;;  %v1110_v63 = vpop.permute.xlu1 %1109  ;;  %v1805_v12 = vadd.f32 %v1773_v27, %v1737_v13  ;;  %v1001_v3 = vadd.f32 %v969_v54, %v805_v40  ;;  %6452 = vst [vmem:[#allocation36_spill] sm:$0xff] %v5342_v22  ;;  %v1738_v39 = vadd.f32 %v1706_v8, %v1670_v30 }
 0x1f0   : > { %v1165_v61 = vmul.f32 %v3910_v57, %v1110_v63  ;;  %v1872_v7 = vadd.f32 %v5126_v34, %v1804_v0  ;;  %v2202_v1 = vmul.f32 %v4147_v23, %v5202_v24  ;;  %v2385_v16 = vadd.f32 %v2384_v15, %v2383_v31  ;;  %6454 = vst [vmem:[#allocation47_spill] sm:$0xff] %v5350_v56 }
 0x1f1   : > { %v5348_v36 = vmul.f32 %v6392_v41, %v938_v35  ;;  %v5355_v54 = vmul.f32 %v4147_v23, %v5229_v11  ;;  %v1806_v13 = vadd.f32 %v1774_v46, %v1738_v39  ;;  %v1873_v24 = vadd.f32 %v5234_v44, %v1805_v12  ;;  %v5405_v12 = vld [vmem:[#allocation2 + $0x1e0] sm:$0xff] }
 0x1f2   : > { %v1197_v14 = vadd.f32 %v1165_v61, %v1001_v3  ;;  %v2234_v34 = vadd.f32 %v2202_v1, %v2166_v9  ;;  %v5358_v8 = vadd.f32 %v2386_v25, %v2385_v16  ;;  %v5364_v61 = vld [vmem:[%s6183_s2] ss:$0 sm:$0xff]  ;;  %v6455_v11 = vrot.slane %v4996_v37, 1 }
 0x1f3   : > { %6453 = vst [vmem:[#allocation24_spill] sm:$0xff] %v5348_v36  ;;  %v2106_v16 = vsel %vm2077_vm2, %v2033_v21, %v2051_v45  ;;  %v5377_v44 = vmul.f32 %v4132_v51, %v5205_v26  ;;  %v1910_v1 = vmul.f32 %v4135_v42, %v5205_v26  ;;  %v1940_v39 = vadd.f32 %v1908_v49, %v1872_v7 }
 0x1f4   : > { %v1236_v31 = vadd.f32 %v5364_v61, %v1197_v14  ;;  %v5367_v0 = vpop.permute.xlu1 %562  ;;  %v2088_v40 = vsel %vm2077_vm2, %v2051_v45, %v6455_v11  ;;  %v5384_v15 = vmul.f32 %v4157_v17, %v5255_v6  ;;  %v1976_v37 = vmul.f32 %v4160_v10, %v5205_v26 }
 0x1f5   : > { %v775_v46 = vmul.f32 %v3889_v4, %v726_v47  ;;  %v1874_v63 = vadd.f32 %v5279_v55, %v1806_v13  ;;  %v5391_v35 = vmul.f32 %v4139_v29, %v2106_v16  ;;  %v5394_v9 = vmul.f32 %v4139_v29, %v2088_v40 }
 0x1f6   : > { %v1268_v21 = vadd.f32 3.0, %v1236_v31  ;;  %v5397_v7 = vmul.f32 %v4147_v23, %v2106_v16  ;;  %v1941_v6 = vadd.f32 %v5270_v52, %v1873_v24  ;;  %v611_v49 = vmul.f32 %v6387_v19, %v5245_v58 }
 0x1f7   : > { %6456 = vst [vmem:[#allocation37_spill] sm:$0xff] %v5391_v35  ;;  %6457 = vst [vmem:[#allocation22_spill] sm:$0xff] %v5394_v9  ;;  %v2270_v47 = vmul.f32 %v4181_v18, %v2106_v16  ;;  %v2008_v25 = vadd.f32 %v1976_v37, %v1940_v39  ;;  %v1978_v55 = vmul.f32 %v4160_v10, %v5261_v33  ;;  %v1550_v16 = vld [vmem:[#allocation2 + $0x220] sm:$0xff]  ;;  %v5414_v39 = vld [vmem:[#allocation2 + $0x228] sm:$0xff] }
 0x1f8   : > { %v1300_v26 = vmax.f32 %v1268_v21, 0.0  ;;  %v5408_v3 = vmul.f32 %v4147_v23, %v2088_v40  ;;  %v2271_v13 = vmul.f32 %v4181_v18, %v2088_v40  ;;  %v1977_v52 = vmul.f32 %v4160_v10, %v5223_v5  ;;  %v5416_v37 = vld [vmem:[#allocation2 + $0x230] sm:$0xff]  ;;  %v5418_v21 = vld [vmem:[#allocation2 + $0x200] sm:$0xff] }
 0x1f9   : > { %v922_v45 = vpop.permute.xlu1 %921  ;;  %v807_v24 = vadd.f32 %v775_v46, %v611_v49  ;;  %6458 = vst [vmem:[#allocation49_spill] sm:$0xff] %v5418_v21  ;;  %v5422_v30 = vmul.f32 %v4132_v51, %v5261_v33  ;;  %v5426_v40 = vmul.f32 %v4135_v42, %v5261_v33  ;;  %v1942_v27 = vadd.f32 %v1910_v1, %v1874_v63 }
 0x1fa   : > { %v1332_v58 = vmin.f32 %v1300_v26, 6.0  ;;  %v971_v11 = vmul.f32 %v6392_v41, %v922_v45  ;;  %v2052_v46 = vrot.slane %v5261_v33, 1  ;;  %v2009_v49 = vadd.f32 %v1977_v52, %v1941_v6 }
 0x1fb   : > { %6459 = vst [vmem:[#allocation44_spill] sm:$0xff] %v5422_v30  ;;  %v2302_v14 = vadd.f32 %v2270_v47, %v2234_v34  ;;  %v1571_v22 = vrot.slane %v1550_v16, 7  ;;  %v1589_v36 = vrot.slane %v5414_v39, 7  ;;  %v1607_v48 = vrot.slane %v5416_v37, 7  ;;  %v6460_v30 = vld [vmem:[#allocation40_spill] sm:$0xff] }
 0x1fc   : > { %v1364_v26 = vmul.f32 %v1332_v58, %v1236_v31  ;;  %v1003_v45 = vadd.f32 %v971_v11, %v807_v24  ;;  %v2167_v1 = vadd.f32 %v5180_v53, %v2008_v25  ;;  %v5437_v33 = vmul.f32 %v4132_v51, %v5223_v5  ;;  %v5440_v31 = vld [vmem:[#allocation2 + $0x188] sm:$0xff]  ;;  %v5454_v24 = vld [vmem:[#allocation2 + $0x190] sm:$0xff] }
 0x1fd   : > { %v2034_v34 = vrot.slane %v5223_v5, 1  ;;  %v2010_v6 = vadd.f32 %v1978_v55, %v1942_v27  ;;  %v1707_v47 = vmul.f32 %v4165_v28, %v5287_v50  ;;  %v2168_v25 = vadd.f32 %v5325_v32, %v2009_v49  ;;  %v5480_v49 = vld [vmem:[#allocation2 + $0x1a8] sm:$0xff] }
 0x1fe   : > { %v1396_v9 = vmul.f32 0.16666667, %v1364_v26  ;;  %v1199_v35 = vadd.f32 %v6460_v30, %v1003_v45  ;;  %v1114_v4 = vpop.permute.xlu1 %1113  ;;  %v5447_v30 = vmul.f32 %v4135_v42, %v5223_v5  ;;  %v1708_v52 = vmul.f32 %v4165_v28, %v5309_v2  ;;  %6461 = vst [vmem:[#allocation15_spill] sm:$0xff] %v5480_v49 }
 0x1ff   : > { %v1166_v63 = vmul.f32 %v3910_v57, %v1114_v4  ;;  %v1628_v27 = vsel %vm1610_vm3, %v1589_v36, %v1607_v48  ;;  %v1646_v5 = vsel %vm1610_vm3, %v1571_v22, %v1589_v36  ;;  %v1584_v55 = vrot.slane %v5440_v31, 7 }
 0x200   : > { %1472 = vst.msk [vmem:[#allocation2 + $0x1b0] sm:$0xff] %vm1403_vm0, %v1396_v9  ;;  %v1238_v53 = vadd.f32 %v5364_v61, %v1199_v35  ;;  %v5464_v35 = vmul.f32 %v4157_v17, %v5287_v50  ;;  %v2235_v32 = vadd.f32 %v5355_v54, %v2167_v1  ;;  %v2107_v22 = vsel %vm2077_vm2, %v2034_v34, %v2052_v46  ;;  %v6463_v1 = vld [vmem:[#allocation48_spill] sm:$0xff] }
 0x201   : > { %v1198_v4 = vadd.f32 %v1166_v63, %v5209_v38  ;;  %v5472_v38 = vmul.f32 %v4157_v17, %v5309_v2  ;;  %v2169_v48 = vadd.f32 %v5335_v20, %v2010_v6  ;;  %v1602_v36 = vrot.slane %v5454_v24, 7  ;;  %v6465_v6 = vld [vmem:[#allocation32_spill] sm:$0xff] }
 0x202   : > { %v1270_v9 = vadd.f32 3.0, %v1238_v53  ;;  %v1739_v50 = vadd.f32 %v1707_v47, %v5291_v62  ;;  %v2236_v54 = vadd.f32 %v5397_v7, %v2168_v25  ;;  %v1740_v45 = vadd.f32 %v1708_v52, %v5384_v15  ;;  %v1553_v15 = vld [vmem:[#allocation2 + $0x238] sm:$0xff] }
 0x203   : > { %v1237_v58 = vadd.f32 %v5364_v61, %v1198_v4  ;;  %v5468_v11 = vpop.permute.xlu1 %733  ;;  %v5484_v2 = vmul.f32 %v4185_v60, %v1646_v5  ;;  %v6464_v63 = vrot.slane %v6463_v1, 1  ;;  %v6466_v4 = vrot.slane %v6465_v6, 7 }
 0x204   : > { %v1302_v16 = vmax.f32 %v1270_v9, 0.0  ;;  %v2272_v7 = vmul.f32 %v4181_v18, %v2107_v22  ;;  %v2303_v47 = vadd.f32 %v2271_v13, %v2235_v32  ;;  %v5498_v52 = vmul.f32 %v4185_v60, %v1628_v27 }
 0x205   : > { %v1269_v26 = vadd.f32 3.0, %v1237_v58  ;;  %6462 = vst [vmem:[#allocation35_spill] sm:$0xff] %v5484_v2  ;;  %v2089_v20 = vsel %vm2077_vm2, %v2052_v46, %v6464_v63  ;;  %v5494_v62 = vsel %vm1610_vm3, %v6466_v4, %v1584_v55  ;;  %v2237_v5 = vadd.f32 %v5408_v3, %v2169_v48  ;;  %v5504_v46 = vld [vmem:[%s6185_s4] ss:$0 sm:$0xff] }
 0x206   : > { %v1334_v34 = vmin.f32 %v1302_v16, 6.0  ;;  %6467 = vst [vmem:[#allocation45_spill] sm:$0xff] %v5498_v52  ;;  %v5507_v9 = vadd.f32 %v5504_v46, %v2302_v14  ;;  %v1585_v16 = vrot.slane %v5480_v49, 7  ;;  %v5512_v13 = vsel %vm1610_vm3, %v1584_v55, %v1602_v36 }
 0x207   : > { %v1301_v25 = vmax.f32 %v1269_v26, 0.0  ;;  %v2304_v27 = vadd.f32 %v2272_v7, %v2236_v54  ;;  %v1775_v3 = vmul.f32 %v4185_v60, %v5494_v62  ;;  %v2040_v48 = vrot.slane %v5414_v39, 1  ;;  %v6470_v7 = vld [vmem:[#allocation8_spill] sm:$0xff] }
 0x208   : > { %6468 = vst [vmem:[#allocation31_spill] sm:$0xff] %v5507_v9  ;;  %v1366_v1 = vmul.f32 %v1334_v34, %v1238_v53  ;;  %v926_v63 = vpop.permute.xlu1 %925  ;;  %v2273_v26 = vmul.f32 %v4181_v18, %v2089_v20  ;;  %v2058_v14 = vrot.slane %v5416_v37, 1  ;;  %v2076_v4 = vrot.slane %v1553_v15, 1 }
 0x209   : > { %v1333_v32 = vmin.f32 %v1301_v25, 6.0  ;;  %v5520_v53 = vadd.f32 %v5504_v46, %v2303_v47  ;;  %v1776_v55 = vmul.f32 %v4185_v60, %v5512_v13  ;;  %v5525_v36 = vmul.f32 %v4139_v29, %v2107_v22 }
 0x20a   : > { %v1398_v6 = vmul.f32 0.16666667, %v1366_v1  ;;  %v2305_v54 = vadd.f32 %v2273_v26, %v2237_v5  ;;  %v6471_v25 = vrot.slane %v6470_v7, 7  ;;  %v5535_v15 = vmul.f32 %v4139_v29, %v2089_v20  ;;  %v5544_v5 = vld [vmem:[#allocation2 + $0x1f8] sm:$0xff] }
 0x20b   : > { %6469 = vst [vmem:[#allocation38_spill] sm:$0xff] %v5520_v53  ;;  %v1365_v34 = vmul.f32 %v1333_v32, %v1237_v58  ;;  %v5538_v58 = vadd.f32 %v5504_v46, %v2304_v27  ;;  %v2388_v47 = vsel %vm1403_vm0, %v5507_v9, 0.0  ;;  %6473 = vst [vmem:[#allocation33_spill] sm:$0xff] %v5544_v5  ;;  %v1709_v26 = vmul.f32 %v4165_v28, %v5494_v62 }
 0x20c   : > { %1474 = vst.msk [vmem:[#allocation2 + $0x1d0] sm:$0xff] %vm1403_vm0, %v1398_v6  ;;  %v5532_v1 = vsel %vm1610_vm3, %v6471_v25, %v1585_v16  ;;  %v1807_v6 = vadd.f32 %v1775_v3, %v1739_v50  ;;  %v5549_v7 = vmul.f32 %v4147_v23, %v2107_v22  ;;  %v5551_v25 = vld [vmem:[#allocation2 + $0x1b0] sm:$0xff]  ;;  %v2095_v27 = vsel %vm2077_vm2, %v2058_v14, %v2076_v4  ;;  %v5563_v50 = vld [vmem:[#allocation2 + $0x218] sm:$0xff] }
 0x20d   : > { %6472 = vst [vmem:[#allocation4_spill] sm:$0xff] %v5538_v58  ;;  %v1397_v32 = vmul.f32 0.16666667, %v1365_v34  ;;  %v5542_v56 = vpop.permute.xlu1 %572  ;;  %v2113_v43 = vsel %vm2077_vm2, %v2040_v48, %v2058_v14  ;;  %v5558_v34 = vmul.f32 %v4147_v23, %v2089_v20  ;;  %v2390_v9 = vsel %vm1403_vm0, %v5520_v53, 0.0  ;;  %6474 = vst [vmem:[#allocation25_spill] sm:$0xff] %v5563_v50 }
 0x20e   : > { %v1777_v22 = vmul.f32 %v4185_v60, %v5532_v1  ;;  %v1808_v3 = vadd.f32 %v1776_v55, %v1740_v45  ;;  %v5568_v52 = vadd.f32 %v5504_v46, %v2305_v54  ;;  %v2389_v4 = vadd.f32 %v2388_v47, %v5358_v8  ;;  %v6478_v54 = vld [vmem:[#allocation43_spill] sm:$0xff] }
 0x20f   : > { %1473 = vst.msk [vmem:[#allocation2 + $0x1c8] sm:$0xff] %vm1403_vm0, %v1397_v32  ;;  %v5573_v20 = vmul.f32 %v4160_v10, %v5414_v39  ;;  %v5577_v48 = vmul.f32 %v4160_v10, %v5416_v37  ;;  %v2392_v32 = vsel %vm1403_vm0, %v5538_v58, 0.0  ;;  %v1603_v45 = vrot.slane %v5551_v25, 7 }
 0x210   : > { %6475 = vst [vmem:[#allocation40_spill] sm:$0xff] %v5568_v52  ;;  %v1741_v55 = vadd.f32 %v1709_v26, %v5464_v35  ;;  %v1875_v53 = vadd.f32 %v6478_v54, %v1807_v6  ;;  %v2391_v8 = vadd.f32 %v2390_v9, %v2389_v4  ;;  %v612_v39 = vmul.f32 %v6387_v19, %v5367_v0  ;;  %v6484_v4 = vld [vmem:[#allocation19_spill] sm:$0xff] }
 0x211   : > { %6476 = vst [vmem:[#allocation48_spill] sm:$0xff] %v5573_v20  ;;  %6477 = vst [vmem:[#allocation32_spill] sm:$0xff] %v5577_v48  ;;  %v5591_v48 = vmul.f32 %v4181_v18, %v2113_v43  ;;  %v5594_v14 = vmul.f32 %v4181_v18, %v2095_v27  ;;  %v1876_v20 = vadd.f32 %v5377_v44, %v1808_v3  ;;  %v5601_v9 = vsel %vm1403_vm0, %v5568_v52, 0.0 }
 0x212   : > { %v5587_v47 = vpop.permute.xlu1 %737  ;;  %v1809_v58 = vadd.f32 %v1777_v22, %v1741_v55  ;;  %v5597_v35 = vadd.f32 %v2392_v32, %v2391_v8  ;;  %6482 = vst [vmem:[#allocation51_spill] sm:$0xff] %v5601_v9  ;;  %v1979_v0 = vmul.f32 %v4160_v10, %v5440_v31  ;;  %v972_v26 = vmul.f32 %v6392_v41, %v926_v63 }
 0x213   : > { %6479 = vst [vmem:[#allocation8_spill] sm:$0xff] %v5591_v48  ;;  %6480 = vst [vmem:[#allocation43_spill] sm:$0xff] %v5594_v14  ;;  %v5608_v43 = vmul.f32 %v4132_v51, %v5440_v31  ;;  %v1913_v6 = vmul.f32 %v4135_v42, %v5440_v31  ;;  %v5612_v27 = vld [vmem:[#allocation2 + $0x1d0] sm:$0xff]  ;;  %v5616_v44 = vsel %vm1610_vm3, %v1585_v16, %v1603_v45  ;;  %v2035_v63 = vrot.slane %v5440_v31, 1  ;;  %v6485_v14 = vld [vmem:[#allocation47_spill] sm:$0xff] }
 0x214   : > { %6481 = vst [vmem:[#allocation50_spill] sm:$0xff] %v5597_v35  ;;  %6483 = vst [vmem:[#allocation52_spill] sm:$0xff] %v5616_v44  ;;  %v1675_v22 = vmul.f32 %v4157_v17, %v5494_v62  ;;  %v1943_v3 = vadd.f32 %v5447_v30, %v1875_v53  ;;  %v808_v32 = vadd.f32 %v6484_v4, %v612_v39  ;;  %v1604_v37 = vrot.slane %v5612_v27, 7 }
 0x215   : > { %v1710_v54 = vmul.f32 %v4165_v28, %v5512_v13  ;;  %v5629_v8 = vmul.f32 %v4135_v42, %v5480_v49  ;;  %v1981_v16 = vmul.f32 %v4160_v10, %v5480_v49  ;;  %v1711_v31 = vmul.f32 %v4165_v28, %v5532_v1 }
 0x216   : > { %v5623_v55 = vld [vmem:[#allocation2 + $0x1c8] sm:$0xff]  ;;  %v1877_v30 = vadd.f32 %v5437_v33, %v1809_v58  ;;  %v1944_v53 = vadd.f32 %v5426_v40, %v1876_v20  ;;  %v1004_v39 = vadd.f32 %v972_v26, %v808_v32  ;;  %v1778_v52 = vmul.f32 %v4185_v60, %v5616_v44 }
 0x217   : > { %v1122_v45 = vpop.permute.xlu1 %1121  ;;  %v1586_v62 = vrot.slane %v5623_v55, 7  ;;  %v6486_v48 = vrot.slane %v6485_v14, 7  ;;  %v2011_v2 = vadd.f32 %v1979_v0, %v1943_v3  ;;  %v2036_v5 = vrot.slane %v5480_v49, 1 }
 0x218   : > { %v1168_v4 = vmul.f32 %v3910_v57, %v1122_v45  ;;  %v2053_v33 = vrot.slane %v5454_v24, 1  ;;  %v1742_v20 = vadd.f32 %v1710_v54, %v5472_v38  ;;  %v1980_v26 = vmul.f32 %v4160_v10, %v5454_v24  ;;  %v6488_v54 = vld [vmem:[#allocation6_spill] sm:$0xff] }
 0x219   : > { %v5646_v50 = vsel %vm1610_vm3, %v6486_v48, %v1586_v62  ;;  %v5652_v58 = vsel %vm1610_vm3, %v1586_v62, %v1604_v37  ;;  %v5659_v14 = vmul.f32 %v4157_v17, %v5532_v1  ;;  %v1712_v48 = vmul.f32 %v4165_v28, %v5616_v44 }
 0x21a   : > { %v1200_v40 = vadd.f32 %v1168_v4, %v1004_v39  ;;  %6487 = vst [vmem:[#allocation19_spill] sm:$0xff] %v5652_v58  ;;  %v1779_v0 = vmul.f32 %v4185_v60, %v5646_v50  ;;  %v1945_v3 = vadd.f32 %v1913_v6, %v1877_v30  ;;  %v1743_v45 = vadd.f32 %v1711_v31, %v1675_v22  ;;  %v6489_v30 = vld [vmem:[#allocation46_spill] sm:$0xff]  ;;  %v6491_v31 = vld [vmem:[#allocation37_spill] sm:$0xff] }
 0x21b   : > { %v1810_v62 = vadd.f32 %v1778_v52, %v1742_v20  ;;  %v2012_v38 = vadd.f32 %v1980_v26, %v1944_v53  ;;  %v777_v39 = vmul.f32 %v6488_v54, %v5468_v11  ;;  %v1676_v1 = vmul.f32 %v4157_v17, %v5512_v13  ;;  %v6493_v17 = vld [vmem:[#allocation22_spill] sm:$0xff] }
 0x21c   : > { %v1239_v32 = vadd.f32 %v5364_v61, %v1200_v40  ;;  %v578_v37 = vpop.permute.xlu1 %577  ;;  %v1780_v4 = vmul.f32 %v4185_v60, %v5652_v58  ;;  %v2108_v21 = vsel %vm2077_vm2, %v2035_v63, %v2053_v33  ;;  %v1848_v6 = vmul.f32 %v4132_v51, %v5454_v24  ;;  %v6492_v58 = vld [vmem:[#allocation44_spill] sm:$0xff]  ;;  %v6494_v51 = vld [vmem:[#allocation42_spill] sm:$0xff] }
 0x21d   : > { %v6490_v22 = vrot.slane %v6489_v30, 1  ;;  %v2170_v11 = vadd.f32 %v6491_v31, %v2011_v2  ;;  %v1744_v53 = vadd.f32 %v1712_v48, %v1676_v1  ;;  %v1811_v40 = vadd.f32 %v1779_v0, %v1743_v45 }
 0x21e   : > { %v1271_v44 = vadd.f32 3.0, %v1239_v32  ;;  %v1914_v13 = vmul.f32 %v4135_v42, %v5454_v24  ;;  %v2013_v20 = vadd.f32 %v1981_v16, %v1945_v3  ;;  %v1878_v63 = vadd.f32 %v6492_v58, %v1810_v62 }
 0x21f   : > { %v2090_v52 = vsel %vm2077_vm2, %v2053_v33, %v6490_v22  ;;  %v2171_v9 = vadd.f32 %v6493_v17, %v2012_v38  ;;  %v2274_v35 = vmul.f32 %v4181_v18, %v2108_v21  ;;  %v809_v30 = vadd.f32 %v777_v39, %v6494_v51  ;;  %v6495_v39 = vld [vmem:[#allocation20_spill] sm:$0xff] }
 0x220   : > { %v1303_v26 = vmax.f32 %v1271_v44, 0.0  ;;  %v1812_v60 = vadd.f32 %v1780_v4, %v1744_v53  ;;  %v2142_v33 = vmul.f32 %v4139_v29, %v2108_v21  ;;  %v5689_v2 = vmul.f32 %v4139_v29, %v2090_v52  ;;  %v6497_v53 = vld [vmem:[#allocation34_spill] sm:$0xff] }
 0x221   : > { %v934_v49 = vpop.permute.xlu1 %933  ;;  %v2054_v24 = vrot.slane %v5551_v25, 1  ;;  %v2208_v44 = vmul.f32 %v4147_v23, %v2108_v21  ;;  %v2238_v16 = vadd.f32 %v5549_v7, %v2170_v11  ;;  %v1879_v17 = vadd.f32 %v5608_v43, %v1811_v40 }
 0x222   : > { %v1335_v48 = vmin.f32 %v1303_v26, 6.0  ;;  %v2172_v58 = vadd.f32 %v5525_v36, %v2013_v20  ;;  %v2209_v51 = vmul.f32 %v4147_v23, %v2090_v52  ;;  %v2275_v0 = vmul.f32 %v4181_v18, %v2090_v52 }
 0x223   : > { %v1946_v45 = vadd.f32 %v1914_v13, %v1878_v63  ;;  %v2239_v62 = vadd.f32 %v5558_v34, %v2171_v9  ;;  %v2306_v38 = vadd.f32 %v2274_v35, %v2238_v16  ;;  %v1005_v1 = vadd.f32 %v6495_v39, %v809_v30 }
 0x224   : > { %v1367_v3 = vmul.f32 %v1335_v48, %v1239_v32  ;;  %v778_v21 = vmul.f32 %v6488_v54, %v5587_v47  ;;  %v1880_v4 = vadd.f32 %v1848_v6, %v1812_v60  ;;  %v1916_v7 = vmul.f32 %v4135_v42, %v5551_v25 }
 0x225   : > { %v615_v36 = vmul.f32 %v6387_v19, %v578_v37  ;;  %v1982_v32 = vmul.f32 %v4160_v10, %v5551_v25  ;;  %v5709_v34 = vsel %vm2077_vm2, %v2036_v5, %v2054_v24  ;;  %v614_v35 = vmul.f32 %v6387_v19, %v5542_v56  ;;  %v6496_v56 = vld [vmem:[#allocation16_spill] sm:$0xff] }
 0x226   : > { %v1399_v43 = vmul.f32 0.16666667, %v1367_v3  ;;  %v1126_v22 = vpop.permute.xlu1 %1125  ;;  %v974_v47 = vmul.f32 %v6392_v41, %v934_v49  ;;  %v1947_v9 = vadd.f32 %v5629_v8, %v1879_v17  ;;  %v2240_v54 = vadd.f32 %v2208_v44, %v2172_v58 }
 0x227   : > { %v1169_v60 = vmul.f32 %v3910_v57, %v1126_v22  ;;  %v2014_v37 = vadd.f32 %v1982_v32, %v1946_v45  ;;  %v2307_v6 = vadd.f32 %v2275_v0, %v2239_v62  ;;  %v5718_v52 = vadd.f32 %v5504_v46, %v2306_v38  ;;  %v6499_v62 = vld [vmem:[#allocation24_spill] sm:$0xff] }
 0x228   : > { %1475 = vst.msk [vmem:[#allocation2 + $0x1e8] sm:$0xff] %vm1403_vm0, %v1399_v43  ;;  %v810_v31 = vadd.f32 %v778_v21, %v614_v35  ;;  %v1948_v11 = vadd.f32 %v1916_v7, %v1880_v4  ;;  %v1983_v19 = vmul.f32 %v4160_v10, %v5623_v55  ;;  %v811_v41 = vadd.f32 %v6496_v56, %v615_v36 }
 0x229   : > { %v1201_v5 = vadd.f32 %v1169_v60, %v1005_v1  ;;  %v1984_v8 = vmul.f32 %v4160_v10, %v5612_v27  ;;  %v6498_v40 = vrot.slane %v6497_v53, 1  ;;  %v2276_v20 = vmul.f32 %v4181_v18, %v5709_v34 }
 0x22a   : > { %v1130_v49 = vpop.permute.xlu1 %1129  ;;  %v1006_v26 = vadd.f32 %v974_v47, %v810_v31  ;;  %v2015_v48 = vadd.f32 %v1983_v19, %v1947_v9  ;;  %v2037_v44 = vrot.slane %v5623_v55, 1  ;;  %v2173_v16 = vadd.f32 %v5535_v15, %v2014_v37  ;;  %v6501_v31 = vld [vmem:[#allocation36_spill] sm:$0xff] }
 0x22b   : > { %v5729_v13 = vsel %vm2077_vm2, %v2054_v24, %v6498_v40  ;;  %v1240_v63 = vadd.f32 %v5364_v61, %v1201_v5  ;;  %v1170_v30 = vmul.f32 %v3910_v57, %v1130_v49  ;;  %v5738_v17 = vadd.f32 %v5504_v46, %v2307_v6 }
 0x22c   : > { %v2396_v24 = vsel %vm1403_vm0, %v5718_v52, 0.0  ;;  %v2016_v3 = vadd.f32 %v1984_v8, %v1948_v11  ;;  %v2210_v45 = vmul.f32 %v4147_v23, %v5709_v34  ;;  %v1007_v38 = vadd.f32 %v6499_v62, %v811_v41  ;;  %v6503_v8 = vld [vmem:[#allocation13_spill] sm:$0xff] }
 0x22d   : > { %v1272_v58 = vadd.f32 3.0, %v1240_v63  ;;  %v1202_v0 = vadd.f32 %v1170_v30, %v1006_v26  ;;  %v2055_v1 = vrot.slane %v5612_v27, 1  ;;  %v2211_v15 = vmul.f32 %v4147_v23, %v5729_v13 }
 0x22e   : > { %v1134_v39 = vpop.permute.xlu1 %1133  ;;  %v2308_v21 = vadd.f32 %v2276_v20, %v2240_v54  ;;  %v2174_v22 = vadd.f32 %v2142_v33, %v2015_v48  ;;  %v1713_v35 = vmul.f32 %v4165_v28, %v5646_v50  ;;  %v2241_v60 = vadd.f32 %v2209_v51, %v2173_v16 }
 0x22f   : > { %v1304_v4 = vmax.f32 %v1272_v58, 0.0  ;;  %v1241_v7 = vadd.f32 %v5364_v61, %v1202_v0  ;;  %v1171_v43 = vmul.f32 %v3910_v57, %v1134_v39  ;;  %v5750_v36 = vld [vmem:[#allocation2 + $0x1e8] sm:$0xff]  ;;  %v5757_v47 = vsel %vm2077_vm2, %v2037_v44, %v2055_v1  ;;  %v6504_v58 = vld [vmem:[#allocation15_spill] sm:$0xff] }
 0x230   : > { %v1587_v32 = vrot.slane %v5750_v36, 7  ;;  %v2175_v6 = vadd.f32 %v5689_v2, %v2016_v3  ;;  %v6500_v57 = vrot.slane %v5405_v12, 7  ;;  %v6502_v5 = vrot.slane %v6501_v31, 1  ;;  %v6506_v3 = vld [vmem:[#allocation50_spill] sm:$0xff] }
 0x231   : > { %v1336_v9 = vmin.f32 %v1304_v4, 6.0  ;;  %v1273_v37 = vadd.f32 3.0, %v1241_v7  ;;  %v1203_v54 = vadd.f32 %v1171_v43, %v1007_v38  ;;  %v2277_v51 = vmul.f32 %v4181_v18, %v5729_v13 }
 0x232   : > { %v5766_v33 = vsel %vm1610_vm3, %v6500_v57, %v1587_v32  ;;  %v2092_v11 = vsel %vm2077_vm2, %v2055_v1, %v6502_v5  ;;  %v5775_v19 = vadd.f32 %v5504_v46, %v2308_v21  ;;  %v2242_v12 = vadd.f32 %v2210_v45, %v2174_v22 }
 0x233   : > { %v1368_v2 = vmul.f32 %v1336_v9, %v1240_v63  ;;  %v1305_v56 = vmax.f32 %v1273_v37, 0.0  ;;  %v1242_v41 = vadd.f32 %v5364_v61, %v1203_v54  ;;  %v1745_v49 = vadd.f32 %v1713_v35, %v5659_v14  ;;  %v6505_v63 = vld [vmem:[#allocation10_spill] sm:$0xff]  ;;  %v6507_v61 = vld [vmem:[#allocation51_spill] sm:$0xff]  ;;  %v6508_v37 = vld [vmem:[#allocation52_spill] sm:$0xff] }
 0x234   : > { %v1781_v53 = vmul.f32 %v6503_v8, %v5766_v33  ;;  %v2278_v40 = vmul.f32 %v4181_v18, %v5757_v47  ;;  %v2309_v20 = vadd.f32 %v2277_v51, %v2241_v60  ;;  %v2243_v44 = vadd.f32 %v2211_v15, %v2175_v6 }
 0x235   : > { %v1400_v26 = vmul.f32 0.16666667, %v1368_v2  ;;  %v1337_v30 = vmin.f32 %v1305_v56, 6.0  ;;  %v1274_v48 = vadd.f32 3.0, %v1242_v41  ;;  %v1849_v0 = vmul.f32 %v6505_v63, %v6504_v58 }
 0x236   : > { %v1813_v16 = vadd.f32 %v1781_v53, %v1745_v49  ;;  %v2395_v45 = vadd.f32 %v6507_v61, %v6506_v3  ;;  %v2398_v14 = vsel %vm1403_vm0, %v5738_v17, 0.0  ;;  %v2279_v39 = vmul.f32 %v4181_v18, %v2092_v11 }
 0x237   : > { %1476 = vst.msk [vmem:[#allocation2 + $0x1f0] sm:$0xff] %vm1403_vm0, %v1400_v26  ;;  %v1369_v62 = vmul.f32 %v1337_v30, %v1241_v7  ;;  %v1306_v38 = vmax.f32 %v1274_v48, 0.0  ;;  %v2310_v1 = vadd.f32 %v2278_v40, %v2242_v12  ;;  %v1917_v15 = vmul.f32 %v4135_v42, %v5623_v55  ;;  %v6509_v7 = vld [vmem:[#allocation11_spill] sm:$0xff] }
 0x238   : > { %v1881_v21 = vadd.f32 %v1849_v0, %v1813_v16  ;;  %v2397_v4 = vadd.f32 %v2396_v24, %v2395_v45  ;;  %v2400_v43 = vsel %vm1403_vm0, %v5775_v19, 0.0  ;;  %v2311_v60 = vadd.f32 %v2279_v39, %v2243_v44 }
 0x239   : > { %v1401_v22 = vmul.f32 0.16666667, %v1369_v62  ;;  %v1338_v35 = vmin.f32 %v1306_v38, 6.0  ;;  %v5796_v9 = vadd.f32 %v5504_v46, %v2309_v20  ;;  %v1678_v54 = vmul.f32 %v6509_v7, %v6508_v37 }
 0x23a   : > { %v1850_v6 = vmul.f32 %v6505_v63, %v5551_v25  ;;  %v1949_v57 = vadd.f32 %v1917_v15, %v1881_v21  ;;  %v2399_v31 = vadd.f32 %v2398_v14, %v2397_v4  ;;  %v2144_v5 = vmul.f32 %v4139_v29, %v5709_v34  ;;  %v6510_v34 = vld [vmem:[#allocation19_spill] sm:$0xff] }
 0x23b   : > { %1477 = vst.msk [vmem:[#allocation2 + $0x208] sm:$0xff] %vm1403_vm0, %v1401_v22  ;;  %v1370_v24 = vmul.f32 %v1338_v35, %v1242_v41  ;;  %v5807_v51 = vmul.f32 %v4139_v29, %v5729_v13  ;;  %v5810_v2 = vadd.f32 %v5504_v46, %v2310_v1  ;;  %v5814_v56 = vmul.f32 %v6505_v63, %v5612_v27 }
 0x23c   : > { %v1918_v25 = vmul.f32 %v4135_v42, %v5612_v27  ;;  %v1985_v41 = vmul.f32 %v4160_v10, %v5750_v36  ;;  %v2401_v12 = vadd.f32 %v2400_v43, %v2399_v31  ;;  %v1714_v53 = vmul.f32 %v4165_v28, %v6510_v34 }
 0x23d   : > { %v1402_v49 = vmul.f32 0.16666667, %v1370_v24  ;;  %v5823_v13 = vadd.f32 %v5504_v46, %v2311_v60  ;;  %v2402_v40 = vsel %vm1403_vm0, %v5796_v9, 0.0  ;;  %v1851_v26 = vmul.f32 %v6505_v63, %v5623_v55 }
 0x23e   : > { %v1544_v20 = vld [vmem:[#allocation2 + $0x1f0] sm:$0xff]  ;;  %v2017_v30 = vadd.f32 %v1985_v41, %v1949_v57  ;;  %v5830_v27 = vmul.f32 %v4139_v29, %v2092_v11  ;;  %v5833_v48 = vmul.f32 %v4147_v23, %v2092_v11  ;;  %v1679_v16 = vmul.f32 %v6509_v7, %v5646_v50 }
 0x23f   : > { %1478 = vst.msk [vmem:[#allocation2 + $0x210] sm:$0xff] %vm1403_vm0, %v1402_v49  ;;  %v1605_v44 = vrot.slane %v1544_v20, 7  ;;  %v1680_v58 = vmul.f32 %v6509_v7, %v6510_v34  ;;  %v2404_v0 = vsel %vm1403_vm0, %v5810_v2, 0.0  ;;  %v1715_v55 = vmul.f32 %v4165_v28, %v5766_v33 }
 0x240   : > { %v2056_v3 = vrot.slane %v1544_v20, 1  ;;  %v5846_v11 = vmul.f32 %v4139_v29, %v5757_v47  ;;  %v2403_v61 = vadd.f32 %v2402_v40, %v2401_v12  ;;  %v1746_v45 = vadd.f32 %v1714_v53, %v1678_v54  ;;  %v6511_v54 = vld [vmem:[#allocation49_spill] sm:$0xff] }
 0x241   : > { %v1626_v50 = vsel %vm1610_vm3, %v1587_v32, %v1605_v44  ;;  %v2212_v14 = vmul.f32 %v4147_v23, %v5757_v47  ;;  %v5856_v62 = vsel %vm1403_vm0, %v5823_v13, 0.0  ;;  %v2038_v1 = vrot.slane %v5750_v36, 1  ;;  %v6513_v40 = vld [vmem:[#allocation33_spill] sm:$0xff] }
 0x242   : > { %v1547_v38 = vld [vmem:[#allocation2 + $0x208] sm:$0xff]  ;;  %v1782_v39 = vmul.f32 %v6503_v8, %v1626_v50  ;;  %v2176_v21 = vadd.f32 %v2144_v5, %v2017_v30  ;;  %v5860_v15 = vadd.f32 %v2404_v0, %v2403_v61  ;;  %v1681_v32 = vmul.f32 %v6509_v7, %v5766_v33 }
 0x243   : > { %v1588_v4 = vrot.slane %v1547_v38, 7  ;;  %v1853_v43 = vmul.f32 %v6505_v63, %v5750_v36  ;;  %v1919_v47 = vmul.f32 %v4135_v42, %v5750_v36  ;;  %v1747_v22 = vadd.f32 %v1715_v55, %v1679_v16 }
 0x244   : > { %v1814_v35 = vadd.f32 %v1782_v39, %v1746_v45  ;;  %v1854_v60 = vmul.f32 %v6505_v63, %v1544_v20  ;;  %v2111_v37 = vsel %vm2077_vm2, %v2038_v1, %v2056_v3  ;;  %v6512_v57 = vrot.slane %v6511_v54, 7  ;;  %v6515_v1 = vld [vmem:[#allocation35_spill] sm:$0xff] }
 0x245   : > { %v1716_v33 = vmul.f32 %v4165_v28, %v1626_v50  ;;  %v1920_v24 = vmul.f32 %v4135_v42, %v1544_v20  ;;  %v1986_v5 = vmul.f32 %v4160_v10, %v1544_v20  ;;  %v2244_v49 = vadd.f32 %v2212_v14, %v2176_v21 }
 0x246   : > { %v1645_v31 = vsel %vm1610_vm3, %v6512_v57, %v1588_v4  ;;  %v1548_v41 = vld [vmem:[#allocation2 + $0x210] sm:$0xff]  ;;  %v1882_v63 = vadd.f32 %v1850_v6, %v1814_v35  ;;  %v1682_v53 = vmul.f32 %v6509_v7, %v1626_v50  ;;  %v6514_v30 = vrot.slane %v6513_v40, 1 }
 0x247   : > { %v1717_v36 = vmul.f32 %v4165_v28, %v1645_v31  ;;  %v1783_v12 = vmul.f32 %v6503_v8, %v1645_v31  ;;  %v1606_v34 = vrot.slane %v1548_v41, 7  ;;  %v2280_v16 = vmul.f32 %v4181_v18, %v2111_v37  ;;  %v6518_v40 = vld [vmem:[#allocation25_spill] sm:$0xff] }
 0x248   : > { %v2093_v44 = vsel %vm2077_vm2, %v2056_v3, %v6514_v30  ;;  %v1921_v20 = vmul.f32 %v4135_v42, %v1547_v38  ;;  %v1950_v61 = vadd.f32 %v1918_v25, %v1882_v63  ;;  %v1748_v6 = vadd.f32 %v1716_v33, %v1680_v58 }
 0x249   : > { %v1749_v0 = vadd.f32 %v1717_v36, %v1681_v32  ;;  %v1815_v55 = vadd.f32 %v1783_v12, %v1747_v22  ;;  %v1627_v45 = vsel %vm1610_vm3, %v1588_v4, %v1606_v34  ;;  %v1987_v14 = vmul.f32 %v4160_v10, %v1547_v38  ;;  %v6516_v36 = vld [vmem:[#allocation45_spill] sm:$0xff] }
 0x24a   : > { %v2057_v39 = vrot.slane %v1548_v41, 1  ;;  %v1718_v7 = vmul.f32 %v4165_v28, %v1627_v45  ;;  %v1784_v50 = vmul.f32 %v6503_v8, %v1627_v45  ;;  %v2018_v35 = vadd.f32 %v1986_v5, %v1950_v61  ;;  %v6520_v61 = vld [vmem:[#allocation32_spill] sm:$0xff] }
 0x24b   : > { %v1817_v3 = vadd.f32 %v6515_v1, %v1749_v0  ;;  %v1883_v21 = vadd.f32 %v1851_v26, %v1815_v55  ;;  %v2039_v32 = vrot.slane %v1547_v38, 1  ;;  %v2148_v22 = vmul.f32 %v4139_v29, %v2111_v37 }
 0x24c   : > { %v2312_v54 = vadd.f32 %v2280_v16, %v2244_v49  ;;  %v1750_v25 = vadd.f32 %v1718_v7, %v1682_v53  ;;  %v1816_v57 = vadd.f32 %v1784_v50, %v1748_v6  ;;  %v1922_v58 = vmul.f32 %v4135_v42, %v1548_v41 }
 0x24d   : > { %v1885_v31 = vadd.f32 %v1853_v43, %v1817_v3  ;;  %v1951_v4 = vadd.f32 %v1919_v47, %v1883_v21  ;;  %v2112_v33 = vsel %vm2077_vm2, %v2039_v32, %v2057_v39  ;;  %v2177_v28 = vadd.f32 %v5807_v51, %v2018_v35  ;;  %v6517_v51 = vld [vmem:[#allocation48_spill] sm:$0xff] }
 0x24e   : > { %v2214_v8 = vmul.f32 %v4147_v23, %v2111_v37  ;;  %v1818_v26 = vadd.f32 %v6516_v36, %v1750_v25  ;;  %v1884_v38 = vadd.f32 %v5814_v56, %v1816_v57  ;;  %v1988_v63 = vmul.f32 %v4160_v10, %v1548_v41  ;;  %v6521_v21 = vld [vmem:[#allocation8_spill] sm:$0xff]  ;;  %v6522_v25 = vld [vmem:[#allocation43_spill] sm:$0xff] }
 0x24f   : > { %v1953_v5 = vadd.f32 %v1921_v20, %v1885_v31  ;;  %v2019_v12 = vadd.f32 %v1987_v14, %v1951_v4  ;;  %v2245_v43 = vadd.f32 %v5833_v48, %v2177_v28  ;;  %v2281_v47 = vmul.f32 %v4181_v18, %v2093_v44 }
 0x250   : > { %v5905_v42 = vadd.f32 %v5504_v46, %v2312_v54  ;;  %v1886_v49 = vadd.f32 %v1854_v60, %v1818_v26  ;;  %v1952_v34 = vadd.f32 %v1920_v24, %v1884_v38  ;;  %v6519_v30 = vrot.slane %v6518_v40, 1 }
 0x251   : > { %v2021_v53 = vadd.f32 %v6517_v51, %v1953_v5  ;;  %v2178_v37 = vadd.f32 %v5846_v11, %v2019_v12  ;;  %v2216_v10 = vmul.f32 %v4147_v23, %v2112_v33  ;;  %v2282_v48 = vmul.f32 %v4181_v18, %v2112_v33  ;;  %v2429_v51 = vld [vmem:[%s6187_s6] sm:$0x1] }
 0x252   : > { %v2094_v56 = vsel %vm2077_vm2, %v2057_v39, %v6519_v30  ;;  %v2313_v41 = vadd.f32 %v2281_v47, %v2245_v43  ;;  %v1954_v16 = vadd.f32 %v1922_v58, %v1886_v49  ;;  %v2020_v0 = vadd.f32 %v1988_v63, %v1952_v34  ;;  %v2504_v34 = vld [vmem:[%s6188_s7] sm:$0xff] }
 0x253   : > { %v2180_v55 = vadd.f32 %v2148_v22, %v2021_v53  ;;  %v2246_v20 = vadd.f32 %v2214_v8, %v2178_v37  ;;  %v2149_v60 = vmul.f32 %v4139_v29, %v2093_v44  ;;  %v2215_v24 = vmul.f32 %v4147_v23, %v2093_v44 }
 0x254   : > { %v5918_v11 = vadd.f32 %v5504_v46, %v2313_v41  ;;  %v2408_v59 = vsel %vm1403_vm0, %v5905_v42, 0.0  ;;  %v2022_v45 = vadd.f32 %v6520_v61, %v1954_v16  ;;  %v2179_v6 = vadd.f32 %v5830_v27, %v2020_v0  ;;  %v2505_v41 = vld [vmem:[%s6189_s8] sm:$0x1]  ;;  %v6524_v61 = vld [vmem:[#allocation5_spill] sm:$0xff] }
 0x255   : > { %v2248_v14 = vadd.f32 %v2216_v10, %v2180_v55  ;;  %v2314_v39 = vadd.f32 %v2282_v48, %v2246_v20  ;;  %v2217_v7 = vmul.f32 %v4147_v23, %v2094_v56  ;;  %v2283_v50 = vmul.f32 %v4181_v18, %v2094_v56  ;;  %v2780_v56 = vld [vmem:[%s6190_s9] sm:$0xff]  ;;  %v2781_v10 = vld [vmem:[%s6190_s9 + $0x8] sm:$0xff] }
 0x256   : > { %v2407_v29 = vadd.f32 %v5856_v62, %v5860_v15  ;;  %v2410_v44 = vsel %vm1403_vm0, %v5918_v11, 0.0  ;;  %v2181_v1 = vadd.f32 %v2149_v60, %v2022_v45  ;;  %v2247_v3 = vadd.f32 %v2215_v24, %v2179_v6  ;;  %v6525_v6 = vld [vmem:[#allocation29_spill] sm:$0xff] }
 0x257   : > { %v2316_v35 = vadd.f32 %v6521_v21, %v2248_v14  ;;  %v5932_v32 = vadd.f32 %v5504_v46, %v2314_v39  ;;  %v6523_v49 = vmov 0.0   ;;  %v3353_v48 = vpack.c.bf16 %v2781_v10, %v2780_v56  ;;  %v6526_v39 = vld [vmem:[#allocation30_spill] sm:$0xff] }
 0x258   : > { %v2409_v27 = vadd.f32 %v2408_v59, %v2407_v29  ;;  %v2249_v22 = vadd.f32 %v2217_v7, %v2181_v1  ;;  %v2315_v54 = vadd.f32 %v2283_v50, %v2247_v3  ;;  %v6527_v50 = vld [vmem:[#allocation14_spill] sm:$0xff]  ;;  %v6529_v3 = vld [vmem:[#allocation17_spill] sm:$0xff] }
 0x259   : > { %v2412_v23 = vsel %vm1403_vm0, %v5932_v32, 0.0  ;;  %v5941_v15 = vadd.f32 %v5504_v46, %v2316_v35  ;;  %3357 = vmatprep.subr.bf16.mxu1 %v3353_v48  ;;  %v6530_v35 = vld [vmem:[#allocation31_spill] sm:$0xff] }
 0x25a   : > { %v2411_v18 = vadd.f32 %v2410_v44, %v2409_v27  ;;  %v2317_v57 = vadd.f32 %v6522_v25, %v2249_v22  ;;  %v5938_v62 = vadd.f32 %v5504_v46, %v2315_v54  ;;  %3358 = vmatpush3.bf16.msra.mxu1 %v3353_v48  ;;  %v6528_v44 = vld [vmem:[#allocation28_spill] sm:$0xff]  ;;  %v6531_v22 = vld [vmem:[#allocation21_spill] sm:$0xff] }
 0x25b   : > { %v2416_v28 = vsel %vm1403_vm0, %v5941_v15, 0.0 }
 0x25c   : > { %v2413_v31 = vadd.f32 %v2412_v23, %v2411_v18  ;;  %v5944_v4 = vadd.f32 %v5504_v46, %v2317_v57  ;;  %v2414_v58 = vsel %vm1403_vm0, %v5938_v62, 0.0  ;;  %v6532_v23 = vld [vmem:[#allocation38_spill] sm:$0xff] }
 0x25e   : > { %v2415_v33 = vadd.f32 %v2414_v58, %v2413_v31  ;;  %v2418_v36 = vsel %vm1403_vm0, %v5944_v4, 0.0 }
 0x260   : > { %v2417_v8 = vadd.f32 %v2416_v28, %v2415_v33 }
 0x262   : > { %v2419_v26 = vadd.f32 %v2418_v36, %v2417_v8 }
 0x264   : > { %v2420_v38 = vrot.slane %v2419_v26, 4 }
 0x266   : > { %v2421_v5 = vadd.f32 %v2420_v38, %v2419_v26 }
 0x268   : > { %v2422_v12 = vrot.slane %v2421_v5, 2 }
 0x26a   : > { %v2423_v63 = vadd.f32 %v2422_v12, %v2421_v5 }
 0x26c   : > { %v2424_v43 = vrot.slane %v2423_v63, 1 }
 0x26e   : > { %v2425_v47 = vadd.f32 %v2424_v43, %v2423_v63 }
 0x270   : > { %v2426_v46 = vmul.f32 0.00390625, %v2425_v47 }
 0x272   : > { %3291 = vmatmul.mubr.msk.f32.vlgmr.msra.gmra.mrb[0].mxu0 %vm1403_vm0, %v2426_v46 }
 0x273   : > { %3295 = vmatprep.mubr.msk.f32.mxu0 %vm3485_vm4, %v6523_v49  ;;  %3294 = vmatpush3.msra.mxu0 %v2504_v34 }
 0x274   : > { %3354 = vmatprep.subr.bf16.mxu0 %v3353_v48 }
 0x345   : > { %v2499_v53 = vpop.f32.mrb[0].mxu0 }
 0x346   : > { %v2500_v37 = vadd.f32 %v2499_v53, %v2429_v51  ;;  %v3292_v40 = vpop.f32.mrb[1].mxu0 }
 0x348   : > { %v2503_v30 = vmax.f32 %v2500_v37, 0.0 }
 0x34a   : > { %3296 = vmatmul.mubr.msk.f32.vlgmr.msra.gmra.mrb[2].mxu0 %vm2506_vm5, %v2503_v30 }
 0x34b   : > { %3356 = vmatpush3.bf16.msra.mxu0 %v3353_v48 }
 0x41d   : > { %v2576_v16 = vpop.f32.mrb[2].mxu0 }
 0x41e   : > { %v2577_v0 = vadd.f32 %v2576_v16, %v2505_v41  ;;  %v3297_v55 = vpop.f32.mrb[3].mxu0 }
 0x420   : > { %v2580_v20 = vadd.f32 3.0, %v2577_v0 }
 0x422   : > { %v2581_v60 = vmax.f32 %v2580_v20, 0.0 }
 0x424   : > { %v2582_v24 = vmin.f32 %v2581_v60, 6.0 }
 0x426   : > { %v2583_v59 = vmul.f32 0.16666667, %v2582_v24 }
 0x428   : > { %v5972_v45 = vrot.slane %v2583_v59, %v6524_v61 }
 0x42a   : > { %v2588_v14 = vmul.f32 %v5972_v45, %v6525_v6  ;;  %v2602_v7 = vmul.f32 %v5972_v45, %v6526_v39  ;;  %v2589_v29 = vmul.f32 %v5972_v45, %v6527_v50  ;;  %v2603_v1 = vmul.f32 %v5972_v45, %v6528_v44  ;;  %v6533_v6 = vld [vmem:[#allocation12_spill] sm:$0xff] }
 0x42b   : > { %v2590_v21 = vmul.f32 %v5972_v45, %v6529_v3  ;;  %v2604_v27 = vmul.f32 %v5972_v45, %v6530_v35  ;;  %v2591_v54 = vmul.f32 %v5972_v45, %v6531_v22  ;;  %v2605_v18 = vmul.f32 %v5972_v45, %v6532_v23  ;;  %v6534_v35 = vld [vmem:[#allocation4_spill] sm:$0xff] }
 0x42c   : > { %v2620_v25 = vadd.f32 3.0, %v2588_v14  ;;  %v2634_v57 = vadd.f32 3.0, %v2602_v7  ;;  %v2621_v31 = vadd.f32 3.0, %v2589_v29  ;;  %v2635_v58 = vadd.f32 3.0, %v2603_v1 }
 0x42d   : > { %v2622_v33 = vadd.f32 3.0, %v2590_v21  ;;  %v2636_v28 = vadd.f32 3.0, %v2604_v27  ;;  %v2623_v8 = vadd.f32 3.0, %v2591_v54  ;;  %v2637_v36 = vadd.f32 3.0, %v2605_v18 }
 0x42e   : > { %v2652_v26 = vmax.f32 %v2620_v25, 0.0  ;;  %v2666_v38 = vmax.f32 %v2634_v57, 0.0  ;;  %v2653_v5 = vmax.f32 %v2621_v31, 0.0  ;;  %v2667_v12 = vmax.f32 %v2635_v58, 0.0 }
 0x42f   : > { %v2654_v63 = vmax.f32 %v2622_v33, 0.0  ;;  %v2668_v43 = vmax.f32 %v2636_v28, 0.0  ;;  %v2655_v47 = vmax.f32 %v2623_v8, 0.0  ;;  %v2669_v46 = vmax.f32 %v2637_v36, 0.0  ;;  %v6538_v33 = vld [vmem:[#allocation27_spill] sm:$0xff] }
 0x430   : > { %v2684_v49 = vmin.f32 %v2652_v26, 6.0  ;;  %v2698_v34 = vmin.f32 %v2666_v38, 6.0  ;;  %v2685_v51 = vmin.f32 %v2653_v5, 6.0  ;;  %v2699_v53 = vmin.f32 %v2667_v12, 6.0 }
 0x431   : > { %v2686_v37 = vmin.f32 %v2654_v63, 6.0  ;;  %v2700_v40 = vmin.f32 %v2668_v43, 6.0  ;;  %v2687_v30 = vmin.f32 %v2655_v47, 6.0  ;;  %v2701_v56 = vmin.f32 %v2669_v46, 6.0 }
 0x432   : > { %v2716_v10 = vmul.f32 %v2684_v49, %v2588_v14  ;;  %v2730_v48 = vmul.f32 %v2698_v34, %v2602_v7  ;;  %v2717_v41 = vmul.f32 %v2685_v51, %v2589_v29  ;;  %v2731_v16 = vmul.f32 %v2699_v53, %v2603_v1  ;;  %v6535_v1 = vld [vmem:[#allocation26_spill] sm:$0xff] }
 0x433   : > { %v2718_v0 = vmul.f32 %v2686_v37, %v2590_v21  ;;  %v2732_v55 = vmul.f32 %v2700_v40, %v2604_v27  ;;  %v2719_v20 = vmul.f32 %v2687_v30, %v2591_v54  ;;  %v2733_v60 = vmul.f32 %v2701_v56, %v2605_v18  ;;  %v6536_v54 = vld [vmem:[#allocation40_spill] sm:$0xff]  ;;  %v6537_v18 = vld [vmem:[#allocation23_spill] sm:$0xff] }
 0x434   : > { %v2748_v24 = vmul.f32 0.16666667, %v2716_v10  ;;  %v2762_v59 = vmul.f32 0.16666667, %v2730_v48  ;;  %v2749_v61 = vmul.f32 0.16666667, %v2717_v41  ;;  %v2592_v39 = vmul.f32 %v5972_v45, %v6533_v6 }
 0x435   : > { %v2763_v50 = vmul.f32 0.16666667, %v2731_v16  ;;  %v2750_v44 = vmul.f32 0.16666667, %v2718_v0  ;;  %v2764_v3 = vmul.f32 0.16666667, %v2732_v55  ;;  %v2606_v22 = vmul.f32 %v5972_v45, %v6534_v35 }
 0x436   : > { %3302 = vmatprep.mubr.msk.f32.mxu0 %vm1403_vm0, %v2748_v24  ;;  %3323 = vmatprep.mubr.msk.f32.mxu1 %vm1403_vm0, %v2762_v59  ;;  %v2751_v14 = vmul.f32 0.16666667, %v2719_v20  ;;  %v2765_v7 = vmul.f32 0.16666667, %v2733_v60  ;;  %v2624_v29 = vadd.f32 3.0, %v2592_v39  ;;  %v2593_v21 = vmul.f32 %v5972_v45, %v6535_v1  ;;  %v6540_v1 = vld [vmem:[#allocation18_spill] sm:$0xff] }
 0x437   : > { %3303 = vmatmul.mubr.msk.f32.vlgmr.msra.gmra.mrb[4].mxu0 %vm1403_vm0, %v2749_v61  ;;  %3324 = vmatmul.mubr.msk.f32.vlgmr.msra.gmra.mrb[0].mxu1 %vm1403_vm0, %v2763_v50  ;;  %v2638_v27 = vadd.f32 3.0, %v2606_v22  ;;  %v2607_v23 = vmul.f32 %v5972_v45, %v6536_v54  ;;  %v2594_v25 = vmul.f32 %v5972_v45, %v6537_v18  ;;  %v2608_v57 = vmul.f32 %v5972_v45, %v5718_v52 }
 0x438   : > { %3305 = vmatprep.mubr.msk.f32.mxu0 %vm1403_vm0, %v2750_v44  ;;  %3326 = vmatprep.mubr.msk.f32.mxu1 %vm1403_vm0, %v2764_v3  ;;  %v2656_v31 = vmax.f32 %v2624_v29, 0.0  ;;  %v2625_v58 = vadd.f32 3.0, %v2593_v21  ;;  %v2595_v28 = vmul.f32 %v5972_v45, %v6538_v33  ;;  %v2609_v8 = vmul.f32 %v5972_v45, %v5738_v17 }
 0x439   : > { %v2670_v36 = vmax.f32 %v2638_v27, 0.0  ;;  %v2639_v26 = vadd.f32 3.0, %v2607_v23  ;;  %v2626_v38 = vadd.f32 3.0, %v2594_v25  ;;  %v2640_v5 = vadd.f32 3.0, %v2608_v57 }
 0x43a   : > { %v2688_v12 = vmin.f32 %v2656_v31, 6.0  ;;  %v2657_v63 = vmax.f32 %v2625_v58, 0.0  ;;  %v2627_v43 = vadd.f32 3.0, %v2595_v28  ;;  %v2641_v52 = vadd.f32 3.0, %v2609_v8  ;;  %v6542_v31 = vld [vmem:[#allocation7_spill] sm:$0xff] }
 0x43b   : > { %3306 = vmatmul.mubr.msk.f32.gmra.mrb[6].mxu0 %vm1403_vm0, %v2751_v14  ;;  %3327 = vmatmul.mubr.msk.f32.gmra.mrb[2].mxu1 %vm1403_vm0, %v2765_v7  ;;  %v2702_v47 = vmin.f32 %v2670_v36, 6.0  ;;  %v2671_v46 = vmax.f32 %v2639_v26, 0.0  ;;  %v2658_v49 = vmax.f32 %v2626_v38, 0.0  ;;  %v2672_v34 = vmax.f32 %v2640_v5, 0.0 }
 0x43c   : > { %v2720_v51 = vmul.f32 %v2688_v12, %v2592_v39  ;;  %v2689_v53 = vmin.f32 %v2657_v63, 6.0  ;;  %v2659_v37 = vmax.f32 %v2627_v43, 0.0  ;;  %v2673_v17 = vmax.f32 %v2641_v52, 0.0  ;;  %v6539_v39 = vld [vmem:[#allocation41_spill] sm:$0xff] }
 0x43d   : > { %v2734_v40 = vmul.f32 %v2702_v47, %v2606_v22  ;;  %v2703_v30 = vmin.f32 %v2671_v46, 6.0  ;;  %v2690_v56 = vmin.f32 %v2658_v49, 6.0  ;;  %v2704_v10 = vmin.f32 %v2672_v34, 6.0 }
 0x43e   : > { %v2752_v48 = vmul.f32 0.16666667, %v2720_v51  ;;  %v2721_v41 = vmul.f32 %v2689_v53, %v2593_v21  ;;  %v2691_v16 = vmin.f32 %v2659_v37, 6.0  ;;  %v2705_v0 = vmin.f32 %v2673_v17, 6.0 }
 0x43f   : > { %v2766_v55 = vmul.f32 0.16666667, %v2734_v40  ;;  %v2735_v20 = vmul.f32 %v2703_v30, %v2607_v23  ;;  %v2722_v60 = vmul.f32 %v2690_v56, %v2594_v25  ;;  %v2736_v24 = vmul.f32 %v2704_v10, %v2608_v57  ;;  %v6541_v23 = vld [vmem:[#allocation9_spill] sm:$0xff] }
 0x440   : > { %3308 = vmatprep.mubr.msk.f32.mxu0 %vm1403_vm0, %v2752_v48  ;;  %v2753_v59 = vmul.f32 0.16666667, %v2721_v41  ;;  %v2723_v61 = vmul.f32 %v2691_v16, %v2595_v28  ;;  %v2737_v6 = vmul.f32 %v2705_v0, %v2609_v8  ;;  %v2596_v50 = vmul.f32 %v5972_v45, %v6539_v39 }
 0x441   : > { %3329 = vmatprep.mubr.msk.f32.mxu1 %vm1403_vm0, %v2766_v55  ;;  %v2767_v44 = vmul.f32 0.16666667, %v2735_v20  ;;  %v2754_v3 = vmul.f32 0.16666667, %v2722_v60  ;;  %v2768_v35 = vmul.f32 0.16666667, %v2736_v24  ;;  %v2610_v22 = vmul.f32 %v5972_v45, %v5775_v19 }
 0x442   : > { %3309 = vmatmul.mubr.msk.f32.gmra.mrb[8].mxu0 %vm1403_vm0, %v2753_v59  ;;  %v2755_v14 = vmul.f32 0.16666667, %v2723_v61  ;;  %v2769_v7 = vmul.f32 0.16666667, %v2737_v6  ;;  %v2628_v29 = vadd.f32 3.0, %v2596_v50  ;;  %v2597_v21 = vmul.f32 %v5972_v45, %v6540_v1  ;;  %v6543_v60 = vld [vmem:[#allocation39_spill] sm:$0xff] }
 0x443   : > { %3330 = vmatmul.mubr.msk.f32.gmra.mrb[4].mxu1 %vm1403_vm0, %v2767_v44  ;;  %3311 = vmatprep.mubr.msk.f32.mxu0 %vm1403_vm0, %v2754_v3  ;;  %v2642_v27 = vadd.f32 3.0, %v2610_v22  ;;  %v2611_v54 = vmul.f32 %v5972_v45, %v5796_v9  ;;  %v2598_v18 = vmul.f32 %v5972_v45, %v6541_v23  ;;  %v2612_v19 = vmul.f32 %v5972_v45, %v5810_v2 }
 0x444   : > { %3332 = vmatprep.mubr.msk.f32.mxu1 %vm1403_vm0, %v2768_v35  ;;  %v2660_v25 = vmax.f32 %v2628_v29, 0.0  ;;  %v2629_v57 = vadd.f32 3.0, %v2597_v21  ;;  %v2599_v58 = vmul.f32 %v5972_v45, %v6542_v31  ;;  %v2613_v33 = vmul.f32 %v5972_v45, %v5823_v13  ;;  %v6544_v35 = vld [vmem:[#allocation3_spill] sm:$0xff] }
 0x445   : > { %v2674_v28 = vmax.f32 %v2642_v27, 0.0  ;;  %v2643_v8 = vadd.f32 3.0, %v2611_v54  ;;  %v2630_v36 = vadd.f32 3.0, %v2598_v18  ;;  %v2644_v9 = vadd.f32 3.0, %v2612_v19 }
 0x446   : > { %3312 = vmatmul.mubr.msk.f32.gmra.mrb[10].mxu0 %vm1403_vm0, %v2755_v14  ;;  %v2692_v26 = vmin.f32 %v2660_v25, 6.0  ;;  %v2661_v38 = vmax.f32 %v2629_v57, 0.0  ;;  %v2631_v5 = vadd.f32 3.0, %v2599_v58  ;;  %v2645_v2 = vadd.f32 3.0, %v2613_v33 }
 0x447   : > { %3333 = vmatmul.mubr.msk.f32.gmra.mrb[6].mxu1 %vm1403_vm0, %v2769_v7  ;;  %v2706_v12 = vmin.f32 %v2674_v28, 6.0  ;;  %v2675_v63 = vmax.f32 %v2643_v8, 0.0  ;;  %v2662_v43 = vmax.f32 %v2630_v36, 0.0  ;;  %v2676_v52 = vmax.f32 %v2644_v9, 0.0 }
 0x448   : > { %v2724_v47 = vmul.f32 %v2692_v26, %v2596_v50  ;;  %v2693_v46 = vmin.f32 %v2661_v38, 6.0  ;;  %v2663_v49 = vmax.f32 %v2631_v5, 0.0  ;;  %v2677_v13 = vmax.f32 %v2645_v2, 0.0 }
 0x449   : > { %v2738_v34 = vmul.f32 %v2706_v12, %v2610_v22  ;;  %v2707_v51 = vmin.f32 %v2675_v63, 6.0  ;;  %v2694_v53 = vmin.f32 %v2662_v43, 6.0  ;;  %v2708_v37 = vmin.f32 %v2676_v52, 6.0 }
 0x44a   : > { %v2756_v17 = vmul.f32 0.16666667, %v2724_v47  ;;  %v2725_v40 = vmul.f32 %v2693_v46, %v2597_v21  ;;  %v2695_v30 = vmin.f32 %v2663_v49, 6.0  ;;  %v2709_v56 = vmin.f32 %v2677_v13, 6.0 }
 0x44b   : > { %v2770_v10 = vmul.f32 0.16666667, %v2738_v34  ;;  %v2739_v48 = vmul.f32 %v2707_v51, %v2611_v54  ;;  %v2726_v41 = vmul.f32 %v2694_v53, %v2598_v18  ;;  %v2740_v16 = vmul.f32 %v2708_v37, %v2612_v19 }
 0x44c   : > { %3314 = vmatprep.mubr.msk.f32.mxu0 %vm1403_vm0, %v2756_v17  ;;  %v2757_v0 = vmul.f32 0.16666667, %v2725_v40  ;;  %v2727_v55 = vmul.f32 %v2695_v30, %v2599_v58  ;;  %v2741_v20 = vmul.f32 %v2709_v56, %v2613_v33  ;;  %v2600_v24 = vmul.f32 %v5972_v45, %v6543_v60  ;;  %v6073_v30 = vld [vmem:[%s6191_s10] ss:$0 sm:$0xff] }
 0x44d   : > { %3335 = vmatprep.mubr.msk.f32.mxu1 %vm1403_vm0, %v2770_v10  ;;  %v2771_v59 = vmul.f32 0.16666667, %v2739_v48  ;;  %v2758_v61 = vmul.f32 0.16666667, %v2726_v41  ;;  %v2772_v6 = vmul.f32 0.16666667, %v2740_v16  ;;  %v2614_v39 = vmul.f32 %v5972_v45, %v5905_v42 }
 0x44e   : > { %3315 = vmatmul.mubr.msk.f32.gmra.mrb[12].mxu0 %vm1403_vm0, %v2757_v0  ;;  %v2759_v50 = vmul.f32 0.16666667, %v2727_v55  ;;  %v2773_v44 = vmul.f32 0.16666667, %v2741_v20  ;;  %v2632_v3 = vadd.f32 3.0, %v2600_v24  ;;  %v2601_v22 = vmul.f32 %v5972_v45, %v6544_v35 }
 0x44f   : > { %3336 = vmatmul.mubr.msk.f32.gmra.mrb[8].mxu1 %vm1403_vm0, %v2771_v59  ;;  %3317 = vmatprep.mubr.msk.f32.mxu0 %vm1403_vm0, %v2758_v61  ;;  %v2646_v14 = vadd.f32 3.0, %v2614_v39  ;;  %v2615_v7 = vmul.f32 %v5972_v45, %v5918_v11  ;;  %v2616_v29 = vmul.f32 %v5972_v45, %v5932_v32  ;;  %v2617_v42 = vmul.f32 %v5972_v45, %v5938_v62 }
 0x450   : > { %3338 = vmatprep.mubr.msk.f32.mxu1 %vm1403_vm0, %v2772_v6  ;;  %v2664_v1 = vmax.f32 %v2632_v3, 0.0  ;;  %v2633_v21 = vadd.f32 3.0, %v2601_v22  ;;  %v2618_v27 = vmul.f32 %v5972_v45, %v5941_v15  ;;  %v2619_v54 = vmul.f32 %v5972_v45, %v5944_v4 }
 0x451   : > { %v2678_v23 = vmax.f32 %v2646_v14, 0.0  ;;  %v2647_v18 = vadd.f32 3.0, %v2615_v7  ;;  %v2648_v19 = vadd.f32 3.0, %v2616_v29  ;;  %v2649_v11 = vadd.f32 3.0, %v2617_v42 }
 0x452   : > { %3318 = vmatmul.mubr.msk.f32.gmra.mrb[14].mxu0 %vm1403_vm0, %v2759_v50  ;;  %v2696_v32 = vmin.f32 %v2664_v1, 6.0  ;;  %v2665_v25 = vmax.f32 %v2633_v21, 0.0  ;;  %v2650_v57 = vadd.f32 3.0, %v2618_v27  ;;  %v2651_v62 = vadd.f32 3.0, %v2619_v54 }
 0x453   : > { %3339 = vmatmul.mubr.msk.f32.gmra.mrb[10].mxu1 %vm1403_vm0, %v2773_v44  ;;  %v2710_v31 = vmin.f32 %v2678_v23, 6.0  ;;  %v2679_v58 = vmax.f32 %v2647_v18, 0.0  ;;  %v2680_v33 = vmax.f32 %v2648_v19, 0.0  ;;  %v2681_v28 = vmax.f32 %v2649_v11, 0.0 }
 0x454   : > { %v2728_v15 = vmul.f32 %v2696_v32, %v2600_v24  ;;  %v2697_v8 = vmin.f32 %v2665_v25, 6.0  ;;  %v2682_v36 = vmax.f32 %v2650_v57, 0.0  ;;  %v2683_v4 = vmax.f32 %v2651_v62, 0.0 }
 0x455   : > { %v2742_v45 = vmul.f32 %v2710_v31, %v2614_v39  ;;  %v2711_v9 = vmin.f32 %v2679_v58, 6.0  ;;  %v2712_v26 = vmin.f32 %v2680_v33, 6.0  ;;  %v2713_v38 = vmin.f32 %v2681_v28, 6.0 }
 0x456   : > { %v2760_v5 = vmul.f32 0.16666667, %v2728_v15  ;;  %v2729_v2 = vmul.f32 %v2697_v8, %v2601_v22  ;;  %v2714_v12 = vmin.f32 %v2682_v36, 6.0  ;;  %v2715_v13 = vmin.f32 %v2683_v4, 6.0 }
 0x457   : > { %v2774_v63 = vmul.f32 0.16666667, %v2742_v45  ;;  %v2743_v43 = vmul.f32 %v2711_v9, %v2615_v7  ;;  %v2744_v52 = vmul.f32 %v2712_v26, %v2616_v29  ;;  %v2745_v49 = vmul.f32 %v2713_v38, %v2617_v42 }
 0x458   : > { %3320 = vmatprep.mubr.msk.f32.mxu0 %vm1403_vm0, %v2760_v5  ;;  %v2761_v47 = vmul.f32 0.16666667, %v2729_v2  ;;  %v2746_v51 = vmul.f32 %v2714_v12, %v2618_v27  ;;  %v2747_v37 = vmul.f32 %v2715_v13, %v2619_v54 }
 0x459   : > { %3341 = vmatprep.mubr.msk.f32.mxu1 %vm1403_vm0, %v2774_v63  ;;  %v2775_v46 = vmul.f32 0.16666667, %v2743_v43  ;;  %v2776_v34 = vmul.f32 0.16666667, %v2744_v52  ;;  %v2777_v53 = vmul.f32 0.16666667, %v2745_v49 }
 0x45a   : > { %3321 = vmatmul.mubr.msk.f32.gmra.mrb[16].mxu0 %vm1403_vm0, %v2761_v47  ;;  %v2778_v17 = vmul.f32 0.16666667, %v2746_v51  ;;  %v2779_v40 = vmul.f32 0.16666667, %v2747_v37 }
 0x45b   : > { %3342 = vmatmul.mubr.msk.f32.gmra.mrb[12].mxu1 %vm1403_vm0, %v2775_v46 }
 0x45c   : > { %3344 = vmatprep.mubr.msk.f32.mxu1 %vm1403_vm0, %v2776_v34 }
 0x45f   : > { %3345 = vmatmul.mubr.msk.f32.gmra.mrb[14].mxu1 %vm1403_vm0, %v2777_v53 }
 0x460   : > { %3347 = vmatprep.mubr.msk.f32.mxu1 %vm1403_vm0, %v2778_v17 }
 0x463   : > { %3348 = vmatmul.mubr.msk.f32.gmra.mrb[16].mxu1 %vm1403_vm0, %v2779_v40 }
 0x50a   : > { %v3304_v56 = vpop.f32.mrb[4].mxu0  ;;  %v3325_v10 = vpop.f32.mrb[0].mxu1 }
 0x50b   : > { %v2957_v48 = vadd.f32 %v3304_v56, %v6073_v30  ;;  %v3027_v41 = vadd.f32 %v3325_v10, %v6073_v30  ;;  %v2951_v16 = vpop.f32.mrb[5].mxu0  ;;  %v3021_v0 = vpop.f32.mrb[1].mxu1 }
 0x50c   : > { %v2952_v55 = vadd.f32 %v6073_v30, %v2951_v16  ;;  %v3022_v20 = vadd.f32 %v6073_v30, %v3021_v0 }
 0x50d   : > { %3111 = vst.msk [vmem:[%s6080_s27 + $0x8] sm:$0xff] %vm2506_vm5, %v2957_v48  ;;  %3125 = vst.msk [vmem:[%s6080_s27 + $0x78] sm:$0xff] %vm2506_vm5, %v3027_v41 }
 0x50e   : > { %3110 = vst.msk [vmem:[%s6080_s27] sm:$0xff] %vm2506_vm5, %v2952_v55  ;;  %3124 = vst.msk [vmem:[%s6080_s27 + $0x70] sm:$0xff] %vm2506_vm5, %v3022_v20  ;;  %v3307_v60 = vpop.f32.mrb[6].mxu0  ;;  %v3328_v24 = vpop.f32.mrb[2].mxu1 }
 0x50f   : > { %v2967_v59 = vadd.f32 %v3307_v60, %v6073_v30  ;;  %v3037_v61 = vadd.f32 %v3328_v24, %v6073_v30  ;;  %v2961_v6 = vpop.f32.mrb[7].mxu0  ;;  %v3031_v39 = vpop.f32.mrb[3].mxu1 }
 0x510   : > { %v2962_v50 = vadd.f32 %v6073_v30, %v2961_v6  ;;  %v3032_v44 = vadd.f32 %v6073_v30, %v3031_v39 }
 0x511   : > { %3113 = vst.msk [vmem:[%s6080_s27 + $0x18] sm:$0xff] %vm2506_vm5, %v2967_v59  ;;  %3127 = vst.msk [vmem:[%s6080_s27 + $0x88] sm:$0xff] %vm2506_vm5, %v3037_v61 }
 0x512   : > { %3112 = vst.msk [vmem:[%s6080_s27 + $0x10] sm:$0xff] %vm2506_vm5, %v2962_v50  ;;  %3126 = vst.msk [vmem:[%s6080_s27 + $0x80] sm:$0xff] %vm2506_vm5, %v3032_v44 }
 0x515   : > { %v3310_v3 = vpop.f32.mrb[8].mxu0 }
 0x516   : > { %v2977_v35 = vadd.f32 %v3310_v3, %v6073_v30  ;;  %v3331_v22 = vpop.f32.mrb[4].mxu1  ;;  %v2971_v14 = vpop.f32.mrb[9].mxu0 }
 0x517   : > { %v3047_v7 = vadd.f32 %v3331_v22, %v6073_v30  ;;  %v2972_v29 = vadd.f32 %v6073_v30, %v2971_v14  ;;  %v3041_v42 = vpop.f32.mrb[5].mxu1 }
 0x518   : > { %3115 = vst.msk [vmem:[%s6080_s27 + $0x28] sm:$0xff] %vm2506_vm5, %v2977_v35  ;;  %v3042_v1 = vadd.f32 %v6073_v30, %v3041_v42 }
 0x519   : > { %3129 = vst.msk [vmem:[%s6080_s27 + $0x98] sm:$0xff] %vm2506_vm5, %v3047_v7  ;;  %3114 = vst.msk [vmem:[%s6080_s27 + $0x20] sm:$0xff] %vm2506_vm5, %v2972_v29  ;;  %v3313_v21 = vpop.f32.mrb[10].mxu0 }
 0x51a   : > { %3128 = vst.msk [vmem:[%s6080_s27 + $0x90] sm:$0xff] %vm2506_vm5, %v3042_v1  ;;  %v2987_v27 = vadd.f32 %v3313_v21, %v6073_v30  ;;  %v3334_v54 = vpop.f32.mrb[6].mxu1  ;;  %v2981_v23 = vpop.f32.mrb[11].mxu0 }
 0x51b   : > { %v3057_v18 = vadd.f32 %v3334_v54, %v6073_v30  ;;  %v2982_v19 = vadd.f32 %v6073_v30, %v2981_v23  ;;  %v3051_v11 = vpop.f32.mrb[7].mxu1 }
 0x51c   : > { %3117 = vst.msk [vmem:[%s6080_s27 + $0x38] sm:$0xff] %vm2506_vm5, %v2987_v27  ;;  %v3052_v32 = vadd.f32 %v6073_v30, %v3051_v11 }
 0x51d   : > { %3131 = vst.msk [vmem:[%s6080_s27 + $0xa8] sm:$0xff] %vm2506_vm5, %v3057_v18  ;;  %3116 = vst.msk [vmem:[%s6080_s27 + $0x30] sm:$0xff] %vm2506_vm5, %v2982_v19 }
 0x51e   : > { %3130 = vst.msk [vmem:[%s6080_s27 + $0xa0] sm:$0xff] %vm2506_vm5, %v3052_v32 }
 0x521   : > { %v3316_v25 = vpop.f32.mrb[12].mxu0 }
 0x522   : > { %v2997_v57 = vadd.f32 %v3316_v25, %v6073_v30  ;;  %v3337_v62 = vpop.f32.mrb[8].mxu1  ;;  %v2991_v31 = vpop.f32.mrb[13].mxu0 }
 0x523   : > { %v3067_v58 = vadd.f32 %v3337_v62, %v6073_v30  ;;  %v2992_v33 = vadd.f32 %v6073_v30, %v2991_v31  ;;  %v3061_v28 = vpop.f32.mrb[9].mxu1 }
 0x524   : > { %3119 = vst.msk [vmem:[%s6080_s27 + $0x48] sm:$0xff] %vm2506_vm5, %v2997_v57  ;;  %v3062_v15 = vadd.f32 %v6073_v30, %v3061_v28 }
 0x525   : > { %3133 = vst.msk [vmem:[%s6080_s27 + $0xb8] sm:$0xff] %vm2506_vm5, %v3067_v58  ;;  %3118 = vst.msk [vmem:[%s6080_s27 + $0x40] sm:$0xff] %vm2506_vm5, %v2992_v33  ;;  %v3319_v8 = vpop.f32.mrb[14].mxu0 }
 0x526   : > { %3132 = vst.msk [vmem:[%s6080_s27 + $0xb0] sm:$0xff] %vm2506_vm5, %v3062_v15  ;;  %v3007_v36 = vadd.f32 %v3319_v8, %v6073_v30  ;;  %v3340_v4 = vpop.f32.mrb[10].mxu1  ;;  %v3001_v45 = vpop.f32.mrb[15].mxu0 }
 0x527   : > { %v3077_v9 = vadd.f32 %v3340_v4, %v6073_v30  ;;  %v3002_v26 = vadd.f32 %v6073_v30, %v3001_v45  ;;  %v3071_v38 = vpop.f32.mrb[11].mxu1 }
 0x528   : > { %3121 = vst.msk [vmem:[%s6080_s27 + $0x58] sm:$0xff] %vm2506_vm5, %v3007_v36  ;;  %v3072_v5 = vadd.f32 %v6073_v30, %v3071_v38 }
 0x529   : > { %3135 = vst.msk [vmem:[%s6080_s27 + $0xc8] sm:$0xff] %vm2506_vm5, %v3077_v9  ;;  %3120 = vst.msk [vmem:[%s6080_s27 + $0x50] sm:$0xff] %vm2506_vm5, %v3002_v26 }
 0x52a   : > { %3134 = vst.msk [vmem:[%s6080_s27 + $0xc0] sm:$0xff] %vm2506_vm5, %v3072_v5 }
 0x52d   : > { %v3322_v2 = vpop.f32.mrb[16].mxu0 }
 0x52e   : > { %v3017_v12 = vadd.f32 %v3322_v2, %v6073_v30  ;;  %v3343_v63 = vpop.f32.mrb[12].mxu1  ;;  %v3011_v43 = vpop.f32.mrb[17].mxu0 }
 0x52f   : > { %v3087_v52 = vadd.f32 %v3343_v63, %v6073_v30  ;;  %v3012_v47 = vadd.f32 %v6073_v30, %v3011_v43  ;;  %v3081_v46 = vpop.f32.mrb[13].mxu1 }
 0x530   : > { %3123 = vst.msk [vmem:[%s6080_s27 + $0x68] sm:$0xff] %vm2506_vm5, %v3017_v12  ;;  %v3082_v49 = vadd.f32 %v6073_v30, %v3081_v46 }
 0x531   : > { %3137 = vst.msk [vmem:[%s6080_s27 + $0xd8] sm:$0xff] %vm2506_vm5, %v3087_v52  ;;  %3122 = vst.msk [vmem:[%s6080_s27 + $0x60] sm:$0xff] %vm2506_vm5, %v3012_v47 }
 0x532   : > { %3136 = vst.msk [vmem:[%s6080_s27 + $0xd0] sm:$0xff] %vm2506_vm5, %v3082_v49  ;;  %v3346_v13 = vpop.f32.mrb[14].mxu1 }
 0x533   : > { %v3097_v34 = vadd.f32 %v3346_v13, %v6073_v30  ;;  %v3091_v51 = vpop.f32.mrb[15].mxu1 }
 0x534   : > { %v3092_v53 = vadd.f32 %v6073_v30, %v3091_v51 }
 0x535   : > { %3139 = vst.msk [vmem:[%s6080_s27 + $0xe8] sm:$0xff] %vm2506_vm5, %v3097_v34 }
 0x536   : > { %3138 = vst.msk [vmem:[%s6080_s27 + $0xe0] sm:$0xff] %vm2506_vm5, %v3092_v53  ;;  %v3349_v37 = vpop.f32.mrb[16].mxu1 }
 0x537   : > { %v3107_v17 = vadd.f32 %v3349_v37, %v6073_v30  ;;  %v3101_v40 = vpop.f32.mrb[17].mxu1 }
 0x538   : > { %v3102_v56 = vadd.f32 %v6073_v30, %v3101_v40 }
 0x539   : > { %3141 = vst.msk [vmem:[%s6080_s27 + $0xf8] sm:$0xff] %vm2506_vm5, %v3107_v17 }
 0x53a   : > { %3140 = vst.msk [vmem:[%s6080_s27 + $0xf0] sm:$0xff] %vm2506_vm5, %v3102_v56 }
 0x53b PF: > { %s21_s17 = sadd.s32 1, %s3477_s17  }
 0x53c   : > { %p18_p4 = scmp.ge.s32.totalorder %s21_s17, 4  }
 0x53e   :  { %20 = sbr.rel (!%p18_p4) target bundleno = 1 (0x1), region = 96 }

</bundles_post_ra>
